<compile_context>
chip_gen: v7x
topology: tpu7x:2x2x1
jax: 0.10.0
libtpu: 0.0.40
codegen_flags: <defaults>
</compile_context>

<pallas_src>
import functools

import jax
import jax.numpy as jnp
from jax.experimental import pallas as pl
from jax.experimental.pallas import tpu as pltpu


# Module default: forward(x, cross, x_mask=None, ...) -> no attention mask.
# Set True to apply a causal mask in the decoder self-attention block.
CAUSAL_SELF_ATTENTION = False


# -----------------------------------------------------------------------------
# Fused decoder-layer kernel (one batch tile per grid step)
# -----------------------------------------------------------------------------
def decoder_layer_kernel(
        x_ref, cross_ref,
        # self-attention: fused QKV slab (D,3D) bf16, bias (1,3D) f32, W_o, b_o
        s_wqkv_ref, s_bqkv_ref, s_wo_ref, s_bo_ref,
        # cross-attention: W_q (D,D), b_q, fused KV slab (D,2D), b_kv, W_o, b_o
        c_wq_ref, c_bq_ref, c_wkv_ref, c_bkv_ref, c_wo_ref, c_bo_ref,
        # position-wise FFN (the 1x1 conv pair)
        w1_ref, b1_ref, w2_ref, b2_ref,
        # layer norms
        ln1g_ref, ln1b_ref, ln2g_ref, ln2b_ref, ln3g_ref, ln3b_ref,
        # output
        o_ref,
        *, n_heads, causal):
    f32 = jnp.float32
    bf16 = jnp.bfloat16

    Bt, Lq, D = x_ref.shape
    _, Lk, _ = cross_ref.shape
    H = n_heads
    dh = D // H
    Mq = Bt * Lq
    Mk = Bt * Lk
    scale = 1.0 / (float(dh) ** 0.5)

    # Flatten the batch tile into the matmul M axis (cheap leading-dim merge).
    x = x_ref[...].astype(f32).reshape(Mq, D)       # (Mq, D)
    cr = cross_ref[...].astype(f32).reshape(Mk, D)  # (Mk, D)

    def layer_norm(v, g_ref, b_ref):                # f32 math
        mean = jnp.mean(v, axis=-1, keepdims=True)
        c = v - mean
        var = jnp.mean(c * c, axis=-1, keepdims=True)
        return c * jax.lax.rsqrt(var + 1e-5) * g_ref[...] + b_ref[...]

    def mha_core(q, k, v, lq, lk, wo_ref, bo_ref, is_causal):
        # q: (Bt*lq, D), k/v: (Bt*lk, D) -- already projected, f32.
        q3 = q.reshape(Bt, lq, D) * scale           # fold the 1/sqrt(dh) scale
        k3 = k.reshape(Bt, lk, D)
        v3 = v.reshape(Bt, lk, D)

        ctx_heads = []
        for h in range(H):                          # static lane slices, H small
            sl = slice(h * dh, (h + 1) * dh)
            qh = q3[:, :, sl]                       # (Bt, lq, dh)
            kh = k3[:, :, sl]                       # (Bt, lk, dh)
            vh = v3[:, :, sl]                       # (Bt, lk, dh)

            s = jnp.einsum("bqe,bke->bqk", qh.astype(bf16), kh.astype(bf16),
                           preferred_element_type=f32)          # (Bt, lq, lk) f32
            if is_causal:
                qi = jax.lax.broadcasted_iota(jnp.int32, s.shape, 1)
                ki = jax.lax.broadcasted_iota(jnp.int32, s.shape, 2)
                s = jnp.where(ki <= qi, s, f32(-1e30))

            # softmax in f32; divide replaced by EUP approx reciprocal
            m = jnp.max(s, axis=-1, keepdims=True)
            p = jnp.exp(s - m)
            inv = pl.reciprocal(jnp.sum(p, axis=-1, keepdims=True), approx=True)
            p = p * inv

            ctx_heads.append(
                jnp.einsum("bqk,bke->bqe", p.astype(bf16), vh.astype(bf16),
                           preferred_element_type=f32))          # (Bt, lq, dh)

        # Lane-concat heads back to (M, D); single full-depth output projection.
        ctx = jnp.concatenate(ctx_heads, axis=-1).reshape(Bt * lq, D)
        return (jnp.dot(ctx.astype(bf16), wo_ref[...],
                        preferred_element_type=f32) + bo_ref[...])

    # ---- self-attention + add & norm1 ------------------------------------
    qkv = jnp.dot(x.astype(bf16), s_wqkv_ref[...],
                  preferred_element_type=f32) + s_bqkv_ref[...]   # (Mq, 3D)
    sa = mha_core(qkv[:, :D], qkv[:, D:2 * D], qkv[:, 2 * D:],
                  Lq, Lq, s_wo_ref, s_bo_ref, causal)
    x1 = layer_norm(x + sa, ln1g_ref, ln1b_ref)

    # ---- cross-attention + add & norm2 -----------------------------------
    cq = jnp.dot(x1.astype(bf16), c_wq_ref[...],
                 preferred_element_type=f32) + c_bq_ref[...]      # (Mq, D)
    ckv = jnp.dot(cr.astype(bf16), c_wkv_ref[...],
                  preferred_element_type=f32) + c_bkv_ref[...]    # (Mk, 2D)
    ca = mha_core(cq, ckv[:, :D], ckv[:, D:],
                  Lq, Lk, c_wo_ref, c_bo_ref, False)
    x2 = layer_norm(x1 + ca, ln2g_ref, ln2b_ref)

    # ---- position-wise FFN (conv1 -> relu -> conv2) + add & norm3 ---------
    h = jnp.dot(x2.astype(bf16), w1_ref[...],
                preferred_element_type=f32) + b1_ref[...]
    h = jnp.maximum(h, 0.0)                                        # relu
    y = jnp.dot(h.astype(bf16), w2_ref[...],
                preferred_element_type=f32) + b2_ref[...]
    out = layer_norm(x2 + y, ln3g_ref, ln3b_ref)

    o_ref[...] = out.reshape(Bt, Lq, D).astype(o_ref.dtype)


# -----------------------------------------------------------------------------
# Wrapper: one fused pallas_call for the whole layer
# -----------------------------------------------------------------------------
def _pick_batch_tile(B, Lq):
    # Largest divisor of B such that Bt*Lq does not wildly exceed the 128-row
    # MXU target (packs M to amortize per-grid-step overhead).
    target = max(1, -(-128 // Lq))
    bt = 1
    for cand in range(1, B + 1):
        if B % cand == 0 and cand <= target:
            bt = cand
    return bt


def decoder_layer_forward(x, cross, params, n_heads):
    B, Lq, D = x.shape
    _, Lk, _ = cross.shape
    assert D % n_heads == 0, "d_model must be divisible by n_heads"
    bf16 = jnp.bfloat16

    Bt = _pick_batch_tile(B, Lq)
    grid = (B // Bt,)

    sa, ca = params["self_attn"], params["cross_attn"]
    weights = (
        # self-attn: fused QKV slab + fused bias, W_o, b_o
        jnp.concatenate([sa["wq"], sa["wk"], sa["wv"]], axis=1).astype(bf16),
        jnp.concatenate([sa["bq"], sa["bk"], sa["bv"]], axis=1),
        sa["wo"].astype(bf16), sa["bo"],
        # cross-attn: W_q, b_q, fused KV slab + fused bias, W_o, b_o
        ca["wq"].astype(bf16), ca["bq"],
        jnp.concatenate([ca["wk"], ca["wv"]], axis=1).astype(bf16),
        jnp.concatenate([ca["bk"], ca["bv"]], axis=1),
        ca["wo"].astype(bf16), ca["bo"],
        # FFN (1x1 conv pair) -- weights bf16, biases f32
        params["w1"].astype(bf16), params["b1"],
        params["w2"].astype(bf16), params["b2"],
        # layer norms (f32)
        params["ln1_g"], params["ln1_b"],
        params["ln2_g"], params["ln2_b"],
        params["ln3_g"], params["ln3_b"],
    )

    def full_spec(a):  # whole-array block, constant index map -> VMEM-resident
        return pl.BlockSpec(a.shape, lambda b: (0, 0))

    in_specs = [
        pl.BlockSpec((Bt, Lq, D), lambda b: (b, 0, 0)),   # x batch tile
        pl.BlockSpec((Bt, Lk, D), lambda b: (b, 0, 0)),   # cross batch tile
    ] + [full_spec(w) for w in weights]

    kernel = functools.partial(decoder_layer_kernel,
                               n_heads=n_heads,
                               causal=CAUSAL_SELF_ATTENTION)

    return pl.pallas_call(
        kernel,
        out_shape=jax.ShapeDtypeStruct((B, Lq, D), x.dtype),
        grid=grid,
        in_specs=in_specs,
        out_specs=pl.BlockSpec((Bt, Lq, D), lambda b: (b, 0, 0)),
        compiler_params=pltpu.CompilerParams(
            dimension_semantics=("parallel",),        # megacore sharding on v7x
            vmem_limit_bytes=32 * 1024 * 1024),       # headroom beyond v5e's 16 MiB default
    )(x, cross, *weights)


# -----------------------------------------------------------------------------
# Pure-JAX reference (f32 everywhere) for a sanity check against the kernel
# -----------------------------------------------------------------------------
def reference_forward(x, cross, params, n_heads):
    def mha(q_in, kv_in, p):
        B, Lq, D = q_in.shape
        dh = D // n_heads

        def proj(t, w, b):
            y = jnp.einsum("bld,de->ble", t, w) + b
            return y.reshape(t.shape[0], t.shape[1], n_heads, dh).transpose(0, 2, 1, 3)

        q = proj(q_in, p["wq"], p["bq"])
        k = proj(kv_in, p["wk"], p["bk"])
        v = proj(kv_in, p["wv"], p["bv"])
        s = jnp.einsum("bhqe,bhke->bhqk", q, k) / jnp.sqrt(jnp.float32(dh))
        a = jax.nn.softmax(s, axis=-1)
        ctx = jnp.einsum("bhqk,bhke->bhqe", a, v)
        ctx = ctx.transpose(0, 2, 1, 3).reshape(B, Lq, D)
        return jnp.einsum("bld,de->ble", ctx, p["wo"]) + p["bo"]

    def ln(v, g, b):
        m = jnp.mean(v, -1, keepdims=True)
        c = v - m
        var = jnp.mean(c * c, -1, keepdims=True)
        return c * jax.lax.rsqrt(var + 1e-5) * g + b

    h = ln(x + mha(x, x, params["self_attn"]), params["ln1_g"], params["ln1_b"])
    h = ln(h + mha(h, cross, params["cross_attn"]), params["ln2_g"], params["ln2_b"])
    y = jnp.maximum(jnp.einsum("bld,df->blf", h, params["w1"]) + params["b1"], 0.0)
    y = jnp.einsum("blf,fd->bld", y, params["w2"]) + params["b2"]
    return ln(h + y, params["ln3_g"], params["ln3_b"])


# -----------------------------------------------------------------------------
# Deterministic parameter init (module-format weights)
# -----------------------------------------------------------------------------
def init_params(key, d_model, d_ff):
    ks = jax.random.split(key, 4)
    s = 0.02

    def w(k, shape):
        return jax.random.normal(k, shape, jnp.float32) * s

    def attn(k):
        kq, kk, kv, ko = jax.random.split(k, 4)
        z = lambda: jnp.zeros((1, d_model), jnp.float32)
        return dict(wq=w(kq, (d_model, d_model)), bq=z(),
                    wk=w(kk, (d_model, d_model)), bk=z(),
                    wv=w(kv, (d_model, d_model)), bv=z(),
                    wo=w(ko, (d_model, d_model)), bo=z())

    return dict(
        self_attn=attn(ks[0]),
        cross_attn=attn(ks[1]),
        # conv1: Conv1d(d_model, d_ff, 1) weight == (D, d_ff) matmul weight
        w1=w(ks[2], (d_model, d_ff)), b1=jnp.zeros((1, d_ff), jnp.float32),
        # conv2: Conv1d(d_ff, d_model, 1) weight == (d_ff, D) matmul weight
        w2=w(ks[3], (d_ff, d_model)), b2=jnp.zeros((1, d_model), jnp.float32),
        ln1_g=jnp.ones((1, d_model), jnp.float32), ln1_b=jnp.zeros((1, d_model), jnp.float32),
        ln2_g=jnp.ones((1, d_model), jnp.float32), ln2_b=jnp.zeros((1, d_model), jnp.float32),
        ln3_g=jnp.ones((1, d_model), jnp.float32), ln3_b=jnp.zeros((1, d_model), jnp.float32),
    )


# -----------------------------------------------------------------------------
# Main
# -----------------------------------------------------------------------------
if __name__ == "__main__":
    B, L_dec, L_enc = 2, 16, 24
    d_model, n_heads = 128, 4          # lane-dense D; dh = 32
    d_ff = 4 * d_model                 # PyTorch default d_ff = 4 * d_model

    key = jax.random.PRNGKey(0)
    kx, kc, kp = jax.random.split(key, 3)
    x = jax.random.normal(kx, (B, L_dec, d_model), jnp.float32)
    cross = jax.random.normal(kc, (B, L_enc, d_model), jnp.float32)
    params = init_params(kp, d_model, d_ff)

    fwd = jax.jit(decoder_layer_forward, static_argnums=(3,))
    out = jax.block_until_ready(fwd(x, cross, params, n_heads))
    assert out.shape == (B, L_dec, d_model)

    ref = reference_forward(x, cross, params, n_heads)
    max_err = float(jnp.max(jnp.abs(out - ref)))
    # bf16 MXU operands (+ approx reciprocal) vs f32 reference: expect O(1e-3)
    # max abs error on layer-normalized outputs; 3e-2 gives safe headroom.
    assert max_err < 3e-2, f"kernel vs reference max abs err = {max_err}"

    print("KERNEL_OK")
</pallas_src>

<mosaic_0001>
module attributes {stable_mosaic.version = 11 : i64} {
  func.func @decoder_layer_kernel(%arg0: i32, %arg1: memref<2x16x128xf32, #tpu.memory_space<vmem>>, %arg2: memref<2x24x128xf32, #tpu.memory_space<vmem>>, %arg3: memref<128x384xbf16, #tpu.memory_space<vmem>>, %arg4: memref<1x384xf32, #tpu.memory_space<vmem>>, %arg5: memref<128x128xbf16, #tpu.memory_space<vmem>>, %arg6: memref<1x128xf32, #tpu.memory_space<vmem>>, %arg7: memref<128x128xbf16, #tpu.memory_space<vmem>>, %arg8: memref<1x128xf32, #tpu.memory_space<vmem>>, %arg9: memref<128x256xbf16, #tpu.memory_space<vmem>>, %arg10: memref<1x256xf32, #tpu.memory_space<vmem>>, %arg11: memref<128x128xbf16, #tpu.memory_space<vmem>>, %arg12: memref<1x128xf32, #tpu.memory_space<vmem>>, %arg13: memref<128x512xbf16, #tpu.memory_space<vmem>>, %arg14: memref<1x512xf32, #tpu.memory_space<vmem>>, %arg15: memref<512x128xbf16, #tpu.memory_space<vmem>>, %arg16: memref<1x128xf32, #tpu.memory_space<vmem>>, %arg17: memref<1x128xf32, #tpu.memory_space<vmem>>, %arg18: memref<1x128xf32, #tpu.memory_space<vmem>>, %arg19: memref<1x128xf32, #tpu.memory_space<vmem>>, %arg20: memref<1x128xf32, #tpu.memory_space<vmem>>, %arg21: memref<1x128xf32, #tpu.memory_space<vmem>>, %arg22: memref<1x128xf32, #tpu.memory_space<vmem>>, %arg23: memref<2x16x128xf32, #tpu.memory_space<vmem>>) attributes {dimension_semantics = [#tpu.dimension_semantics<parallel>], iteration_bounds = array<i64: 1>, scalar_prefetch = 0 : i64, scratch_operands = 0 : i64, tpu.core_type = #tpu.core_type<tc>, window_params = [{transform_indices = @transform_0, window_bounds = array<i64: 2, 16, 128>}, {transform_indices = @transform_1, window_bounds = array<i64: 2, 24, 128>}, {pipeline_mode = #tpu.pipeline_mode<synchronous>, transform_indices = @transform_2, window_bounds = array<i64: 128, 384>}, {pipeline_mode = #tpu.pipeline_mode<synchronous>, transform_indices = @transform_3, window_bounds = array<i64: 1, 384>}, {pipeline_mode = #tpu.pipeline_mode<synchronous>, transform_indices = @transform_4, window_bounds = array<i64: 128, 128>}, {pipeline_mode = #tpu.pipeline_mode<synchronous>, transform_indices = @transform_5, window_bounds = array<i64: 1, 128>}, {pipeline_mode = #tpu.pipeline_mode<synchronous>, transform_indices = @transform_6, window_bounds = array<i64: 128, 128>}, {pipeline_mode = #tpu.pipeline_mode<synchronous>, transform_indices = @transform_7, window_bounds = array<i64: 1, 128>}, {pipeline_mode = #tpu.pipeline_mode<synchronous>, transform_indices = @transform_8, window_bounds = array<i64: 128, 256>}, {pipeline_mode = #tpu.pipeline_mode<synchronous>, transform_indices = @transform_9, window_bounds = array<i64: 1, 256>}, {pipeline_mode = #tpu.pipeline_mode<synchronous>, transform_indices = @transform_10, window_bounds = array<i64: 128, 128>}, {pipeline_mode = #tpu.pipeline_mode<synchronous>, transform_indices = @transform_11, window_bounds = array<i64: 1, 128>}, {pipeline_mode = #tpu.pipeline_mode<synchronous>, transform_indices = @transform_12, window_bounds = array<i64: 128, 512>}, {pipeline_mode = #tpu.pipeline_mode<synchronous>, transform_indices = @transform_13, window_bounds = array<i64: 1, 512>}, {pipeline_mode = #tpu.pipeline_mode<synchronous>, transform_indices = @transform_14, window_bounds = array<i64: 512, 128>}, {pipeline_mode = #tpu.pipeline_mode<synchronous>, transform_indices = @transform_15, window_bounds = array<i64: 1, 128>}, {pipeline_mode = #tpu.pipeline_mode<synchronous>, transform_indices = @transform_16, window_bounds = array<i64: 1, 128>}, {pipeline_mode = #tpu.pipeline_mode<synchronous>, transform_indices = @transform_17, window_bounds = array<i64: 1, 128>}, {pipeline_mode = #tpu.pipeline_mode<synchronous>, transform_indices = @transform_18, window_bounds = array<i64: 1, 128>}, {pipeline_mode = #tpu.pipeline_mode<synchronous>, transform_indices = @transform_19, window_bounds = array<i64: 1, 128>}, {pipeline_mode = #tpu.pipeline_mode<synchronous>, transform_indices = @transform_20, window_bounds = array<i64: 1, 128>}, {pipeline_mode = #tpu.pipeline_mode<synchronous>, transform_indices = @transform_21, window_bounds = array<i64: 1, 128>}, {transform_indices = @transform_22, window_bounds = array<i64: 2, 16, 128>}]} {
    %c0 = arith.constant 0 : index
    %c0_0 = arith.constant 0 : index
    %c0_1 = arith.constant 0 : index
    %0 = vector.load %arg1[%c0, %c0_0, %c0_1] : memref<2x16x128xf32, #tpu.memory_space<vmem>>, vector<2x16x128xf32>
    %1 = vector.shape_cast %0 : vector<2x16x128xf32> to vector<32x128xf32>
    %c0_2 = arith.constant 0 : index
    %c0_3 = arith.constant 0 : index
    %c0_4 = arith.constant 0 : index
    %2 = vector.load %arg2[%c0_2, %c0_3, %c0_4] : memref<2x24x128xf32, #tpu.memory_space<vmem>>, vector<2x24x128xf32>
    %3 = vector.shape_cast %2 : vector<2x24x128xf32> to vector<48x128xf32>
    %4 = arith.truncf %1 : vector<32x128xf32> to vector<32x128xbf16>
    %c0_5 = arith.constant 0 : index
    %c0_6 = arith.constant 0 : index
    %5 = vector.load %arg3[%c0_5, %c0_6] : memref<128x384xbf16, #tpu.memory_space<vmem>>, vector<128x384xbf16>
    %cst = arith.constant dense<0.000000e+00> : vector<32x384xf32>
    %6 = tpu.matmul %4, %5, %cst {dimension_numbers = #tpu.dot_dimension_numbers<[1], [0], [0], [1], [0, 0, 1, 1], [], []>} : vector<32x128xbf16>, vector<128x384xbf16>, vector<32x384xf32> -> vector<32x384xf32>
    %c0_7 = arith.constant 0 : index
    %c0_8 = arith.constant 0 : index
    %7 = vector.load %arg4[%c0_7, %c0_8] : memref<1x384xf32, #tpu.memory_space<vmem>>, vector<1x384xf32>
    %8 = vector.broadcast %7 : vector<1x384xf32> to vector<32x384xf32>
    %9 = arith.addf %6, %8 : vector<32x384xf32>
    %10 = vector.extract_strided_slice %9 {offsets = [0, 0], sizes = [32, 128], strides = [1, 1]} : vector<32x384xf32> to vector<32x128xf32>
    %11 = vector.extract_strided_slice %9 {offsets = [0, 128], sizes = [32, 128], strides = [1, 1]} : vector<32x384xf32> to vector<32x128xf32>
    %12 = vector.extract_strided_slice %9 {offsets = [0, 256], sizes = [32, 128], strides = [1, 1]} : vector<32x384xf32> to vector<32x128xf32>
    %13 = vector.shape_cast %10 : vector<32x128xf32> to vector<2x16x128xf32>
    %cst_9 = arith.constant 0.176776692 : f32
    %14 = vector.broadcast %cst_9 : f32 to vector<2x16x128xf32>
    %15 = arith.mulf %13, %14 : vector<2x16x128xf32>
    %16 = vector.shape_cast %11 : vector<32x128xf32> to vector<2x16x128xf32>
    %17 = vector.shape_cast %12 : vector<32x128xf32> to vector<2x16x128xf32>
    %18 = vector.extract_strided_slice %15 {offsets = [0, 0, 0], sizes = [2, 16, 32], strides = [1, 1, 1]} : vector<2x16x128xf32> to vector<2x16x32xf32>
    %19 = vector.extract_strided_slice %16 {offsets = [0, 0, 0], sizes = [2, 16, 32], strides = [1, 1, 1]} : vector<2x16x128xf32> to vector<2x16x32xf32>
    %20 = vector.extract_strided_slice %17 {offsets = [0, 0, 0], sizes = [2, 16, 32], strides = [1, 1, 1]} : vector<2x16x128xf32> to vector<2x16x32xf32>
    %21 = arith.truncf %18 : vector<2x16x32xf32> to vector<2x16x32xbf16>
    %22 = arith.truncf %19 : vector<2x16x32xf32> to vector<2x16x32xbf16>
    "tpu.trace_start"() <{level = 10 : i32, message = "bqe,bke->bqk"}> : () -> ()
    %cst_10 = arith.constant dense<0.000000e+00> : vector<2x16x16xf32>
    %23 = tpu.matmul %21, %22, %cst_10 {dimension_numbers = #tpu.dot_dimension_numbers<[2], [2], [1], [1], [0, 0, 0, 1, 1, 1], [0], [0]>} : vector<2x16x32xbf16>, vector<2x16x32xbf16>, vector<2x16x16xf32> -> vector<2x16x16xf32>
    "tpu.trace_stop"() : () -> ()
    %cst_11 = arith.constant dense<0xFF800000> : vector<2x16xf32>
    %24 = vector.multi_reduction <maximumf>, %23, %cst_11 [2] : vector<2x16x16xf32> to vector<2x16xf32>
    %25 = vector.shape_cast %24 : vector<2x16xf32> to vector<2x16x1xf32>
    %26 = vector.broadcast %25 : vector<2x16x1xf32> to vector<2x16x16xf32>
    %27 = arith.subf %23, %26 : vector<2x16x16xf32>
    %28 = math.exp %27 : vector<2x16x16xf32>
    %cst_12 = arith.constant dense<0.000000e+00> : vector<2x16xf32>
    %29 = vector.multi_reduction <add>, %28, %cst_12 [2] : vector<2x16x16xf32> to vector<2x16xf32>
    %30 = vector.shape_cast %29 : vector<2x16xf32> to vector<2x16x1xf32>
    %31 = tpu.reciprocal %30 {approx = true} : vector<2x16x1xf32> -> vector<2x16x1xf32>
    %32 = vector.broadcast %31 : vector<2x16x1xf32> to vector<2x16x16xf32>
    %33 = arith.mulf %28, %32 : vector<2x16x16xf32>
    %34 = arith.truncf %33 : vector<2x16x16xf32> to vector<2x16x16xbf16>
    %35 = arith.truncf %20 : vector<2x16x32xf32> to vector<2x16x32xbf16>
    "tpu.trace_start"() <{level = 10 : i32, message = "bqk,bke->bqe"}> : () -> ()
    %cst_13 = arith.constant dense<0.000000e+00> : vector<2x16x32xf32>
    %36 = tpu.matmul %34, %35, %cst_13 {dimension_numbers = #tpu.dot_dimension_numbers<[2], [1], [1], [2], [0, 0, 0, 1, 1, 2], [0], [0]>} : vector<2x16x16xbf16>, vector<2x16x32xbf16>, vector<2x16x32xf32> -> vector<2x16x32xf32>
    "tpu.trace_stop"() : () -> ()
    %37 = vector.extract_strided_slice %15 {offsets = [0, 0, 32], sizes = [2, 16, 32], strides = [1, 1, 1]} : vector<2x16x128xf32> to vector<2x16x32xf32>
    %38 = vector.extract_strided_slice %16 {offsets = [0, 0, 32], sizes = [2, 16, 32], strides = [1, 1, 1]} : vector<2x16x128xf32> to vector<2x16x32xf32>
    %39 = vector.extract_strided_slice %17 {offsets = [0, 0, 32], sizes = [2, 16, 32], strides = [1, 1, 1]} : vector<2x16x128xf32> to vector<2x16x32xf32>
    %40 = arith.truncf %37 : vector<2x16x32xf32> to vector<2x16x32xbf16>
    %41 = arith.truncf %38 : vector<2x16x32xf32> to vector<2x16x32xbf16>
    "tpu.trace_start"() <{level = 10 : i32, message = "bqe,bke->bqk"}> : () -> ()
    %cst_14 = arith.constant dense<0.000000e+00> : vector<2x16x16xf32>
    %42 = tpu.matmul %40, %41, %cst_14 {dimension_numbers = #tpu.dot_dimension_numbers<[2], [2], [1], [1], [0, 0, 0, 1, 1, 1], [0], [0]>} : vector<2x16x32xbf16>, vector<2x16x32xbf16>, vector<2x16x16xf32> -> vector<2x16x16xf32>
    "tpu.trace_stop"() : () -> ()
    %cst_15 = arith.constant dense<0xFF800000> : vector<2x16xf32>
    %43 = vector.multi_reduction <maximumf>, %42, %cst_15 [2] : vector<2x16x16xf32> to vector<2x16xf32>
    %44 = vector.shape_cast %43 : vector<2x16xf32> to vector<2x16x1xf32>
    %45 = vector.broadcast %44 : vector<2x16x1xf32> to vector<2x16x16xf32>
    %46 = arith.subf %42, %45 : vector<2x16x16xf32>
    %47 = math.exp %46 : vector<2x16x16xf32>
    %cst_16 = arith.constant dense<0.000000e+00> : vector<2x16xf32>
    %48 = vector.multi_reduction <add>, %47, %cst_16 [2] : vector<2x16x16xf32> to vector<2x16xf32>
    %49 = vector.shape_cast %48 : vector<2x16xf32> to vector<2x16x1xf32>
    %50 = tpu.reciprocal %49 {approx = true} : vector<2x16x1xf32> -> vector<2x16x1xf32>
    %51 = vector.broadcast %50 : vector<2x16x1xf32> to vector<2x16x16xf32>
    %52 = arith.mulf %47, %51 : vector<2x16x16xf32>
    %53 = arith.truncf %52 : vector<2x16x16xf32> to vector<2x16x16xbf16>
    %54 = arith.truncf %39 : vector<2x16x32xf32> to vector<2x16x32xbf16>
    "tpu.trace_start"() <{level = 10 : i32, message = "bqk,bke->bqe"}> : () -> ()
    %cst_17 = arith.constant dense<0.000000e+00> : vector<2x16x32xf32>
    %55 = tpu.matmul %53, %54, %cst_17 {dimension_numbers = #tpu.dot_dimension_numbers<[2], [1], [1], [2], [0, 0, 0, 1, 1, 2], [0], [0]>} : vector<2x16x16xbf16>, vector<2x16x32xbf16>, vector<2x16x32xf32> -> vector<2x16x32xf32>
    "tpu.trace_stop"() : () -> ()
    %56 = vector.extract_strided_slice %15 {offsets = [0, 0, 64], sizes = [2, 16, 32], strides = [1, 1, 1]} : vector<2x16x128xf32> to vector<2x16x32xf32>
    %57 = vector.extract_strided_slice %16 {offsets = [0, 0, 64], sizes = [2, 16, 32], strides = [1, 1, 1]} : vector<2x16x128xf32> to vector<2x16x32xf32>
    %58 = vector.extract_strided_slice %17 {offsets = [0, 0, 64], sizes = [2, 16, 32], strides = [1, 1, 1]} : vector<2x16x128xf32> to vector<2x16x32xf32>
    %59 = arith.truncf %56 : vector<2x16x32xf32> to vector<2x16x32xbf16>
    %60 = arith.truncf %57 : vector<2x16x32xf32> to vector<2x16x32xbf16>
    "tpu.trace_start"() <{level = 10 : i32, message = "bqe,bke->bqk"}> : () -> ()
    %cst_18 = arith.constant dense<0.000000e+00> : vector<2x16x16xf32>
    %61 = tpu.matmul %59, %60, %cst_18 {dimension_numbers = #tpu.dot_dimension_numbers<[2], [2], [1], [1], [0, 0, 0, 1, 1, 1], [0], [0]>} : vector<2x16x32xbf16>, vector<2x16x32xbf16>, vector<2x16x16xf32> -> vector<2x16x16xf32>
    "tpu.trace_stop"() : () -> ()
    %cst_19 = arith.constant dense<0xFF800000> : vector<2x16xf32>
    %62 = vector.multi_reduction <maximumf>, %61, %cst_19 [2] : vector<2x16x16xf32> to vector<2x16xf32>
    %63 = vector.shape_cast %62 : vector<2x16xf32> to vector<2x16x1xf32>
    %64 = vector.broadcast %63 : vector<2x16x1xf32> to vector<2x16x16xf32>
    %65 = arith.subf %61, %64 : vector<2x16x16xf32>
    %66 = math.exp %65 : vector<2x16x16xf32>
    %cst_20 = arith.constant dense<0.000000e+00> : vector<2x16xf32>
    %67 = vector.multi_reduction <add>, %66, %cst_20 [2] : vector<2x16x16xf32> to vector<2x16xf32>
    %68 = vector.shape_cast %67 : vector<2x16xf32> to vector<2x16x1xf32>
    %69 = tpu.reciprocal %68 {approx = true} : vector<2x16x1xf32> -> vector<2x16x1xf32>
    %70 = vector.broadcast %69 : vector<2x16x1xf32> to vector<2x16x16xf32>
    %71 = arith.mulf %66, %70 : vector<2x16x16xf32>
    %72 = arith.truncf %71 : vector<2x16x16xf32> to vector<2x16x16xbf16>
    %73 = arith.truncf %58 : vector<2x16x32xf32> to vector<2x16x32xbf16>
    "tpu.trace_start"() <{level = 10 : i32, message = "bqk,bke->bqe"}> : () -> ()
    %cst_21 = arith.constant dense<0.000000e+00> : vector<2x16x32xf32>
    %74 = tpu.matmul %72, %73, %cst_21 {dimension_numbers = #tpu.dot_dimension_numbers<[2], [1], [1], [2], [0, 0, 0, 1, 1, 2], [0], [0]>} : vector<2x16x16xbf16>, vector<2x16x32xbf16>, vector<2x16x32xf32> -> vector<2x16x32xf32>
    "tpu.trace_stop"() : () -> ()
    %75 = vector.extract_strided_slice %15 {offsets = [0, 0, 96], sizes = [2, 16, 32], strides = [1, 1, 1]} : vector<2x16x128xf32> to vector<2x16x32xf32>
    %76 = vector.extract_strided_slice %16 {offsets = [0, 0, 96], sizes = [2, 16, 32], strides = [1, 1, 1]} : vector<2x16x128xf32> to vector<2x16x32xf32>
    %77 = vector.extract_strided_slice %17 {offsets = [0, 0, 96], sizes = [2, 16, 32], strides = [1, 1, 1]} : vector<2x16x128xf32> to vector<2x16x32xf32>
    %78 = arith.truncf %75 : vector<2x16x32xf32> to vector<2x16x32xbf16>
    %79 = arith.truncf %76 : vector<2x16x32xf32> to vector<2x16x32xbf16>
    "tpu.trace_start"() <{level = 10 : i32, message = "bqe,bke->bqk"}> : () -> ()
    %cst_22 = arith.constant dense<0.000000e+00> : vector<2x16x16xf32>
    %80 = tpu.matmul %78, %79, %cst_22 {dimension_numbers = #tpu.dot_dimension_numbers<[2], [2], [1], [1], [0, 0, 0, 1, 1, 1], [0], [0]>} : vector<2x16x32xbf16>, vector<2x16x32xbf16>, vector<2x16x16xf32> -> vector<2x16x16xf32>
    "tpu.trace_stop"() : () -> ()
    %cst_23 = arith.constant dense<0xFF800000> : vector<2x16xf32>
    %81 = vector.multi_reduction <maximumf>, %80, %cst_23 [2] : vector<2x16x16xf32> to vector<2x16xf32>
    %82 = vector.shape_cast %81 : vector<2x16xf32> to vector<2x16x1xf32>
    %83 = vector.broadcast %82 : vector<2x16x1xf32> to vector<2x16x16xf32>
    %84 = arith.subf %80, %83 : vector<2x16x16xf32>
    %85 = math.exp %84 : vector<2x16x16xf32>
    %cst_24 = arith.constant dense<0.000000e+00> : vector<2x16xf32>
    %86 = vector.multi_reduction <add>, %85, %cst_24 [2] : vector<2x16x16xf32> to vector<2x16xf32>
    %87 = vector.shape_cast %86 : vector<2x16xf32> to vector<2x16x1xf32>
    %88 = tpu.reciprocal %87 {approx = true} : vector<2x16x1xf32> -> vector<2x16x1xf32>
    %89 = vector.broadcast %88 : vector<2x16x1xf32> to vector<2x16x16xf32>
    %90 = arith.mulf %85, %89 : vector<2x16x16xf32>
    %91 = arith.truncf %90 : vector<2x16x16xf32> to vector<2x16x16xbf16>
    %92 = arith.truncf %77 : vector<2x16x32xf32> to vector<2x16x32xbf16>
    "tpu.trace_start"() <{level = 10 : i32, message = "bqk,bke->bqe"}> : () -> ()
    %cst_25 = arith.constant dense<0.000000e+00> : vector<2x16x32xf32>
    %93 = tpu.matmul %91, %92, %cst_25 {dimension_numbers = #tpu.dot_dimension_numbers<[2], [1], [1], [2], [0, 0, 0, 1, 1, 2], [0], [0]>} : vector<2x16x16xbf16>, vector<2x16x32xbf16>, vector<2x16x32xf32> -> vector<2x16x32xf32>
    "tpu.trace_stop"() : () -> ()
    %94 = tpu.concatenate %36, %55, %74, %93 in 2 : vector<2x16x32xf32>, vector<2x16x32xf32>, vector<2x16x32xf32>, vector<2x16x32xf32> -> vector<2x16x128xf32>
    %95 = vector.shape_cast %94 : vector<2x16x128xf32> to vector<32x128xf32>
    %96 = arith.truncf %95 : vector<32x128xf32> to vector<32x128xbf16>
    %c0_26 = arith.constant 0 : index
    %c0_27 = arith.constant 0 : index
    %97 = vector.load %arg5[%c0_26, %c0_27] : memref<128x128xbf16, #tpu.memory_space<vmem>>, vector<128x128xbf16>
    %cst_28 = arith.constant dense<0.000000e+00> : vector<32x128xf32>
    %98 = tpu.matmul %96, %97, %cst_28 {dimension_numbers = #tpu.dot_dimension_numbers<[1], [0], [0], [1], [0, 0, 1, 1], [], []>} : vector<32x128xbf16>, vector<128x128xbf16>, vector<32x128xf32> -> vector<32x128xf32>
    %c0_29 = arith.constant 0 : index
    %c0_30 = arith.constant 0 : index
    %99 = vector.load %arg6[%c0_29, %c0_30] : memref<1x128xf32, #tpu.memory_space<vmem>>, vector<1x128xf32>
    %100 = vector.broadcast %99 : vector<1x128xf32> to vector<32x128xf32>
    %101 = arith.addf %98, %100 : vector<32x128xf32>
    %102 = arith.addf %1, %101 : vector<32x128xf32>
    %cst_31 = arith.constant dense<0.000000e+00> : vector<32xf32>
    %103 = vector.multi_reduction <add>, %102, %cst_31 [1] : vector<32x128xf32> to vector<32xf32>
    %104 = vector.shape_cast %103 : vector<32xf32> to vector<32x1xf32>
    %cst_32 = arith.constant 1.280000e+02 : f32
    %105 = vector.broadcast %cst_32 : f32 to vector<32x1xf32>
    %106 = arith.divf %104, %105 : vector<32x1xf32>
    %107 = vector.broadcast %106 : vector<32x1xf32> to vector<32x128xf32>
    %108 = arith.subf %102, %107 : vector<32x128xf32>
    %109 = arith.mulf %108, %108 : vector<32x128xf32>
    %cst_33 = arith.constant dense<0.000000e+00> : vector<32xf32>
    %110 = vector.multi_reduction <add>, %109, %cst_33 [1] : vector<32x128xf32> to vector<32xf32>
    %111 = vector.shape_cast %110 : vector<32xf32> to vector<32x1xf32>
    %cst_34 = arith.constant 1.280000e+02 : f32
    %112 = vector.broadcast %cst_34 : f32 to vector<32x1xf32>
    %113 = arith.divf %111, %112 : vector<32x1xf32>
    %cst_35 = arith.constant 9.99999974E-6 : f32
    %114 = vector.broadcast %cst_35 : f32 to vector<32x1xf32>
    %115 = arith.addf %113, %114 : vector<32x1xf32>
    %116 = math.rsqrt %115 : vector<32x1xf32>
    %117 = vector.broadcast %116 : vector<32x1xf32> to vector<32x128xf32>
    %118 = arith.mulf %108, %117 : vector<32x128xf32>
    %c0_36 = arith.constant 0 : index
    %c0_37 = arith.constant 0 : index
    %119 = vector.load %arg17[%c0_36, %c0_37] : memref<1x128xf32, #tpu.memory_space<vmem>>, vector<1x128xf32>
    %120 = vector.broadcast %119 : vector<1x128xf32> to vector<32x128xf32>
    %121 = arith.mulf %118, %120 : vector<32x128xf32>
    %c0_38 = arith.constant 0 : index
    %c0_39 = arith.constant 0 : index
    %122 = vector.load %arg18[%c0_38, %c0_39] : memref<1x128xf32, #tpu.memory_space<vmem>>, vector<1x128xf32>
    %123 = vector.broadcast %122 : vector<1x128xf32> to vector<32x128xf32>
    %124 = arith.addf %121, %123 : vector<32x128xf32>
    %125 = arith.truncf %124 : vector<32x128xf32> to vector<32x128xbf16>
    %c0_40 = arith.constant 0 : index
    %c0_41 = arith.constant 0 : index
    %126 = vector.load %arg7[%c0_40, %c0_41] : memref<128x128xbf16, #tpu.memory_space<vmem>>, vector<128x128xbf16>
    %cst_42 = arith.constant dense<0.000000e+00> : vector<32x128xf32>
    %127 = tpu.matmul %125, %126, %cst_42 {dimension_numbers = #tpu.dot_dimension_numbers<[1], [0], [0], [1], [0, 0, 1, 1], [], []>} : vector<32x128xbf16>, vector<128x128xbf16>, vector<32x128xf32> -> vector<32x128xf32>
    %c0_43 = arith.constant 0 : index
    %c0_44 = arith.constant 0 : index
    %128 = vector.load %arg8[%c0_43, %c0_44] : memref<1x128xf32, #tpu.memory_space<vmem>>, vector<1x128xf32>
    %129 = vector.broadcast %128 : vector<1x128xf32> to vector<32x128xf32>
    %130 = arith.addf %127, %129 : vector<32x128xf32>
    %131 = arith.truncf %3 : vector<48x128xf32> to vector<48x128xbf16>
    %c0_45 = arith.constant 0 : index
    %c0_46 = arith.constant 0 : index
    %132 = vector.load %arg9[%c0_45, %c0_46] : memref<128x256xbf16, #tpu.memory_space<vmem>>, vector<128x256xbf16>
    %cst_47 = arith.constant dense<0.000000e+00> : vector<48x256xf32>
    %133 = tpu.matmul %131, %132, %cst_47 {dimension_numbers = #tpu.dot_dimension_numbers<[1], [0], [0], [1], [0, 0, 1, 1], [], []>} : vector<48x128xbf16>, vector<128x256xbf16>, vector<48x256xf32> -> vector<48x256xf32>
    %c0_48 = arith.constant 0 : index
    %c0_49 = arith.constant 0 : index
    %134 = vector.load %arg10[%c0_48, %c0_49] : memref<1x256xf32, #tpu.memory_space<vmem>>, vector<1x256xf32>
    %135 = vector.broadcast %134 : vector<1x256xf32> to vector<48x256xf32>
    %136 = arith.addf %133, %135 : vector<48x256xf32>
    %137 = vector.extract_strided_slice %136 {offsets = [0, 0], sizes = [48, 128], strides = [1, 1]} : vector<48x256xf32> to vector<48x128xf32>
    %138 = vector.extract_strided_slice %136 {offsets = [0, 128], sizes = [48, 128], strides = [1, 1]} : vector<48x256xf32> to vector<48x128xf32>
    %139 = vector.shape_cast %130 : vector<32x128xf32> to vector<2x16x128xf32>
    %cst_50 = arith.constant 0.176776692 : f32
    %140 = vector.broadcast %cst_50 : f32 to vector<2x16x128xf32>
    %141 = arith.mulf %139, %140 : vector<2x16x128xf32>
    %142 = vector.shape_cast %137 : vector<48x128xf32> to vector<2x24x128xf32>
    %143 = vector.shape_cast %138 : vector<48x128xf32> to vector<2x24x128xf32>
    %144 = vector.extract_strided_slice %141 {offsets = [0, 0, 0], sizes = [2, 16, 32], strides = [1, 1, 1]} : vector<2x16x128xf32> to vector<2x16x32xf32>
    %145 = vector.extract_strided_slice %142 {offsets = [0, 0, 0], sizes = [2, 24, 32], strides = [1, 1, 1]} : vector<2x24x128xf32> to vector<2x24x32xf32>
    %146 = vector.extract_strided_slice %143 {offsets = [0, 0, 0], sizes = [2, 24, 32], strides = [1, 1, 1]} : vector<2x24x128xf32> to vector<2x24x32xf32>
    %147 = arith.truncf %144 : vector<2x16x32xf32> to vector<2x16x32xbf16>
    %148 = arith.truncf %145 : vector<2x24x32xf32> to vector<2x24x32xbf16>
    "tpu.trace_start"() <{level = 10 : i32, message = "bqe,bke->bqk"}> : () -> ()
    %cst_51 = arith.constant dense<0.000000e+00> : vector<2x16x24xf32>
    %149 = tpu.matmul %147, %148, %cst_51 {dimension_numbers = #tpu.dot_dimension_numbers<[2], [2], [1], [1], [0, 0, 0, 1, 1, 1], [0], [0]>} : vector<2x16x32xbf16>, vector<2x24x32xbf16>, vector<2x16x24xf32> -> vector<2x16x24xf32>
    "tpu.trace_stop"() : () -> ()
    %cst_52 = arith.constant dense<0xFF800000> : vector<2x16xf32>
    %150 = vector.multi_reduction <maximumf>, %149, %cst_52 [2] : vector<2x16x24xf32> to vector<2x16xf32>
    %151 = vector.shape_cast %150 : vector<2x16xf32> to vector<2x16x1xf32>
    %152 = vector.broadcast %151 : vector<2x16x1xf32> to vector<2x16x24xf32>
    %153 = arith.subf %149, %152 : vector<2x16x24xf32>
    %154 = math.exp %153 : vector<2x16x24xf32>
    %cst_53 = arith.constant dense<0.000000e+00> : vector<2x16xf32>
    %155 = vector.multi_reduction <add>, %154, %cst_53 [2] : vector<2x16x24xf32> to vector<2x16xf32>
    %156 = vector.shape_cast %155 : vector<2x16xf32> to vector<2x16x1xf32>
    %157 = tpu.reciprocal %156 {approx = true} : vector<2x16x1xf32> -> vector<2x16x1xf32>
    %158 = vector.broadcast %157 : vector<2x16x1xf32> to vector<2x16x24xf32>
    %159 = arith.mulf %154, %158 : vector<2x16x24xf32>
    %160 = arith.truncf %159 : vector<2x16x24xf32> to vector<2x16x24xbf16>
    %161 = arith.truncf %146 : vector<2x24x32xf32> to vector<2x24x32xbf16>
    "tpu.trace_start"() <{level = 10 : i32, message = "bqk,bke->bqe"}> : () -> ()
    %cst_54 = arith.constant dense<0.000000e+00> : vector<2x16x32xf32>
    %162 = tpu.matmul %160, %161, %cst_54 {dimension_numbers = #tpu.dot_dimension_numbers<[2], [1], [1], [2], [0, 0, 0, 1, 1, 2], [0], [0]>} : vector<2x16x24xbf16>, vector<2x24x32xbf16>, vector<2x16x32xf32> -> vector<2x16x32xf32>
    "tpu.trace_stop"() : () -> ()
    %163 = vector.extract_strided_slice %141 {offsets = [0, 0, 32], sizes = [2, 16, 32], strides = [1, 1, 1]} : vector<2x16x128xf32> to vector<2x16x32xf32>
    %164 = vector.extract_strided_slice %142 {offsets = [0, 0, 32], sizes = [2, 24, 32], strides = [1, 1, 1]} : vector<2x24x128xf32> to vector<2x24x32xf32>
    %165 = vector.extract_strided_slice %143 {offsets = [0, 0, 32], sizes = [2, 24, 32], strides = [1, 1, 1]} : vector<2x24x128xf32> to vector<2x24x32xf32>
    %166 = arith.truncf %163 : vector<2x16x32xf32> to vector<2x16x32xbf16>
    %167 = arith.truncf %164 : vector<2x24x32xf32> to vector<2x24x32xbf16>
    "tpu.trace_start"() <{level = 10 : i32, message = "bqe,bke->bqk"}> : () -> ()
    %cst_55 = arith.constant dense<0.000000e+00> : vector<2x16x24xf32>
    %168 = tpu.matmul %166, %167, %cst_55 {dimension_numbers = #tpu.dot_dimension_numbers<[2], [2], [1], [1], [0, 0, 0, 1, 1, 1], [0], [0]>} : vector<2x16x32xbf16>, vector<2x24x32xbf16>, vector<2x16x24xf32> -> vector<2x16x24xf32>
    "tpu.trace_stop"() : () -> ()
    %cst_56 = arith.constant dense<0xFF800000> : vector<2x16xf32>
    %169 = vector.multi_reduction <maximumf>, %168, %cst_56 [2] : vector<2x16x24xf32> to vector<2x16xf32>
    %170 = vector.shape_cast %169 : vector<2x16xf32> to vector<2x16x1xf32>
    %171 = vector.broadcast %170 : vector<2x16x1xf32> to vector<2x16x24xf32>
    %172 = arith.subf %168, %171 : vector<2x16x24xf32>
    %173 = math.exp %172 : vector<2x16x24xf32>
    %cst_57 = arith.constant dense<0.000000e+00> : vector<2x16xf32>
    %174 = vector.multi_reduction <add>, %173, %cst_57 [2] : vector<2x16x24xf32> to vector<2x16xf32>
    %175 = vector.shape_cast %174 : vector<2x16xf32> to vector<2x16x1xf32>
    %176 = tpu.reciprocal %175 {approx = true} : vector<2x16x1xf32> -> vector<2x16x1xf32>
    %177 = vector.broadcast %176 : vector<2x16x1xf32> to vector<2x16x24xf32>
    %178 = arith.mulf %173, %177 : vector<2x16x24xf32>
    %179 = arith.truncf %178 : vector<2x16x24xf32> to vector<2x16x24xbf16>
    %180 = arith.truncf %165 : vector<2x24x32xf32> to vector<2x24x32xbf16>
    "tpu.trace_start"() <{level = 10 : i32, message = "bqk,bke->bqe"}> : () -> ()
    %cst_58 = arith.constant dense<0.000000e+00> : vector<2x16x32xf32>
    %181 = tpu.matmul %179, %180, %cst_58 {dimension_numbers = #tpu.dot_dimension_numbers<[2], [1], [1], [2], [0, 0, 0, 1, 1, 2], [0], [0]>} : vector<2x16x24xbf16>, vector<2x24x32xbf16>, vector<2x16x32xf32> -> vector<2x16x32xf32>
    "tpu.trace_stop"() : () -> ()
    %182 = vector.extract_strided_slice %141 {offsets = [0, 0, 64], sizes = [2, 16, 32], strides = [1, 1, 1]} : vector<2x16x128xf32> to vector<2x16x32xf32>
    %183 = vector.extract_strided_slice %142 {offsets = [0, 0, 64], sizes = [2, 24, 32], strides = [1, 1, 1]} : vector<2x24x128xf32> to vector<2x24x32xf32>
    %184 = vector.extract_strided_slice %143 {offsets = [0, 0, 64], sizes = [2, 24, 32], strides = [1, 1, 1]} : vector<2x24x128xf32> to vector<2x24x32xf32>
    %185 = arith.truncf %182 : vector<2x16x32xf32> to vector<2x16x32xbf16>
    %186 = arith.truncf %183 : vector<2x24x32xf32> to vector<2x24x32xbf16>
    "tpu.trace_start"() <{level = 10 : i32, message = "bqe,bke->bqk"}> : () -> ()
    %cst_59 = arith.constant dense<0.000000e+00> : vector<2x16x24xf32>
    %187 = tpu.matmul %185, %186, %cst_59 {dimension_numbers = #tpu.dot_dimension_numbers<[2], [2], [1], [1], [0, 0, 0, 1, 1, 1], [0], [0]>} : vector<2x16x32xbf16>, vector<2x24x32xbf16>, vector<2x16x24xf32> -> vector<2x16x24xf32>
    "tpu.trace_stop"() : () -> ()
    %cst_60 = arith.constant dense<0xFF800000> : vector<2x16xf32>
    %188 = vector.multi_reduction <maximumf>, %187, %cst_60 [2] : vector<2x16x24xf32> to vector<2x16xf32>
    %189 = vector.shape_cast %188 : vector<2x16xf32> to vector<2x16x1xf32>
    %190 = vector.broadcast %189 : vector<2x16x1xf32> to vector<2x16x24xf32>
    %191 = arith.subf %187, %190 : vector<2x16x24xf32>
    %192 = math.exp %191 : vector<2x16x24xf32>
    %cst_61 = arith.constant dense<0.000000e+00> : vector<2x16xf32>
    %193 = vector.multi_reduction <add>, %192, %cst_61 [2] : vector<2x16x24xf32> to vector<2x16xf32>
    %194 = vector.shape_cast %193 : vector<2x16xf32> to vector<2x16x1xf32>
    %195 = tpu.reciprocal %194 {approx = true} : vector<2x16x1xf32> -> vector<2x16x1xf32>
    %196 = vector.broadcast %195 : vector<2x16x1xf32> to vector<2x16x24xf32>
    %197 = arith.mulf %192, %196 : vector<2x16x24xf32>
    %198 = arith.truncf %197 : vector<2x16x24xf32> to vector<2x16x24xbf16>
    %199 = arith.truncf %184 : vector<2x24x32xf32> to vector<2x24x32xbf16>
    "tpu.trace_start"() <{level = 10 : i32, message = "bqk,bke->bqe"}> : () -> ()
    %cst_62 = arith.constant dense<0.000000e+00> : vector<2x16x32xf32>
    %200 = tpu.matmul %198, %199, %cst_62 {dimension_numbers = #tpu.dot_dimension_numbers<[2], [1], [1], [2], [0, 0, 0, 1, 1, 2], [0], [0]>} : vector<2x16x24xbf16>, vector<2x24x32xbf16>, vector<2x16x32xf32> -> vector<2x16x32xf32>
    "tpu.trace_stop"() : () -> ()
    %201 = vector.extract_strided_slice %141 {offsets = [0, 0, 96], sizes = [2, 16, 32], strides = [1, 1, 1]} : vector<2x16x128xf32> to vector<2x16x32xf32>
    %202 = vector.extract_strided_slice %142 {offsets = [0, 0, 96], sizes = [2, 24, 32], strides = [1, 1, 1]} : vector<2x24x128xf32> to vector<2x24x32xf32>
    %203 = vector.extract_strided_slice %143 {offsets = [0, 0, 96], sizes = [2, 24, 32], strides = [1, 1, 1]} : vector<2x24x128xf32> to vector<2x24x32xf32>
    %204 = arith.truncf %201 : vector<2x16x32xf32> to vector<2x16x32xbf16>
    %205 = arith.truncf %202 : vector<2x24x32xf32> to vector<2x24x32xbf16>
    "tpu.trace_start"() <{level = 10 : i32, message = "bqe,bke->bqk"}> : () -> ()
    %cst_63 = arith.constant dense<0.000000e+00> : vector<2x16x24xf32>
    %206 = tpu.matmul %204, %205, %cst_63 {dimension_numbers = #tpu.dot_dimension_numbers<[2], [2], [1], [1], [0, 0, 0, 1, 1, 1], [0], [0]>} : vector<2x16x32xbf16>, vector<2x24x32xbf16>, vector<2x16x24xf32> -> vector<2x16x24xf32>
    "tpu.trace_stop"() : () -> ()
    %cst_64 = arith.constant dense<0xFF800000> : vector<2x16xf32>
    %207 = vector.multi_reduction <maximumf>, %206, %cst_64 [2] : vector<2x16x24xf32> to vector<2x16xf32>
    %208 = vector.shape_cast %207 : vector<2x16xf32> to vector<2x16x1xf32>
    %209 = vector.broadcast %208 : vector<2x16x1xf32> to vector<2x16x24xf32>
    %210 = arith.subf %206, %209 : vector<2x16x24xf32>
    %211 = math.exp %210 : vector<2x16x24xf32>
    %cst_65 = arith.constant dense<0.000000e+00> : vector<2x16xf32>
    %212 = vector.multi_reduction <add>, %211, %cst_65 [2] : vector<2x16x24xf32> to vector<2x16xf32>
    %213 = vector.shape_cast %212 : vector<2x16xf32> to vector<2x16x1xf32>
    %214 = tpu.reciprocal %213 {approx = true} : vector<2x16x1xf32> -> vector<2x16x1xf32>
    %215 = vector.broadcast %214 : vector<2x16x1xf32> to vector<2x16x24xf32>
    %216 = arith.mulf %211, %215 : vector<2x16x24xf32>
    %217 = arith.truncf %216 : vector<2x16x24xf32> to vector<2x16x24xbf16>
    %218 = arith.truncf %203 : vector<2x24x32xf32> to vector<2x24x32xbf16>
    "tpu.trace_start"() <{level = 10 : i32, message = "bqk,bke->bqe"}> : () -> ()
    %cst_66 = arith.constant dense<0.000000e+00> : vector<2x16x32xf32>
    %219 = tpu.matmul %217, %218, %cst_66 {dimension_numbers = #tpu.dot_dimension_numbers<[2], [1], [1], [2], [0, 0, 0, 1, 1, 2], [0], [0]>} : vector<2x16x24xbf16>, vector<2x24x32xbf16>, vector<2x16x32xf32> -> vector<2x16x32xf32>
    "tpu.trace_stop"() : () -> ()
    %220 = tpu.concatenate %162, %181, %200, %219 in 2 : vector<2x16x32xf32>, vector<2x16x32xf32>, vector<2x16x32xf32>, vector<2x16x32xf32> -> vector<2x16x128xf32>
    %221 = vector.shape_cast %220 : vector<2x16x128xf32> to vector<32x128xf32>
    %222 = arith.truncf %221 : vector<32x128xf32> to vector<32x128xbf16>
    %c0_67 = arith.constant 0 : index
    %c0_68 = arith.constant 0 : index
    %223 = vector.load %arg11[%c0_67, %c0_68] : memref<128x128xbf16, #tpu.memory_space<vmem>>, vector<128x128xbf16>
    %cst_69 = arith.constant dense<0.000000e+00> : vector<32x128xf32>
    %224 = tpu.matmul %222, %223, %cst_69 {dimension_numbers = #tpu.dot_dimension_numbers<[1], [0], [0], [1], [0, 0, 1, 1], [], []>} : vector<32x128xbf16>, vector<128x128xbf16>, vector<32x128xf32> -> vector<32x128xf32>
    %c0_70 = arith.constant 0 : index
    %c0_71 = arith.constant 0 : index
    %225 = vector.load %arg12[%c0_70, %c0_71] : memref<1x128xf32, #tpu.memory_space<vmem>>, vector<1x128xf32>
    %226 = vector.broadcast %225 : vector<1x128xf32> to vector<32x128xf32>
    %227 = arith.addf %224, %226 : vector<32x128xf32>
    %228 = arith.addf %124, %227 : vector<32x128xf32>
    %cst_72 = arith.constant dense<0.000000e+00> : vector<32xf32>
    %229 = vector.multi_reduction <add>, %228, %cst_72 [1] : vector<32x128xf32> to vector<32xf32>
    %230 = vector.shape_cast %229 : vector<32xf32> to vector<32x1xf32>
    %cst_73 = arith.constant 1.280000e+02 : f32
    %231 = vector.broadcast %cst_73 : f32 to vector<32x1xf32>
    %232 = arith.divf %230, %231 : vector<32x1xf32>
    %233 = vector.broadcast %232 : vector<32x1xf32> to vector<32x128xf32>
    %234 = arith.subf %228, %233 : vector<32x128xf32>
    %235 = arith.mulf %234, %234 : vector<32x128xf32>
    %cst_74 = arith.constant dense<0.000000e+00> : vector<32xf32>
    %236 = vector.multi_reduction <add>, %235, %cst_74 [1] : vector<32x128xf32> to vector<32xf32>
    %237 = vector.shape_cast %236 : vector<32xf32> to vector<32x1xf32>
    %cst_75 = arith.constant 1.280000e+02 : f32
    %238 = vector.broadcast %cst_75 : f32 to vector<32x1xf32>
    %239 = arith.divf %237, %238 : vector<32x1xf32>
    %cst_76 = arith.constant 9.99999974E-6 : f32
    %240 = vector.broadcast %cst_76 : f32 to vector<32x1xf32>
    %241 = arith.addf %239, %240 : vector<32x1xf32>
    %242 = math.rsqrt %241 : vector<32x1xf32>
    %243 = vector.broadcast %242 : vector<32x1xf32> to vector<32x128xf32>
    %244 = arith.mulf %234, %243 : vector<32x128xf32>
    %c0_77 = arith.constant 0 : index
    %c0_78 = arith.constant 0 : index
    %245 = vector.load %arg19[%c0_77, %c0_78] : memref<1x128xf32, #tpu.memory_space<vmem>>, vector<1x128xf32>
    %246 = vector.broadcast %245 : vector<1x128xf32> to vector<32x128xf32>
    %247 = arith.mulf %244, %246 : vector<32x128xf32>
    %c0_79 = arith.constant 0 : index
    %c0_80 = arith.constant 0 : index
    %248 = vector.load %arg20[%c0_79, %c0_80] : memref<1x128xf32, #tpu.memory_space<vmem>>, vector<1x128xf32>
    %249 = vector.broadcast %248 : vector<1x128xf32> to vector<32x128xf32>
    %250 = arith.addf %247, %249 : vector<32x128xf32>
    %251 = arith.truncf %250 : vector<32x128xf32> to vector<32x128xbf16>
    %c0_81 = arith.constant 0 : index
    %c0_82 = arith.constant 0 : index
    %252 = vector.load %arg13[%c0_81, %c0_82] : memref<128x512xbf16, #tpu.memory_space<vmem>>, vector<128x512xbf16>
    %cst_83 = arith.constant dense<0.000000e+00> : vector<32x512xf32>
    %253 = tpu.matmul %251, %252, %cst_83 {dimension_numbers = #tpu.dot_dimension_numbers<[1], [0], [0], [1], [0, 0, 1, 1], [], []>} : vector<32x128xbf16>, vector<128x512xbf16>, vector<32x512xf32> -> vector<32x512xf32>
    %c0_84 = arith.constant 0 : index
    %c0_85 = arith.constant 0 : index
    %254 = vector.load %arg14[%c0_84, %c0_85] : memref<1x512xf32, #tpu.memory_space<vmem>>, vector<1x512xf32>
    %255 = vector.broadcast %254 : vector<1x512xf32> to vector<32x512xf32>
    %256 = arith.addf %253, %255 : vector<32x512xf32>
    %cst_86 = arith.constant 0.000000e+00 : f32
    %257 = vector.broadcast %cst_86 : f32 to vector<32x512xf32>
    %258 = arith.maximumf %256, %257 : vector<32x512xf32>
    %259 = arith.truncf %258 : vector<32x512xf32> to vector<32x512xbf16>
    %c0_87 = arith.constant 0 : index
    %c0_88 = arith.constant 0 : index
    %260 = vector.load %arg15[%c0_87, %c0_88] : memref<512x128xbf16, #tpu.memory_space<vmem>>, vector<512x128xbf16>
    %cst_89 = arith.constant dense<0.000000e+00> : vector<32x128xf32>
    %261 = tpu.matmul %259, %260, %cst_89 {dimension_numbers = #tpu.dot_dimension_numbers<[1], [0], [0], [1], [0, 0, 1, 1], [], []>} : vector<32x512xbf16>, vector<512x128xbf16>, vector<32x128xf32> -> vector<32x128xf32>
    %c0_90 = arith.constant 0 : index
    %c0_91 = arith.constant 0 : index
    %262 = vector.load %arg16[%c0_90, %c0_91] : memref<1x128xf32, #tpu.memory_space<vmem>>, vector<1x128xf32>
    %263 = vector.broadcast %262 : vector<1x128xf32> to vector<32x128xf32>
    %264 = arith.addf %261, %263 : vector<32x128xf32>
    %265 = arith.addf %250, %264 : vector<32x128xf32>
    %cst_92 = arith.constant dense<0.000000e+00> : vector<32xf32>
    %266 = vector.multi_reduction <add>, %265, %cst_92 [1] : vector<32x128xf32> to vector<32xf32>
    %267 = vector.shape_cast %266 : vector<32xf32> to vector<32x1xf32>
    %cst_93 = arith.constant 1.280000e+02 : f32
    %268 = vector.broadcast %cst_93 : f32 to vector<32x1xf32>
    %269 = arith.divf %267, %268 : vector<32x1xf32>
    %270 = vector.broadcast %269 : vector<32x1xf32> to vector<32x128xf32>
    %271 = arith.subf %265, %270 : vector<32x128xf32>
    %272 = arith.mulf %271, %271 : vector<32x128xf32>
    %cst_94 = arith.constant dense<0.000000e+00> : vector<32xf32>
    %273 = vector.multi_reduction <add>, %272, %cst_94 [1] : vector<32x128xf32> to vector<32xf32>
    %274 = vector.shape_cast %273 : vector<32xf32> to vector<32x1xf32>
    %cst_95 = arith.constant 1.280000e+02 : f32
    %275 = vector.broadcast %cst_95 : f32 to vector<32x1xf32>
    %276 = arith.divf %274, %275 : vector<32x1xf32>
    %cst_96 = arith.constant 9.99999974E-6 : f32
    %277 = vector.broadcast %cst_96 : f32 to vector<32x1xf32>
    %278 = arith.addf %276, %277 : vector<32x1xf32>
    %279 = math.rsqrt %278 : vector<32x1xf32>
    %280 = vector.broadcast %279 : vector<32x1xf32> to vector<32x128xf32>
    %281 = arith.mulf %271, %280 : vector<32x128xf32>
    %c0_97 = arith.constant 0 : index
    %c0_98 = arith.constant 0 : index
    %282 = vector.load %arg21[%c0_97, %c0_98] : memref<1x128xf32, #tpu.memory_space<vmem>>, vector<1x128xf32>
    %283 = vector.broadcast %282 : vector<1x128xf32> to vector<32x128xf32>
    %284 = arith.mulf %281, %283 : vector<32x128xf32>
    %c0_99 = arith.constant 0 : index
    %c0_100 = arith.constant 0 : index
    %285 = vector.load %arg22[%c0_99, %c0_100] : memref<1x128xf32, #tpu.memory_space<vmem>>, vector<1x128xf32>
    %286 = vector.broadcast %285 : vector<1x128xf32> to vector<32x128xf32>
    %287 = arith.addf %284, %286 : vector<32x128xf32>
    %288 = vector.shape_cast %287 : vector<32x128xf32> to vector<2x16x128xf32>
    %c0_101 = arith.constant 0 : index
    %c0_102 = arith.constant 0 : index
    %c0_103 = arith.constant 0 : index
    %289 = vector.load %arg23[%c0_101, %c0_102, %c0_103] : memref<2x16x128xf32, #tpu.memory_space<vmem>>, vector<2x16x128xf32>
    tpu.vector_store %arg23[%c0_101, %c0_102, %c0_103], %288 {strides = array<i32>} : memref<2x16x128xf32, #tpu.memory_space<vmem>>, vector<2x16x128xf32>,
    return
  }
  func.func @transform_0(%arg0: i32) -> (i32, i32, i32) {
    %c0_i32 = arith.constant 0 : i32
    %c0_i32_0 = arith.constant 0 : i32
    %c0_i32_1 = arith.constant 0 : i32
    return %arg0, %c0_i32, %c0_i32_0 : i32, i32, i32
  }
  func.func @transform_1(%arg0: i32) -> (i32, i32, i32) {
    %c0_i32 = arith.constant 0 : i32
    %c0_i32_0 = arith.constant 0 : i32
    %c0_i32_1 = arith.constant 0 : i32
    return %arg0, %c0_i32, %c0_i32_0 : i32, i32, i32
  }
  func.func @transform_2(%arg0: i32) -> (i32, i32) {
    %c0_i32 = arith.constant 0 : i32
    %c0_i32_0 = arith.constant 0 : i32
    %c0_i32_1 = arith.constant 0 : i32
    return %c0_i32, %c0_i32_0 : i32, i32
  }
  func.func @transform_3(%arg0: i32) -> (i32, i32) {
    %c0_i32 = arith.constant 0 : i32
    %c0_i32_0 = arith.constant 0 : i32
    %c0_i32_1 = arith.constant 0 : i32
    return %c0_i32, %c0_i32_0 : i32, i32
  }
  func.func @transform_4(%arg0: i32) -> (i32, i32) {
    %c0_i32 = arith.constant 0 : i32
    %c0_i32_0 = arith.constant 0 : i32
    %c0_i32_1 = arith.constant 0 : i32
    return %c0_i32, %c0_i32_0 : i32, i32
  }
  func.func @transform_5(%arg0: i32) -> (i32, i32) {
    %c0_i32 = arith.constant 0 : i32
    %c0_i32_0 = arith.constant 0 : i32
    %c0_i32_1 = arith.constant 0 : i32
    return %c0_i32, %c0_i32_0 : i32, i32
  }
  func.func @transform_6(%arg0: i32) -> (i32, i32) {
    %c0_i32 = arith.constant 0 : i32
    %c0_i32_0 = arith.constant 0 : i32
    %c0_i32_1 = arith.constant 0 : i32
    return %c0_i32, %c0_i32_0 : i32, i32
  }
  func.func @transform_7(%arg0: i32) -> (i32, i32) {
    %c0_i32 = arith.constant 0 : i32
    %c0_i32_0 = arith.constant 0 : i32
    %c0_i32_1 = arith.constant 0 : i32
    return %c0_i32, %c0_i32_0 : i32, i32
  }
  func.func @transform_8(%arg0: i32) -> (i32, i32) {
    %c0_i32 = arith.constant 0 : i32
    %c0_i32_0 = arith.constant 0 : i32
    %c0_i32_1 = arith.constant 0 : i32
    return %c0_i32, %c0_i32_0 : i32, i32
  }
  func.func @transform_9(%arg0: i32) -> (i32, i32) {
    %c0_i32 = arith.constant 0 : i32
    %c0_i32_0 = arith.constant 0 : i32
    %c0_i32_1 = arith.constant 0 : i32
    return %c0_i32, %c0_i32_0 : i32, i32
  }
  func.func @transform_10(%arg0: i32) -> (i32, i32) {
    %c0_i32 = arith.constant 0 : i32
    %c0_i32_0 = arith.constant 0 : i32
    %c0_i32_1 = arith.constant 0 : i32
    return %c0_i32, %c0_i32_0 : i32, i32
  }
  func.func @transform_11(%arg0: i32) -> (i32, i32) {
    %c0_i32 = arith.constant 0 : i32
    %c0_i32_0 = arith.constant 0 : i32
    %c0_i32_1 = arith.constant 0 : i32
    return %c0_i32, %c0_i32_0 : i32, i32
  }
  func.func @transform_12(%arg0: i32) -> (i32, i32) {
    %c0_i32 = arith.constant 0 : i32
    %c0_i32_0 = arith.constant 0 : i32
    %c0_i32_1 = arith.constant 0 : i32
    return %c0_i32, %c0_i32_0 : i32, i32
  }
  func.func @transform_13(%arg0: i32) -> (i32, i32) {
    %c0_i32 = arith.constant 0 : i32
    %c0_i32_0 = arith.constant 0 : i32
    %c0_i32_1 = arith.constant 0 : i32
    return %c0_i32, %c0_i32_0 : i32, i32
  }
  func.func @transform_14(%arg0: i32) -> (i32, i32) {
    %c0_i32 = arith.constant 0 : i32
    %c0_i32_0 = arith.constant 0 : i32
    %c0_i32_1 = arith.constant 0 : i32
    return %c0_i32, %c0_i32_0 : i32, i32
  }
  func.func @transform_15(%arg0: i32) -> (i32, i32) {
    %c0_i32 = arith.constant 0 : i32
    %c0_i32_0 = arith.constant 0 : i32
    %c0_i32_1 = arith.constant 0 : i32
    return %c0_i32, %c0_i32_0 : i32, i32
  }
  func.func @transform_16(%arg0: i32) -> (i32, i32) {
    %c0_i32 = arith.constant 0 : i32
    %c0_i32_0 = arith.constant 0 : i32
    %c0_i32_1 = arith.constant 0 : i32
    return %c0_i32, %c0_i32_0 : i32, i32
  }
  func.func @transform_17(%arg0: i32) -> (i32, i32) {
    %c0_i32 = arith.constant 0 : i32
    %c0_i32_0 = arith.constant 0 : i32
    %c0_i32_1 = arith.constant 0 : i32
    return %c0_i32, %c0_i32_0 : i32, i32
  }
  func.func @transform_18(%arg0: i32) -> (i32, i32) {
    %c0_i32 = arith.constant 0 : i32
    %c0_i32_0 = arith.constant 0 : i32
    %c0_i32_1 = arith.constant 0 : i32
    return %c0_i32, %c0_i32_0 : i32, i32
  }
  func.func @transform_19(%arg0: i32) -> (i32, i32) {
    %c0_i32 = arith.constant 0 : i32
    %c0_i32_0 = arith.constant 0 : i32
    %c0_i32_1 = arith.constant 0 : i32
    return %c0_i32, %c0_i32_0 : i32, i32
  }
  func.func @transform_20(%arg0: i32) -> (i32, i32) {
    %c0_i32 = arith.constant 0 : i32
    %c0_i32_0 = arith.constant 0 : i32
    %c0_i32_1 = arith.constant 0 : i32
    return %c0_i32, %c0_i32_0 : i32, i32
  }
  func.func @transform_21(%arg0: i32) -> (i32, i32) {
    %c0_i32 = arith.constant 0 : i32
    %c0_i32_0 = arith.constant 0 : i32
    %c0_i32_1 = arith.constant 0 : i32
    return %c0_i32, %c0_i32_0 : i32, i32
  }
  func.func @transform_22(%arg0: i32) -> (i32, i32, i32) {
    %c0_i32 = arith.constant 0 : i32
    %c0_i32_0 = arith.constant 0 : i32
    %c0_i32_1 = arith.constant 0 : i32
    return %arg0, %c0_i32, %c0_i32_0 : i32, i32, i32
  }
}

</mosaic_0001>

<bundles_post_ra>
// kernel: decoder_layer_forward.1
= control target key start
LH: loop header
LB: loop body
LE: loop exit
PB: predicated region body
PF: predicated region fallthrough
CT: control target
= control target key end

     0   :  { %s6233_s0 = inlined_call_operand.vmem [shape: f32[2,16,128], index: 0, kind: input, shape index: {}]   ;;  %s6234_s1 = inlined_call_operand.vmem [shape: f32[2,24,128], index: 1, kind: input, shape index: {}]   ;;  %s6235_s2 = inlined_call_operand.vmem [shape: bf16[128,384], index: 2, kind: input, shape index: {}]   ;;  %s6236_s3 = inlined_call_operand.vmem [shape: f32[1,384], index: 3, kind: input, shape index: {}]   ;;  %s6237_s4 = inlined_call_operand.vmem [shape: bf16[128,128], index: 4, kind: input, shape index: {}]   ;;  %s6238_s5 = inlined_call_operand.vmem [shape: f32[1,128], index: 5, kind: input, shape index: {}]   ;;  %s6239_s6 = inlined_call_operand.vmem [shape: bf16[128,128], index: 6, kind: input, shape index: {}]   ;;  %s6240_s7 = inlined_call_operand.vmem [shape: f32[1,128], index: 7, kind: input, shape index: {}]   ;;  %s6241_s8 = inlined_call_operand.vmem [shape: bf16[128,256], index: 8, kind: input, shape index: {}]   ;;  %s6242_s9 = inlined_call_operand.vmem [shape: f32[1,256], index: 9, kind: input, shape index: {}]   ;;  %s6243_s10 = inlined_call_operand.vmem [shape: bf16[128,128], index: 10, kind: input, shape index: {}]   ;;  %s6244_s11 = inlined_call_operand.vmem [shape: f32[1,128], index: 11, kind: input, shape index: {}]   ;;  %s6245_s12 = inlined_call_operand.vmem [shape: bf16[128,512], index: 12, kind: input, shape index: {}]   ;;  %s6246_s13 = inlined_call_operand.vmem [shape: f32[1,512], index: 13, kind: input, shape index: {}]   ;;  %s6247_s14 = inlined_call_operand.vmem [shape: bf16[512,128], index: 14, kind: input, shape index: {}]   ;;  %s6248_s15 = inlined_call_operand.vmem [shape: f32[1,128], index: 15, kind: input, shape index: {}]   ;;  %s6249_s16 = inlined_call_operand.vmem [shape: f32[1,128], index: 16, kind: input, shape index: {}]   ;;  %s6250_s17 = inlined_call_operand.vmem [shape: f32[1,128], index: 17, kind: input, shape index: {}]   ;;  %s6251_s18 = inlined_call_operand.vmem [shape: f32[1,128], index: 18, kind: input, shape index: {}]   ;;  %s6252_s19 = inlined_call_operand.vmem [shape: f32[1,128], index: 19, kind: input, shape index: {}]   ;;  %s6253_s20 = inlined_call_operand.vmem [shape: f32[1,128], index: 20, kind: input, shape index: {}]   ;;  %s6254_s21 = inlined_call_operand.vmem [shape: f32[1,128], index: 21, kind: input, shape index: {}]   ;;  %s6255_s22 = inlined_call_operand.hbm [shape: f32[2,16,128], index: 22, kind: output, shape index: {}]  }
   0x1   :  { %6261 = sst [smem:[#allocation5_spill]] %s6233_s0 }
   0x2   :  { %6262 = sst [smem:[#allocation6_spill]] %s6234_s1 }
   0x3   :  { %6263 = sst [smem:[#allocation7_spill]] %s6235_s2 }
   0x4   :  { %6264 = sst [smem:[#allocation8_spill]] %s6236_s3 }
   0x5   :  { %6265 = sst [smem:[#allocation9_spill]] %s6237_s4 }
   0x6   :  { %6266 = sst [smem:[#allocation10_spill]] %s6238_s5 }
   0x7   :  { %6267 = sst [smem:[#allocation11_spill]] %s6239_s6 }
   0x8   :  { %s6268_s29 = sld [smem:[#allocation7_spill]]  ;;  %v5047_v2 = vmov 0   ;;  %s6269_s30 = sld [smem:[#allocation5_spill]] }
   0x9   :  { %294 = vmatprep.mubr.bf16.mxu0 %v5047_v2 }
   0xe   :  { %v4707_v0 = vld [vmem:[%s6268_s29 + $0x4] ss:$12 sps:$4 sm:$0xff]   ;;  %v4709_v1 = vld [vmem:[%s6268_s29] ss:$12 sps:$4 sm:$0xff]   ;;  %v4710_v3 = vld [vmem:[%s6268_s29 + $0x1c] ss:$12 sps:$4 sm:$0xff]  }
   0xf   :  { %262 = vmatprep.subr.bf16.mxu0 %v4707_v0  ;;  %v4712_v4 = vld [vmem:[%s6268_s29 + $0x18] ss:$12 sps:$4 sm:$0xff]   ;;  %v4713_v5 = vld [vmem:[%s6268_s29 + $0x34] ss:$12 sps:$4 sm:$0xff]   ;;  %v4715_v6 = vld [vmem:[%s6268_s29 + $0x30] ss:$12 sps:$4 sm:$0xff]  }
  0x10   :  { %263 = vmatpush1.bf16.msra.mxu0 %v4709_v1  ;;  %v4716_v7 = vld [vmem:[%s6268_s29 + $0x4c] ss:$12 sps:$4 sm:$0xff]   ;;  %v73_v8 = vld [vmem:[%s6269_s30] sm:$0xff]  ;;  %v4718_v9 = vld [vmem:[%s6268_s29 + $0x48] ss:$12 sps:$4 sm:$0xff]  }
  0x11   :  { %264 = vmatprep.subr.bf16.mxu0 %v4710_v3  ;;  %v4719_v10 = vld [vmem:[%s6268_s29 + $0x64] ss:$12 sps:$4 sm:$0xff]   ;;  %v74_v11 = vld [vmem:[%s6269_s30 + $0x8] sm:$0xff]  ;;  %v4725_v19 = vld [vmem:[%s6268_s29 + $0x94] ss:$12 sps:$4 sm:$0xff]  }
  0x12   :  { %v83_v12 = vpack.c.bf16 %v74_v11, %v73_v8  ;;  %v4731_v13 = vld [vmem:[%s6268_s29 + $0x8] ss:$12 sps:$4 sm:$0xff]   ;;  %v4732_v14 = vld [vmem:[%s6268_s29 + $0x20] ss:$12 sps:$4 sm:$0xff]   ;;  %v4733_v17 = vld [vmem:[%s6268_s29 + $0x38] ss:$12 sps:$4 sm:$0xff]  }
  0x13   :  { %v4721_v15 = vld [vmem:[%s6268_s29 + $0x60] ss:$12 sps:$4 sm:$0xff]   ;;  %4334 = vmatprep.subr.bf16.mxu1 %v4731_v13  ;;  %v4722_v16 = vld [vmem:[%s6268_s29 + $0x7c] ss:$12 sps:$4 sm:$0xff]   ;;  %v4724_v18 = vld [vmem:[%s6268_s29 + $0x78] ss:$12 sps:$4 sm:$0xff]  }
  0x14   :  { %265 = vmatpush1.bf16.msra.mxu0 %v4712_v4  ;;  %4350 = vmatprep.mubr.bf16.mxu1 %v83_v12  ;;  %v4734_v20 = vld [vmem:[%s6268_s29 + $0x50] ss:$12 sps:$4 sm:$0xff]   ;;  %v4728_v22 = vld [vmem:[%s6268_s29 + $0xac] ss:$12 sps:$4 sm:$0xff]   ;;  %v4735_v23 = vld [vmem:[%s6268_s29 + $0x68] ss:$12 sps:$4 sm:$0xff]  }
  0x15   :  { %266 = vmatprep.subr.bf16.mxu0 %v4713_v5  ;;  %4335 = vmatpush3.bf16.msra.mxu1 %v4731_v13  ;;  %v4727_v21 = vld [vmem:[%s6268_s29 + $0x90] ss:$12 sps:$4 sm:$0xff]   ;;  %v4730_v24 = vld [vmem:[%s6268_s29 + $0xa8] ss:$12 sps:$4 sm:$0xff]   ;;  %v4736_v25 = vld [vmem:[%s6268_s29 + $0x80] ss:$12 sps:$4 sm:$0xff]  }
  0x16   :  { %4336 = vmatprep.subr.bf16.mxu1 %v4732_v14  ;;  %v4737_v26 = vld [vmem:[%s6268_s29 + $0x98] ss:$12 sps:$4 sm:$0xff]   ;;  %v75_v27 = vld [vmem:[%s6269_s30 + $0x10] sm:$0xff] }
  0x17   :  { %v76_v28 = vld [vmem:[%s6269_s30 + $0x18] sm:$0xff] }
  0x18   :  { %267 = vmatpush1.bf16.msra.mxu0 %v4715_v6  ;;  %v4738_v29 = vld [vmem:[%s6268_s29 + $0xb0] ss:$12 sps:$4 sm:$0xff]   ;;  %v84_v30 = vpack.c.bf16 %v76_v28, %v75_v27 }
  0x19   :  { %268 = vmatprep.subr.bf16.mxu0 %v4716_v7  ;;  %4337 = vmatpush3.bf16.msra.mxu1 %v4732_v14 }
  0x1a   :  { %4338 = vmatprep.subr.bf16.mxu1 %v4733_v17 }
  0x1c   :  { %269 = vmatpush1.bf16.msra.mxu0 %v4718_v9 }
  0x1d   :  { %270 = vmatprep.subr.bf16.mxu0 %v4719_v10  ;;  %4339 = vmatpush3.bf16.msra.mxu1 %v4733_v17 }
  0x1e   :  { %4340 = vmatprep.subr.bf16.mxu1 %v4734_v20 }
  0x20   :  { %271 = vmatpush1.bf16.msra.mxu0 %v4721_v15 }
  0x21   :  { %272 = vmatprep.subr.bf16.mxu0 %v4722_v16  ;;  %4341 = vmatpush3.bf16.msra.mxu1 %v4734_v20 }
  0x22   :  { %4342 = vmatprep.subr.bf16.mxu1 %v4735_v23 }
  0x24   :  { %273 = vmatpush1.bf16.msra.mxu0 %v4724_v18 }
  0x25   :  { %274 = vmatprep.subr.bf16.mxu0 %v4725_v19  ;;  %4343 = vmatpush3.bf16.msra.mxu1 %v4735_v23 }
  0x26   :  { %4344 = vmatprep.subr.bf16.mxu1 %v4736_v25 }
  0x28   :  { %275 = vmatpush1.bf16.msra.mxu0 %v4727_v21 }
  0x29   :  { %276 = vmatprep.subr.bf16.mxu0 %v4728_v22  ;;  %4345 = vmatpush3.bf16.msra.mxu1 %v4736_v25 }
  0x2a   :  { %4346 = vmatprep.subr.bf16.mxu1 %v4737_v26 }
  0x2c   :  { %277 = vmatpush1.bf16.msra.mxu0 %v4730_v24 }
  0x2d   :  { %4347 = vmatpush3.bf16.msra.mxu1 %v4737_v26 }
  0x2e   :  { %4348 = vmatprep.subr.bf16.mxu1 %v4738_v29 }
  0x2f   :  { %295 = vmatmul.mubr.bf16.vlgmr.msra.gmra.mrb[0].mxu0 %v83_v12 }
  0x30   :  { %304 = vmatprep.mubr.bf16.mxu0 %v5047_v2 }
  0x31   :  { %4349 = vmatpush3.bf16.msra.mxu1 %v4738_v29 }
  0x34   :  { %4351 = vmatmul.mubr.bf16.vlgmr.msra.gmra.mrb[0].mxu1 %v84_v30 }
  0x37   :  { %305 = vmatmul.mubr.bf16.gmra.mrb[4].mxu0 %v84_v30 }
  0x38   :  { %27 = vsyncpa [#allocation3], 0  ;;  %v5048_v31 = vmov 0.0   ;;  %vm5049_vm0 = vmmov 0   ;;  %v119_v32 = vlaneseq  ;;  %s6270_s23 = sld [smem:[#allocation8_spill]]  ;;  %vm372_vm1 = vcmask 261120  }
  0x39   :  { %4354 = vmatprep.subr.bf16.mxu1 %v5048_v31  ;;  %4360 = vmatprep.subr.bf16.mxu0 %v5048_v31  ;;  %vm467_vm2 = vcmask 130048   ;;  %s5050_s1 = smov 96   ;;  %s5051_s5 = smov 64   ;;  %vm1388_vm3 = vcmask 523264   ;;  %vm1393_vm4 = vcmask 785408   ;;  %vm2051_vm5 = vcmask 1043456  }
  0x3a   :  { %4356 = vmatprep.mubr.msk.bf16.mxu1 %vm5049_vm0, %v5048_v31  ;;  %4362 = vmatprep.mubr.msk.bf16.mxu0 %vm5049_vm0, %v5048_v31  ;;  %v5263_v33 = vshrl.u32 %v119_v32, 7  ;;  %s5052_s24 = smov 32   ;;  %s6271_s26 = sld [smem:[#allocation9_spill]]  ;;  %vm1997_vm6 = vcmask 195584  }
  0x3b   :  { %s6272_s29 = sld [smem:[#allocation10_spill]] }
  0x3c   :  { %v5266_v34 = vsub.s32 0, %v5263_v33  ;;  %v5272_v36 = vsub.s32 1, %v5263_v33  ;;  %v129_v49 = vsub.s32 2, %v5263_v33 }
  0x3e   :  { %v117_v35 = vld [vmem:[%s6270_s23] sm:$0x7] }
  0x3f   :  { %v122_v37 = vrot.slane %v117_v35, %v5266_v34  ;;  %v126_v39 = vrot.slane %v117_v35, %v5272_v36  ;;  %v130_v56 = vrot.slane %v117_v35, %v129_v49 }
 0x102   :  { %v296_v38 = vpop.f32.mrb[0].mxu0 }
 0x103   :  { %v297_v40 = vadd.f32 %v296_v38, %v122_v37  ;;  %v298_v41 = vpop.f32.mrb[1].mxu0 }
 0x104   :  { %v300_v42 = vpop.f32.mrb[2].mxu0  ;;  %v299_v45 = vadd.f32 %v298_v41, %v126_v39 }
 0x105   :  { %v301_v43 = vadd.f32 %v300_v42, %v122_v37  ;;  %v302_v44 = vpop.f32.mrb[3].mxu0  ;;  %v364_v47 = vmul.f32 0.17677669, %v297_v40 }
 0x106   :  { %v303_v46 = vadd.f32 %v302_v44, %v126_v39 }
 0x107   :  { %v365_v48 = vmul.f32 0.17677669, %v301_v43  ;;  %v4352_v63 = vpop.f32.mrb[0].mxu1 }
 0x108   :  { %v5277_v50 = vpack.c.bf16 %v303_v46, %v299_v45  ;;  %v358_v1 = vadd.f32 %v4352_v63, %v130_v56  ;;  %v349_v3 = vpop.f32.mrb[1].mxu1 }
 0x109   :  { %v5279_v51 = vpack.c.bf16 %v365_v48, %v364_v47  ;;  %v350_v5 = vadd.f32 %v349_v3, %v130_v56  ;;  %v4353_v6 = vpop.f32.mrb[2].mxu1 }
 0x10a   :  { %v306_v52 = vpop.f32.mrb[4].mxu0  ;;  %v377_v53 = vsel %vm372_vm1, %v5277_v50, 0  ;;  %v361_v8 = vadd.f32 %v4353_v6, %v130_v56  ;;  %v352_v9 = vpop.f32.mrb[3].mxu1 }
 0x10b   :  { %v307_v54 = vadd.f32 %v306_v52, %v122_v37  ;;  %v308_v55 = vpop.f32.mrb[5].mxu0  ;;  %4355 = vmatpush3.bf16.xpose.msra.mxu1 %v377_v53  ;;  %v353_v11 = vadd.f32 %v352_v9, %v130_v56 }
 0x10c   :  { %v309_v57 = vadd.f32 %v308_v55, %v126_v39  ;;  %v310_v58 = vpop.f32.mrb[6].mxu0  ;;  %4366 = vmatprep.subr.bf16.mxu1 %v5048_v31  ;;  %v5294_v12 = vpack.c.bf16 %v361_v8, %v358_v1 }
 0x10d   :  { %v366_v59 = vmul.f32 0.17677669, %v307_v54  ;;  %v311_v60 = vadd.f32 %v310_v58, %v122_v37  ;;  %v312_v61 = vpop.f32.mrb[7].mxu0  ;;  %v5298_v13 = vpack.c.bf16 %v353_v11, %v350_v5 }
 0x10e   :  { %v313_v62 = vadd.f32 %v312_v61, %v126_v39 }
 0x10f   :  { %v367_v0 = vmul.f32 0.17677669, %v311_v60 }
 0x110   :  { %v5286_v4 = vpack.c.bf16 %v313_v62, %v309_v57 }
 0x111   :  { %v5288_v7 = vpack.c.bf16 %v367_v0, %v366_v59 }
 0x112   :  { %4357 = vmatmul.mubr.msk.bf16.vlgmr.msra.gmra.mrb[4].mxu1 %vm372_vm1, %v5279_v51  ;;  %v424_v10 = vsel %vm372_vm1, %v5286_v4, 0 }
 0x113   :  { %4361 = vmatpush3.bf16.xpose.msra.mxu0 %v424_v10  ;;  %4368 = vmatprep.mubr.msk.bf16.mxu1 %vm5049_vm0, %v5048_v31 }
 0x114   :  { %4372 = vmatprep.subr.bf16.mxu0 %v5048_v31  ;;  %4367 = vmatpush3.bf16.msra.mxu1 %v5298_v13 }
 0x115   :  { %4378 = vmatprep.subr.bf16.mxu1 %v5048_v31 }
 0x11a   :  { %4363 = vmatmul.mubr.msk.bf16.vlgmr.msra.gmra.mrb[8].mxu0 %vm372_vm1, %v5288_v7 }
 0x11b   :  { %4373 = vmatpush3.bf16.msra.mxu0 %v5294_v12  ;;  %4374 = vmatprep.mubr.msk.bf16.mxu0 %vm5049_vm0, %v5048_v31 }
 0x11c   :  { %4384 = vmatprep.subr.bf16.mxu0 %v5048_v31 }
 0x1e5   :  { %v413_v14 = vpop.f32.mrb[4].mxu1 }
 0x1e6   :  { %v4358_v15 = vpop.f32.mrb[5].mxu1  ;;  %v468_v16 = vsel %vm467_vm2, %v413_v14, -inf }
 0x1e7   :  { %469 = vmax.xlane.f32.xlu0 %v468_v16  ;;  %v416_v17 = vpop.f32.mrb[6].mxu1 }
 0x1e8   :  { %v4359_v18 = vpop.f32.mrb[7].mxu1  ;;  %v471_v19 = vsel %vm467_vm2, %v416_v17, -inf }
 0x1eb   :  { %472 = vmax.xlane.f32.xlu0 %v471_v19 }
 0x1ed   :  { %v460_v20 = vpop.f32.mrb[8].mxu0 }
 0x1ee   :  { %v474_v21 = vsel %vm467_vm2, %v460_v20, -inf  ;;  %v4364_v22 = vpop.f32.mrb[9].mxu0 }
 0x1ef   :  { %475 = vmax.xlane.f32.xlu1 %v474_v21  ;;  %v463_v23 = vpop.f32.mrb[10].mxu0 }
 0x1f0   :  { %v477_v24 = vsel %vm467_vm2, %v463_v23, -inf  ;;  %v4365_v25 = vpop.f32.mrb[11].mxu0 }
 0x1f3   :  { %478 = vmax.xlane.f32.xlu1 %v477_v24 }
 0x274   :  { %v470_v26 = vpop.xlane.xlu0 %469 }
 0x275   :  { %v480_v27 = vsub.f32 %v413_v14, %v470_v26 }
 0x277   :  { %v484_v28 = vmul.f32 1.442695, %v480_v27 }
 0x278   :  { %v473_v29 = vpop.xlane.xlu0 %472 }
 0x279   :  { %4867 = vpow2.f32 %v484_v28  ;;  %v481_v30 = vsub.f32 %v416_v17, %v473_v29 }
 0x27b   :  { %v486_v32 = vmul.f32 1.442695, %v481_v30 }
 0x27c   :  { %v476_v35 = vpop.xlane.xlu1 %475 }
 0x27d   :  { %4869 = vpow2.f32 %v486_v32  ;;  %v482_v37 = vsub.f32 %v460_v20, %v476_v35 }
 0x27f   :  { %v488_v38 = vmul.f32 1.442695, %v482_v37 }
 0x280   :  { %v479_v45 = vpop.xlane.xlu1 %478 }
 0x281   :  { %4871 = vpow2.f32 %v488_v38  ;;  %v483_v46 = vsub.f32 %v463_v23, %v479_v45 }
 0x283   :  { %v4868_v39 = vpop.eup %4867  ;;  %v490_v47 = vmul.f32 1.442695, %v483_v46 }
 0x284   :  { %v492_v40 = vsel %vm467_vm2, %v4868_v39, 0.0 }
 0x285   :  { %493 = vadd.xlane.f32.xlu0 %v492_v40  ;;  %4873 = vpow2.f32 %v490_v47 }
 0x287   :  { %v4870_v41 = vpop.eup %4869 }
 0x288   :  { %v495_v42 = vsel %vm467_vm2, %v4870_v41, 0.0 }
 0x289   :  { %496 = vadd.xlane.f32.xlu1 %v495_v42 }
 0x28b   :  { %v4872_v43 = vpop.eup %4871 }
 0x28c   :  { %v498_v44 = vsel %vm467_vm2, %v4872_v43, 0.0 }
 0x28d   :  { %499 = vadd.xlane.f32.xlu0 %v498_v44 }
 0x28f   :  { %v4874_v48 = vpop.eup %4873 }
 0x290   :  { %v501_v52 = vsel %vm467_vm2, %v4874_v48, 0.0 }
 0x29a   :  { %661 = vrot.lane.b32.xlu1 %v5286_v4, %s5050_s1 }
 0x2a3   :  { %608 = vrot.lane.b32.xlu0 %v5277_v50, %s5050_s1 }
 0x2be   :  { %502 = vadd.xlane.f32.xlu1 %v501_v52 }
 0x2cf   :  { %605 = vrot.lane.b32.xlu1 %v5279_v51, %s5050_s1 }
 0x2d3   :  { %658 = vrot.lane.b32.xlu1 %v5288_v7, %s5050_s1 }
 0x312   :  { %v494_v53 = vpop.xlane.xlu0 %493 }
 0x313   :  { %4875 = vrcp.f32 %v494_v53 }
 0x316   :  { %v497_v54 = vpop.xlane.xlu1 %496 }
 0x317   :  { %4877 = vrcp.f32 %v497_v54 }
 0x31a   :  { %v500_v55 = vpop.xlane.xlu0 %499  ;;  %v662_v63 = vpop.permute.xlu1 %661 }
 0x31b   :  { %4879 = vrcp.f32 %v500_v55  ;;  %v667_v10 = vsel %vm372_vm1, %v662_v63, 0 }
 0x31d   :  { %v4876_v56 = vpop.eup %4875 }
 0x31e   :  { %v508_v58 = vmul.f32 %v4876_v56, %v4868_v39  ;;  %v609_v60 = vpop.permute.xlu0 %608 }
 0x31f   :  { %v614_v62 = vsel %vm372_vm1, %v609_v60, 0 }
 0x321   :  { %v4878_v57 = vpop.eup %4877 }
 0x322   :  { %v509_v59 = vmul.f32 %v4878_v57, %v4870_v41 }
 0x324   :  { %v512_v61 = vpack.c.bf16 %v509_v59, %v508_v58 }
 0x325   :  { %v4880_v3 = vpop.eup %4879 }
 0x326   :  { %4369 = vmatmul.mubr.msk.bf16.vlgmr.msra.gmra.mrb[8].mxu1 %vm467_vm2, %v512_v61  ;;  %v510_v6 = vmul.f32 %v4880_v3, %v4872_v43 }
 0x327   :  { %4379 = vmatpush3.bf16.xpose.msra.mxu1 %v614_v62  ;;  %4380 = vmatprep.mubr.msk.bf16.mxu1 %vm5049_vm0, %v5048_v31 }
 0x328   :  { %4390 = vmatprep.subr.bf16.mxu1 %v5048_v31 }
 0x34b   :  { %v503_v0 = vpop.xlane.xlu1 %502 }
 0x34c   :  { %4881 = vrcp.f32 %v503_v0 }
 0x34f   :  { %v606_v1 = vpop.permute.xlu1 %605 }
 0x350   :  { %4381 = vmatmul.mubr.msk.bf16.vlgmr.msra.gmra.mrb[12].mxu1 %vm372_vm1, %v606_v1 }
 0x351   :  { %4392 = vmatprep.mubr.msk.bf16.mxu1 %vm5049_vm0, %v5048_v31 }
 0x353   :  { %v659_v11 = vpop.permute.xlu1 %658 }
 0x356   :  { %v4882_v5 = vpop.eup %4881 }
 0x357   :  { %v511_v8 = vmul.f32 %v4882_v5, %v4874_v48 }
 0x359   :  { %v513_v9 = vpack.c.bf16 %v511_v8, %v510_v6 }
 0x35b   :  { %4375 = vmatmul.mubr.msk.bf16.vlgmr.msra.gmra.mrb[12].mxu0 %vm467_vm2, %v513_v9 }
 0x35c   :  { %4385 = vmatpush3.bf16.xpose.msra.mxu0 %v667_v10  ;;  %4386 = vmatprep.mubr.msk.bf16.mxu0 %vm5049_vm0, %v5048_v31 }
 0x35d   :  { %4396 = vmatprep.subr.bf16.mxu0 %v5048_v31 }
 0x363   :  { %4387 = vmatmul.mubr.msk.bf16.vlgmr.msra.gmra.mrb[16].mxu0 %vm372_vm1, %v659_v11 }
 0x364   :  { %4398 = vmatprep.mubr.msk.bf16.mxu0 %vm5049_vm0, %v5048_v31 }
 0x3f9   :  { %v5341_v14 = vpop.f32.mrb[8].mxu1 }
 0x3fa   :  { %v4370_v15 = vpop.f32.mrb[9].mxu1 }
 0x3fb   :  { %v5343_v16 = vpop.f32.mrb[10].mxu1 }
 0x3fc   :  { %v4371_v17 = vpop.f32.mrb[11].mxu1 }
 0x423   :  { %v650_v18 = vpop.f32.mrb[12].mxu1 }
 0x424   :  { %v4382_v19 = vpop.f32.mrb[13].mxu1  ;;  %v710_v20 = vsel %vm467_vm2, %v650_v18, -inf }
 0x425   :  { %711 = vmax.xlane.f32.xlu0 %v710_v20  ;;  %v653_v21 = vpop.f32.mrb[14].mxu1 }
 0x426   :  { %v4383_v22 = vpop.f32.mrb[15].mxu1  ;;  %v713_v23 = vsel %vm467_vm2, %v653_v21, -inf }
 0x427   :  { %714 = vmax.xlane.f32.xlu1 %v713_v23 }
 0x42e   :  { %v5347_v24 = vpop.f32.mrb[12].mxu0 }
 0x42f   :  { %v4376_v25 = vpop.f32.mrb[13].mxu0 }
 0x430   :  { %v5349_v26 = vpop.f32.mrb[14].mxu0 }
 0x431   :  { %v4377_v27 = vpop.f32.mrb[15].mxu0 }
 0x436   :  { %v703_v28 = vpop.f32.mrb[16].mxu0 }
 0x437   :  { %v4388_v29 = vpop.f32.mrb[17].mxu0  ;;  %v716_v30 = vsel %vm467_vm2, %v703_v28, -inf }
 0x438   :  { %v706_v32 = vpop.f32.mrb[18].mxu0  ;;  %717 = vmax.xlane.f32.xlu0 %v716_v30 }
 0x439   :  { %v4389_v35 = vpop.f32.mrb[19].mxu0  ;;  %v719_v37 = vsel %vm467_vm2, %v706_v32, -inf }
 0x43c   :  { %720 = vmax.xlane.f32.xlu0 %v719_v37 }
 0x4b2   :  { %v712_v38 = vpop.xlane.xlu0 %711 }
 0x4b3   :  { %v722_v39 = vsub.f32 %v650_v18, %v712_v38 }
 0x4b4   :  { %v715_v40 = vpop.xlane.xlu1 %714 }
 0x4b5   :  { %v726_v41 = vmul.f32 1.442695, %v722_v39  ;;  %v723_v42 = vsub.f32 %v653_v21, %v715_v40 }
 0x4b7   :  { %4883 = vpow2.f32 %v726_v41  ;;  %v728_v43 = vmul.f32 1.442695, %v723_v42 }
 0x4b9   :  { %4885 = vpow2.f32 %v728_v43 }
 0x4c1   :  { %v4884_v44 = vpop.eup %4883 }
 0x4c2   :  { %v734_v45 = vsel %vm467_vm2, %v4884_v44, 0.0 }
 0x4c3   :  { %v4886_v46 = vpop.eup %4885  ;;  %735 = vadd.xlane.f32.xlu0 %v734_v45 }
 0x4c4   :  { %v737_v47 = vsel %vm467_vm2, %v4886_v46, 0.0 }
 0x4c5   :  { %v718_v48 = vpop.xlane.xlu0 %717  ;;  %738 = vadd.xlane.f32.xlu1 %v737_v47 }
 0x4c6   :  { %v724_v52 = vsub.f32 %v703_v28, %v718_v48 }
 0x4c8   :  { %v730_v53 = vmul.f32 1.442695, %v724_v52 }
 0x4c9   :  { %v721_v56 = vpop.xlane.xlu0 %720 }
 0x4ca   :  { %4887 = vpow2.f32 %v730_v53  ;;  %v725_v57 = vsub.f32 %v706_v32, %v721_v56 }
 0x4cc   :  { %v732_v58 = vmul.f32 1.442695, %v725_v57 }
 0x4ce   :  { %4889 = vpow2.f32 %v732_v58 }
 0x4d4   :  { %v4888_v54 = vpop.eup %4887 }
 0x4d5   :  { %v740_v55 = vsel %vm467_vm2, %v4888_v54, 0.0 }
 0x4d6   :  { %741 = vadd.xlane.f32.xlu0 %v740_v55  ;;  %805 = vrot.lane.b32.xlu1 %v5294_v12, %s5050_s1 }
 0x4d8   :  { %v4890_v59 = vpop.eup %4889 }
 0x4d9   :  { %v743_v60 = vsel %vm467_vm2, %v4890_v59, 0.0 }
 0x4da   :  { %854 = vrot.lane.b32.xlu1 %v5277_v50, %s5051_s5 }
 0x4ec   :  { %757 = vrot.lane.b32.xlu0 %v5298_v13, %s5050_s1 }
 0x4f0   :  { %852 = vrot.lane.b32.xlu0 %v5279_v51, %s5051_s5 }
 0x4fe   :  { %744 = vadd.xlane.f32.xlu1 %v743_v60 }
 0x50f   :  { %905 = vrot.lane.b32.xlu1 %v5286_v4, %s5051_s5 }
 0x513   :  { %903 = vrot.lane.b32.xlu1 %v5288_v7, %s5051_s5 }
 0x550   :  { %v736_v63 = vpop.xlane.xlu0 %735 }
 0x552   :  { %v739_v61 = vpop.xlane.xlu1 %738 }
 0x553   :  { %4891 = vrcp.f32 %v739_v61 }
 0x554   :  { %4893 = vrcp.f32 %v736_v63 }
 0x556   :  { %v806_v62 = vpop.permute.xlu1 %805 }
 0x557   :  { %4397 = vmatpush3.bf16.msra.mxu0 %v806_v62 }
 0x558   :  { %4408 = vmatprep.subr.bf16.mxu0 %v5048_v31 }
 0x55a   :  { %v855_v10 = vpop.permute.xlu1 %854 }
 0x55b   :  { %v860_v11 = vsel %vm372_vm1, %v855_v10, 0 }
 0x55d   :  { %v4892_v0 = vpop.eup %4891 }
 0x55e   :  { %v4894_v3 = vpop.eup %4893  ;;  %v751_v5 = vmul.f32 %v4892_v0, %v4886_v46 }
 0x55f   :  { %v750_v6 = vmul.f32 %v4894_v3, %v4884_v44 }
 0x561   :  { %v754_v9 = vpack.c.bf16 %v751_v5, %v750_v6 }
 0x563   :  { %v742_v1 = vpop.xlane.xlu0 %741 }
 0x564   :  { %4895 = vrcp.f32 %v742_v1 }
 0x567   :  { %v758_v8 = vpop.permute.xlu0 %757 }
 0x568   :  { %4391 = vmatpush3.bf16.msra.mxu1 %v758_v8 }
 0x569   :  { %4402 = vmatprep.subr.bf16.mxu1 %v5048_v31 }
 0x56b   :  { %4393 = vmatmul.mubr.msk.bf16.vlgmr.msra.gmra.mrb[16].mxu1 %vm467_vm2, %v754_v9  ;;  %v853_v15 = vpop.permute.xlu0 %852 }
 0x56c   :  { %4404 = vmatprep.mubr.msk.bf16.mxu1 %vm5049_vm0, %v5048_v31 }
 0x56e   :  { %v4896_v18 = vpop.eup %4895 }
 0x56f   :  { %v752_v20 = vmul.f32 %v4896_v18, %v4888_v54 }
 0x571   :  { %4403 = vmatpush3.bf16.xpose.msra.mxu1 %v860_v11 }
 0x572   :  { %4414 = vmatprep.subr.bf16.mxu1 %v5048_v31 }
 0x578   :  { %4405 = vmatmul.mubr.msk.bf16.vlgmr.msra.gmra.mrb[20].mxu1 %vm372_vm1, %v853_v15 }
 0x579   :  { %4416 = vmatprep.mubr.msk.bf16.mxu1 %vm5049_vm0, %v5048_v31 }
 0x58b   :  { %v745_v17 = vpop.xlane.xlu1 %744 }
 0x58c   :  { %4897 = vrcp.f32 %v745_v17 }
 0x58f   :  { %v906_v22 = vpop.permute.xlu1 %905 }
 0x590   :  { %v911_v25 = vsel %vm372_vm1, %v906_v22, 0 }
 0x593   :  { %v904_v27 = vpop.permute.xlu1 %903 }
 0x596   :  { %v4898_v19 = vpop.eup %4897 }
 0x597   :  { %v753_v21 = vmul.f32 %v4898_v19, %v4890_v59 }
 0x599   :  { %v755_v23 = vpack.c.bf16 %v753_v21, %v752_v20 }
 0x59b   :  { %4399 = vmatmul.mubr.msk.bf16.vlgmr.msra.gmra.mrb[20].mxu0 %vm467_vm2, %v755_v23 }
 0x59c   :  { %4409 = vmatpush3.bf16.xpose.msra.mxu0 %v911_v25  ;;  %4410 = vmatprep.mubr.msk.bf16.mxu0 %vm5049_vm0, %v5048_v31 }
 0x59d   :  { %4420 = vmatprep.subr.bf16.mxu0 %v5048_v31 }
 0x5a3   :  { %4411 = vmatmul.mubr.msk.bf16.vlgmr.msra.gmra.mrb[24].mxu0 %vm372_vm1, %v904_v27 }
 0x5a4   :  { %4422 = vmatprep.mubr.msk.bf16.mxu0 %vm5049_vm0, %v5048_v31 }
 0x63e   :  { %v5387_v28 = vpop.f32.mrb[16].mxu1 }
 0x63f   :  { %v4394_v29 = vpop.f32.mrb[17].mxu1 }
 0x640   :  { %v5389_v30 = vpop.f32.mrb[18].mxu1 }
 0x641   :  { %v4647_v32 = vpack.i.bf16 %v5389_v30, %v5387_v28  ;;  %v4395_v35 = vpop.f32.mrb[19].mxu1 }
 0x64b   :  { %v896_v37 = vpop.f32.mrb[20].mxu1 }
 0x64c   :  { %v4406_v38 = vpop.f32.mrb[21].mxu1  ;;  %v954_v39 = vsel %vm467_vm2, %v896_v37, -inf }
 0x64d   :  { %955 = vmax.xlane.f32.xlu0 %v954_v39  ;;  %v899_v40 = vpop.f32.mrb[22].mxu1 }
 0x64e   :  { %v4407_v41 = vpop.f32.mrb[23].mxu1  ;;  %v957_v42 = vsel %vm467_vm2, %v899_v40, -inf }
 0x64f   :  { %958 = vmax.xlane.f32.xlu1 %v957_v42 }
 0x66e   :  { %v5395_v43 = vpop.f32.mrb[20].mxu0 }
 0x66f   :  { %v4400_v44 = vpop.f32.mrb[21].mxu0 }
 0x670   :  { %v5397_v45 = vpop.f32.mrb[22].mxu0 }
 0x671   :  { %v4652_v46 = vpack.i.bf16 %v5397_v45, %v5395_v43  ;;  %v4401_v47 = vpop.f32.mrb[23].mxu0 }
 0x676   :  { %v947_v48 = vpop.f32.mrb[24].mxu0 }
 0x677   :  { %v4412_v52 = vpop.f32.mrb[25].mxu0  ;;  %v960_v53 = vsel %vm467_vm2, %v947_v48, -inf }
 0x678   :  { %v950_v54 = vpop.f32.mrb[26].mxu0  ;;  %961 = vmax.xlane.f32.xlu0 %v960_v53 }
 0x679   :  { %v4413_v55 = vpop.f32.mrb[27].mxu0  ;;  %v963_v56 = vsel %vm467_vm2, %v950_v54, -inf }
 0x67c   :  { %964 = vmax.xlane.f32.xlu0 %v963_v56 }
 0x6da   :  { %v956_v57 = vpop.xlane.xlu0 %955 }
 0x6db   :  { %v966_v58 = vsub.f32 %v896_v37, %v956_v57 }
 0x6dc   :  { %v959_v59 = vpop.xlane.xlu1 %958 }
 0x6dd   :  { %v970_v60 = vmul.f32 1.442695, %v966_v58  ;;  %v967_v61 = vsub.f32 %v899_v40, %v959_v59 }
 0x6df   :  { %4899 = vpow2.f32 %v970_v60  ;;  %v972_v62 = vmul.f32 1.442695, %v967_v61 }
 0x6e1   :  { %4901 = vpow2.f32 %v972_v62 }
 0x6e9   :  { %v4900_v63 = vpop.eup %4899 }
 0x6ea   :  { %v978_v0 = vsel %vm467_vm2, %v4900_v63, 0.0 }
 0x6eb   :  { %v4902_v1 = vpop.eup %4901  ;;  %979 = vadd.xlane.f32.xlu0 %v978_v0 }
 0x6ec   :  { %v981_v3 = vsel %vm467_vm2, %v4902_v1, 0.0 }
 0x6ed   :  { %982 = vadd.xlane.f32.xlu1 %v981_v3 }
 0x6fe   :  { %1047 = vrot.lane.b32.xlu1 %v5294_v12, %s5051_s5 }
 0x702   :  { %1096 = vrot.lane.b32.xlu1 %v5277_v50, %s5052_s24 }
 0x705   :  { %v962_v5 = vpop.xlane.xlu0 %961 }
 0x706   :  { %v968_v6 = vsub.f32 %v947_v48, %v962_v5 }
 0x708   :  { %v974_v8 = vmul.f32 1.442695, %v968_v6 }
 0x709   :  { %v965_v9 = vpop.xlane.xlu0 %964 }
 0x70a   :  { %4903 = vpow2.f32 %v974_v8  ;;  %v969_v10 = vsub.f32 %v950_v54, %v965_v9 }
 0x70c   :  { %v976_v15 = vmul.f32 1.442695, %v969_v10 }
 0x70e   :  { %4905 = vpow2.f32 %v976_v15 }
 0x714   :  { %v4904_v11 = vpop.eup %4903 }
 0x715   :  { %v984_v17 = vsel %vm467_vm2, %v4904_v11, 0.0 }
 0x716   :  { %985 = vadd.xlane.f32.xlu0 %v984_v17 }
 0x718   :  { %v4906_v18 = vpop.eup %4905 }
 0x719   :  { %v987_v19 = vsel %vm467_vm2, %v4906_v18, 0.0 }
 0x726   :  { %988 = vadd.xlane.f32.xlu1 %v987_v19 }
 0x72c   :  { %1000 = vrot.lane.b32.xlu0 %v5298_v13, %s5051_s5 }
 0x730   :  { %1094 = vrot.lane.b32.xlu0 %v5279_v51, %s5052_s24 }
 0x737   :  { %1147 = vrot.lane.b32.xlu1 %v5286_v4, %s5052_s24 }
 0x73b   :  { %1145 = vrot.lane.b32.xlu1 %v5288_v7, %s5052_s24 }
 0x778   :  { %v980_v21 = vpop.xlane.xlu0 %979 }
 0x77a   :  { %v983_v50 = vpop.xlane.xlu1 %982 }
 0x77b   :  { %4907 = vrcp.f32 %v983_v50 }
 0x77c   :  { %4909 = vrcp.f32 %v980_v21 }
 0x77e   :  { %v1048_v20 = vpop.permute.xlu1 %1047 }
 0x77f   :  { %4421 = vmatpush3.bf16.msra.mxu0 %v1048_v20 }
 0x780   :  { %4432 = vmatprep.subr.bf16.mxu0 %v5048_v31 }
 0x782   :  { %v1097_v4 = vpop.permute.xlu1 %1096 }
 0x783   :  { %v1102_v7 = vsel %vm372_vm1, %v1097_v4, 0 }
 0x785   :  { %v4908_v22 = vpop.eup %4907 }
 0x786   :  { %v4910_v25 = vpop.eup %4909  ;;  %v995_v27 = vmul.f32 %v4908_v22, %v4902_v1 }
 0x787   :  { %v994_v29 = vmul.f32 %v4910_v25, %v4900_v63 }
 0x789   :  { %v998_v35 = vpack.c.bf16 %v995_v27, %v994_v29 }
 0x7a3   :  { %v986_v23 = vpop.xlane.xlu0 %985 }
 0x7a4   :  { %4911 = vrcp.f32 %v986_v23 }
 0x7a7   :  { %v1001_v51 = vpop.permute.xlu0 %1000 }
 0x7a8   :  { %4415 = vmatpush3.bf16.msra.mxu1 %v1001_v51 }
 0x7a9   :  { %4426 = vmatprep.subr.bf16.mxu1 %v5048_v31 }
 0x7ab   :  { %4417 = vmatmul.mubr.msk.bf16.vlgmr.msra.gmra.mrb[24].mxu1 %vm467_vm2, %v998_v35  ;;  %v1095_v38 = vpop.permute.xlu0 %1094 }
 0x7ac   :  { %4428 = vmatprep.mubr.msk.bf16.mxu1 %vm5049_vm0, %v5048_v31 }
 0x7ae   :  { %v4912_v39 = vpop.eup %4911 }
 0x7af   :  { %v996_v41 = vmul.f32 %v4912_v39, %v4904_v11 }
 0x7b1   :  { %4427 = vmatpush3.bf16.xpose.msra.mxu1 %v1102_v7 }
 0x7b2   :  { %4438 = vmatprep.subr.bf16.mxu1 %v5048_v31 }
 0x7b3   :  { %v989_v37 = vpop.xlane.xlu1 %988 }
 0x7b4   :  { %4913 = vrcp.f32 %v989_v37 }
 0x7b7   :  { %v1148_v44 = vpop.permute.xlu1 %1147 }
 0x7b8   :  { %4429 = vmatmul.mubr.msk.bf16.vlgmr.msra.gmra.mrb[28].mxu1 %vm372_vm1, %v1095_v38  ;;  %v1153_v48 = vsel %vm372_vm1, %v1148_v44, 0 }
 0x7b9   :  { %4440 = vmatprep.mubr.msk.bf16.mxu1 %vm5049_vm0, %v5048_v31 }
 0x7bb   :  { %v1146_v52 = vpop.permute.xlu1 %1145 }
 0x7be   :  { %v4914_v40 = vpop.eup %4913 }
 0x7bf   :  { %v997_v42 = vmul.f32 %v4914_v40, %v4906_v18 }
 0x7c1   :  { %v999_v47 = vpack.c.bf16 %v997_v42, %v996_v41 }
 0x7c3   :  { %4423 = vmatmul.mubr.msk.bf16.vlgmr.msra.gmra.mrb[28].mxu0 %vm467_vm2, %v999_v47 }
 0x7c4   :  { %4433 = vmatpush3.bf16.xpose.msra.mxu0 %v1153_v48  ;;  %4434 = vmatprep.mubr.msk.bf16.mxu0 %vm5049_vm0, %v5048_v31 }
 0x7c5   :  { %4444 = vmatprep.subr.bf16.mxu0 %v5048_v31 }
 0x7cb   :  { %4435 = vmatmul.mubr.msk.bf16.vlgmr.msra.gmra.mrb[32].mxu0 %vm372_vm1, %v1146_v52 }
 0x7cc   :  { %4446 = vmatprep.mubr.msk.bf16.mxu0 %vm5049_vm0, %v5048_v31 }
 0x87e   :  { %v1040_v53 = vpop.f32.mrb[24].mxu1 }
 0x87f   :  { %v4418_v54 = vpop.f32.mrb[25].mxu1 }
 0x880   :  { %v1043_v55 = vpop.f32.mrb[26].mxu1 }
 0x881   :  { %v4657_v56 = vpack.i.bf16 %v1043_v55, %v1040_v53  ;;  %v4419_v57 = vpop.f32.mrb[27].mxu1 }
 0x882   :  { %v4739_v57 = vld [vmem:[%s6271_s26] sm:$0xff]  }
 0x88b   :  { %v1138_v58 = vpop.f32.mrb[28].mxu1 }
 0x88c   :  { %v4430_v59 = vpop.f32.mrb[29].mxu1  ;;  %v1196_v60 = vsel %vm467_vm2, %v1138_v58, -inf }
 0x88d   :  { %1197 = vmax.xlane.f32.xlu0 %v1196_v60  ;;  %v1141_v61 = vpop.f32.mrb[30].mxu1  ;;  %v4741_v59 = vld [vmem:[%s6271_s26 + $0x10] sm:$0xff]   ;;  %v4742_v60 = vld [vmem:[%s6271_s26 + $0x18] sm:$0xff]  }
 0x88e   :  { %v4431_v62 = vpop.f32.mrb[31].mxu1  ;;  %v1199_v63 = vsel %vm467_vm2, %v1141_v61, -inf }
 0x88f   :  { %1200 = vmax.xlane.f32.xlu1 %v1199_v63  ;;  %v4744_v62 = vld [vmem:[%s6271_s26 + $0x28] sm:$0xff]   ;;  %v4745_v63 = vld [vmem:[%s6271_s26 + $0x30] sm:$0xff]  }
 0x896   :  { %v1087_v0 = vpop.f32.mrb[28].mxu0 }
 0x897   :  { %v4424_v1 = vpop.f32.mrb[29].mxu0 }
 0x898   :  { %v1090_v3 = vpop.f32.mrb[30].mxu0 }
 0x899   :  { %v4662_v5 = vpack.i.bf16 %v1090_v3, %v1087_v0  ;;  %v4425_v6 = vpop.f32.mrb[31].mxu0 }
 0x89e   :  { %v1189_v8 = vpop.f32.mrb[32].mxu0 }
 0x89f   :  { %v4436_v9 = vpop.f32.mrb[33].mxu0  ;;  %v1202_v10 = vsel %vm467_vm2, %v1189_v8, -inf }
 0x8a0   :  { %v1192_v11 = vpop.f32.mrb[34].mxu0  ;;  %1203 = vmax.xlane.f32.xlu0 %v1202_v10 }
 0x8a1   :  { %v4437_v15 = vpop.f32.mrb[35].mxu0  ;;  %v1205_v17 = vsel %vm467_vm2, %v1192_v11, -inf }
 0x8a4   :  { %1206 = vmax.xlane.f32.xlu0 %v1205_v17 }
 0x91a   :  { %v1198_v18 = vpop.xlane.xlu0 %1197 }
 0x91b   :  { %v1208_v19 = vsub.f32 %v1138_v58, %v1198_v18  ;;  %v4740_v58 = vld [vmem:[%s6271_s26 + $0x8] sm:$0xff]  }
 0x91c   :  { %v1201_v50 = vpop.xlane.xlu1 %1200 }
 0x91d   :  { %v1212_v20 = vmul.f32 1.442695, %v1208_v19  ;;  %v1209_v21 = vsub.f32 %v1141_v61, %v1201_v50  ;;  %v4743_v61 = vld [vmem:[%s6271_s26 + $0x20] sm:$0xff]  }
 0x91f   :  { %4915 = vpow2.f32 %v1212_v20  ;;  %v1214_v22 = vmul.f32 1.442695, %v1209_v21 }
 0x921   :  { %4917 = vpow2.f32 %v1214_v22 }
 0x929   :  { %v4916_v23 = vpop.eup %4915 }
 0x92a   :  { %v1220_v25 = vsel %vm467_vm2, %v4916_v23, 0.0 }
 0x92b   :  { %v4918_v27 = vpop.eup %4917  ;;  %1221 = vadd.xlane.f32.xlu0 %v1220_v25 }
 0x92c   :  { %v1223_v29 = vsel %vm467_vm2, %v4918_v27, 0.0 }
 0x92d   :  { %v1204_v51 = vpop.xlane.xlu0 %1203  ;;  %1224 = vadd.xlane.f32.xlu1 %v1223_v29 }
 0x92e   :  { %v1210_v35 = vsub.f32 %v1189_v8, %v1204_v51  ;;  %v4746_v8 = vld [vmem:[%s6271_s26 + $0x38] sm:$0xff]   ;;  %s6273_s26 = sld [smem:[#allocation11_spill]] }
 0x930   :  { %v1216_v4 = vmul.f32 1.442695, %v1210_v35 }
 0x931   :  { %v1207_v7 = vpop.xlane.xlu0 %1206 }
 0x932   :  { %4919 = vpow2.f32 %v1216_v4  ;;  %v1211_v37 = vsub.f32 %v1192_v11, %v1207_v7 }
 0x934   :  { %v1218_v38 = vmul.f32 1.442695, %v1211_v37 }
 0x936   :  { %4921 = vpow2.f32 %v1218_v38 }
 0x93c   :  { %v4920_v39 = vpop.eup %4919 }
 0x93d   :  { %v1226_v40 = vsel %vm467_vm2, %v4920_v39, 0.0 }
 0x93e   :  { %1227 = vadd.xlane.f32.xlu0 %v1226_v40 }
 0x940   :  { %v4922_v41 = vpop.eup %4921 }
 0x941   :  { %v1229_v42 = vsel %vm467_vm2, %v4922_v41, 0.0 }
 0x942   :  { %1230 = vadd.xlane.f32.xlu1 %v1229_v42 }
 0x953   :  { %1289 = vrot.lane.b32.xlu1 %v5294_v12, %s5052_s24 }
 0x954   :  { %1242 = vrot.lane.b32.xlu0 %v5298_v13, %s5052_s24 }
 0x957   :  { %4648 = vrot.lane.b32.xlu1 %v4647_v32, %s5052_s24 }
 0x958   :  { %4658 = vrot.lane.b32.xlu0 %v4657_v56, %s5051_s5 }
 0x95b   :  { %4653 = vrot.lane.b32.xlu1 %v4652_v46, %s5052_s24 }
 0x95f   :  { %4663 = vrot.lane.b32.xlu1 %v4662_v5, %s5051_s5 }
 0x9b8   :  { %v1222_v47 = vpop.xlane.xlu0 %1221 }
 0x9ba   :  { %v1225_v44 = vpop.xlane.xlu1 %1224 }
 0x9bb   :  { %4923 = vrcp.f32 %v1225_v44 }
 0x9bc   :  { %4925 = vrcp.f32 %v1222_v47 }
 0x9c5   :  { %v4924_v12 = vpop.eup %4923 }
 0x9c6   :  { %v4926_v48 = vpop.eup %4925  ;;  %v1237_v52 = vmul.f32 %v4924_v12, %v4918_v27 }
 0x9c7   :  { %v1236_v28 = vmul.f32 %v4926_v48, %v4916_v23 }
 0x9c9   :  { %v1240_v53 = vpack.c.bf16 %v1237_v52, %v1236_v28 }
 0x9cb   :  { %v1228_v13 = vpop.xlane.xlu0 %1227 }
 0x9cc   :  { %4927 = vrcp.f32 %v1228_v13 }
 0x9cf   :  { %v1243_v30 = vpop.permute.xlu0 %1242  ;;  %v1231_v32 = vpop.xlane.xlu1 %1230 }
 0x9d0   :  { %4929 = vrcp.f32 %v1231_v32  ;;  %4439 = vmatpush3.bf16.msra.mxu1 %v1243_v30 }
 0x9d1   :  { %4450 = vmatprep.subr.bf16.mxu1 %v4739_v57 }
 0x9d3   :  { %4441 = vmatmul.mubr.msk.bf16.vlgmr.msra.gmra.mrb[32].mxu1 %vm467_vm2, %v1240_v53  ;;  %v1290_v43 = vpop.permute.xlu1 %1289  ;;  %v4659_v20 = vpop.permute.xlu0 %4658 }
 0x9d4   :  { %4445 = vmatpush3.bf16.msra.mxu0 %v1290_v43  ;;  %4451 = vmatpush3.bf16.msra.mxu1 %v4739_v57  ;;  %v4661_v23 = vunpack.i.h.bf16 %v4659_v20  ;;  %v4660_v25 = vunpack.i.l.bf16 %v4659_v20  ;;  %v5019_v57 = vld [vmem:[%s6269_s30] sm:$0xff]  ;;  %v4762_v20 = vld [vmem:[%s6241_s8 + $0x50] ss:$8 sps:$4 sm:$0xff]  }
 0x9d5   :  { %4452 = vmatprep.subr.bf16.mxu1 %v4740_v58 }
 0x9d6   :  { %v4928_v45 = vpop.eup %4927 }
 0x9d7   :  { %v1238_v54 = vmul.f32 %v4928_v45, %v4920_v39  ;;  %v4649_v18 = vpop.permute.xlu1 %4648 }
 0x9d8   :  { %4453 = vmatpush3.bf16.msra.mxu1 %v4740_v58  ;;  %v4651_v19 = vunpack.i.h.bf16 %v4649_v18  ;;  %v4650_v50 = vunpack.i.l.bf16 %v4649_v18  ;;  %v4761_v18 = vld [vmem:[%s6241_s8 + $0x44] ss:$8 sps:$4 sm:$0xff]  }
 0x9d9   :  { %4454 = vmatprep.subr.bf16.mxu1 %v4741_v59 }
 0x9da   :  { %v4930_v46 = vpop.eup %4929  ;;  %v1385_v21 = vsel %vm372_vm1, %v5343_v16, %v4651_v19  ;;  %v1384_v22 = vsel %vm372_vm1, %v5341_v14, %v4650_v50  ;;  %v4759_v19 = vld [vmem:[%s6241_s8 + $0x40] ss:$8 sps:$4 sm:$0xff]   ;;  %v4764_v50 = vld [vmem:[%s6241_s8 + $0x54] ss:$8 sps:$4 sm:$0xff]  }
 0x9db   :  { %v1239_v55 = vmul.f32 %v4930_v46, %v4922_v41  ;;  %v4654_v29 = vpop.permute.xlu1 %4653  ;;  %v1389_v4 = vsel %vm1388_vm3, %v1384_v22, %v4660_v25  ;;  %v1390_v7 = vsel %vm1388_vm3, %v1385_v21, %v4661_v23  ;;  %v4767_v21 = vld [vmem:[%s6241_s8 + $0x64] ss:$8 sps:$4 sm:$0xff]   ;;  %v4765_v22 = vld [vmem:[%s6241_s8 + $0x60] ss:$8 sps:$4 sm:$0xff]   ;;  %v4770_v23 = vld [vmem:[%s6241_s8 + $0x74] ss:$8 sps:$4 sm:$0xff]  }
 0x9dc   :  { %4455 = vmatpush3.bf16.msra.mxu1 %v4741_v59  ;;  %v4656_v14 = vunpack.i.h.bf16 %v4654_v29  ;;  %v4655_v40 = vunpack.i.l.bf16 %v4654_v29  ;;  %v5020_v59 = vld [vmem:[%s6269_s30 + $0x8] sm:$0xff]  ;;  %v4768_v25 = vld [vmem:[%s6241_s8 + $0x70] ss:$8 sps:$4 sm:$0xff]  }
 0x9dd   :  { %v1241_v56 = vpack.c.bf16 %v1239_v55, %v1238_v54  ;;  %4456 = vmatprep.subr.bf16.mxu1 %v4742_v60 }
 0x9de   :  { %v1387_v47 = vsel %vm372_vm1, %v5349_v26, %v4656_v14  ;;  %v1386_v12 = vsel %vm372_vm1, %v5347_v24, %v4655_v40  ;;  %v4028_v26 = vld [vmem:[%s6272_s29] ss:$0 sm:$0xff]  ;;  %s6274_s29 = sld [smem:[#allocation6_spill]] }
 0x9df   :  { %4447 = vmatmul.mubr.msk.bf16.vlgmr.msra.gmra.mrb[36].mxu0 %vm467_vm2, %v1241_v56  ;;  %v4664_v39 = vpop.permute.xlu1 %4663 }
 0x9e0   :  { %4457 = vmatpush3.bf16.msra.mxu1 %v4742_v60  ;;  %v4666_v41 = vunpack.i.h.bf16 %v4664_v39  ;;  %v4665_v42 = vunpack.i.l.bf16 %v4664_v39 }
 0x9e1   :  { %4458 = vmatprep.subr.bf16.mxu1 %v4743_v61 }
 0x9e2   :  { %v1391_v52 = vsel %vm1388_vm3, %v1386_v12, %v4665_v42  ;;  %v1392_v28 = vsel %vm1388_vm3, %v1387_v47, %v4666_v41 }
 0x9e4   :  { %4459 = vmatpush3.bf16.msra.mxu1 %v4743_v61  ;;  %v77_v12 = vld [vmem:[%s6274_s29] sm:$0xff] }
 0x9e5   :  { %4460 = vmatprep.subr.bf16.mxu1 %v4744_v62 }
 0x9e8   :  { %4461 = vmatpush3.bf16.msra.mxu1 %v4744_v62  ;;  %v5021_v62 = vld [vmem:[%s6269_s30 + $0x10] sm:$0xff] }
 0x9e9   :  { %4462 = vmatprep.subr.bf16.mxu1 %v4745_v63 }
 0x9ec   :  { %4463 = vmatpush3.bf16.msra.mxu1 %v4745_v63 }
 0x9ed   :  { %4464 = vmatprep.subr.bf16.mxu1 %v4746_v8 }
 0x9f0   :  { %4465 = vmatpush3.bf16.msra.mxu1 %v4746_v8  ;;  %v4750_v8 = vld [vmem:[%s6241_s8 + $0x10] ss:$8 sps:$4 sm:$0xff]  }
 0xaa6   :  { %v1282_v0 = vpop.f32.mrb[32].mxu1 }
 0xaa7   :  { %v4442_v1 = vpop.f32.mrb[33].mxu1 }
 0xaa8   :  { %v1285_v3 = vpop.f32.mrb[34].mxu1 }
 0xaa9   :  { %v4667_v5 = vpack.i.bf16 %v1285_v3, %v1282_v0  ;;  %v4443_v6 = vpop.f32.mrb[35].mxu1  ;;  %v5022_v0 = vld [vmem:[%s6269_s30 + $0x18] sm:$0xff]  ;;  %v4747_v3 = vld [vmem:[%s6241_s8] ss:$8 sps:$4 sm:$0xff]  }
 0xaaa   :  { %v4752_v6 = vld [vmem:[%s6241_s8 + $0x14] ss:$8 sps:$4 sm:$0xff]  }
 0xaab   :  { %4668 = vrot.lane.b32.xlu0 %v4667_v5, %s5050_s1  ;;  %v4749_v5 = vld [vmem:[%s6241_s8 + $0x4] ss:$8 sps:$4 sm:$0xff]  }
 0xaac   :  { %1824 = vmatprep.subr.bf16.mxu1 %v4749_v5 }
 0xab2   :  { %v1329_v9 = vpop.f32.mrb[36].mxu0 }
 0xab3   :  { %v4448_v10 = vpop.f32.mrb[37].mxu0 }
 0xab4   :  { %v1332_v11 = vpop.f32.mrb[38].mxu0  ;;  %v4771_v10 = vld [vmem:[%s6273_s26] sm:$0xff]  }
 0xab5   :  { %v4672_v15 = vpack.i.bf16 %v1332_v11, %v1329_v9  ;;  %v4449_v17 = vpop.f32.mrb[39].mxu0  ;;  %v4755_v9 = vld [vmem:[%s6241_s8 + $0x24] ss:$8 sps:$4 sm:$0xff]   ;;  %v4753_v11 = vld [vmem:[%s6241_s8 + $0x20] ss:$8 sps:$4 sm:$0xff]   ;;  %4470 = vmatprep.subr.bf16.mxu0 %v4771_v10 }
 0xab6   :  { %4471 = vmatpush3.bf16.msra.mxu0 %v4771_v10  ;;  %v4756_v17 = vld [vmem:[%s6241_s8 + $0x30] ss:$8 sps:$4 sm:$0xff]  }
 0xab7   :  { %4673 = vrot.lane.b32.xlu1 %v4672_v15, %s5050_s1  ;;  %v4758_v15 = vld [vmem:[%s6241_s8 + $0x34] ss:$8 sps:$4 sm:$0xff]  }
 0xb1d   :  { %v4669_v27 = vpop.permute.xlu0 %4668 }
 0xb1e   :  { %v4671_v51 = vunpack.i.h.bf16 %v4669_v27  ;;  %v4670_v35 = vunpack.i.l.bf16 %v4669_v27 }
 0xb20   :  { %v1394_v37 = vsel %vm1393_vm4, %v1389_v4, %v4670_v35  ;;  %v1395_v38 = vsel %vm1393_vm4, %v1390_v7, %v4671_v51 }
 0xb21   :  { %v1398_v16 = vpack.c.bf16 %v1395_v38, %v1394_v37 }
 0xb23   :  { %4466 = vmatprep.mubr.bf16.mxu1 %v1398_v16 }
 0xb29   :  { %v4674_v44 = vpop.permute.xlu1 %4673 }
 0xb2a   :  { %v4676_v13 = vunpack.i.h.bf16 %v4674_v44  ;;  %v4675_v48 = vunpack.i.l.bf16 %v4674_v44 }
 0xb2c   :  { %v1396_v30 = vsel %vm1393_vm4, %v1391_v52, %v4675_v48  ;;  %v1397_v32 = vsel %vm1393_vm4, %v1392_v28, %v4676_v13  ;;  %v78_v13 = vld [vmem:[%s6274_s29 + $0x8] sm:$0xff]  ;;  %v79_v28 = vld [vmem:[%s6274_s29 + $0x10] sm:$0xff] }
 0xb2d   :  { %v1399_v53 = vpack.c.bf16 %v1397_v32, %v1396_v30  ;;  %v1713_v48 = vpack.c.bf16 %v78_v13, %v77_v12  ;;  %v4772_v52 = vld [vmem:[%s6273_s26 + $0x8] sm:$0xff]   ;;  %v80_v30 = vld [vmem:[%s6274_s29 + $0x18] sm:$0xff]  ;;  %v4773_v32 = vld [vmem:[%s6273_s26 + $0x10] sm:$0xff]  }
 0xb2e   :  { %4472 = vmatprep.subr.bf16.mxu0 %v4772_v52 }
 0xb2f   :  { %4467 = vmatmul.mubr.bf16.vlgmr.msra.gmra.mrb[36].mxu1 %v1399_v53  ;;  %4473 = vmatpush3.bf16.msra.mxu0 %v4772_v52  ;;  %v1714_v53 = vpack.c.bf16 %v80_v30, %v79_v28 }
 0xb30   :  { %1856 = vmatprep.mubr.bf16.mxu1 %v5047_v2  ;;  %1825 = vmatpush1.bf16.msra.mxu1 %v4747_v3 }
 0xb31   :  { %1826 = vmatprep.subr.bf16.mxu1 %v4752_v6  ;;  %4474 = vmatprep.subr.bf16.mxu0 %v4773_v32 }
 0xb33   :  { %4475 = vmatpush3.bf16.msra.mxu0 %v4773_v32 }
 0xb34   :  { %1827 = vmatpush1.bf16.msra.mxu1 %v4750_v8 }
 0xb35   :  { %1828 = vmatprep.subr.bf16.mxu1 %v4755_v9  ;;  %v4037_v9 = vld [vmem:[%s6249_s16] ss:$0 sm:$0xff] }
 0xb38   :  { %1829 = vmatpush1.bf16.msra.mxu1 %v4753_v11 }
 0xb39   :  { %1830 = vmatprep.subr.bf16.mxu1 %v4758_v15 }
 0xb3c   :  { %1831 = vmatpush1.bf16.msra.mxu1 %v4756_v17 }
 0xb3d   :  { %1832 = vmatprep.subr.bf16.mxu1 %v4761_v18 }
 0xb40   :  { %1833 = vmatpush1.bf16.msra.mxu1 %v4759_v19  ;;  %v4038_v19 = vld [vmem:[%s6250_s17] ss:$0 sm:$0xff] }
 0xb41   :  { %1834 = vmatprep.subr.bf16.mxu1 %v4764_v50 }
 0xb44   :  { %1835 = vmatpush1.bf16.msra.mxu1 %v4762_v20 }
 0xb45   :  { %1836 = vmatprep.subr.bf16.mxu1 %v4767_v21 }
 0xb48   :  { %1837 = vmatpush1.bf16.msra.mxu1 %v4765_v22 }
 0xb49   :  { %1838 = vmatprep.subr.bf16.mxu1 %v4770_v23 }
 0xb4c   :  { %1839 = vmatpush1.bf16.msra.mxu1 %v4768_v25 }
 0xb4d   :  { %4490 = vmatprep.subr.bf16.mxu1 %v5048_v31 }
 0xb4f   :  { %1857 = vmatmul.mubr.bf16.vlgmr.msra.gmra.mrb[40].mxu1 %v1713_v48 }
 0xb50   :  { %1866 = vmatprep.mubr.bf16.mxu1 %v5047_v2 }
 0xb57   :  { %1867 = vmatmul.mubr.bf16.gmra.mrb[44].mxu1 %v1714_v53 }
 0xb58   :  { %1876 = vmatprep.mubr.bf16.mxu1 %v5047_v2 }
 0xc02   :  { %v4468_v43 = vpop.f32.mrb[36].mxu1 }
 0xc03   :  { %v1505_v24 = vpop.f32.mrb[37].mxu1  ;;  %v1514_v55 = vadd.f32 %v4468_v43, %v4028_v26  ;;  %v81_v43 = vld [vmem:[%s6274_s29 + $0x20] sm:$0xff] }
 0xc04   :  { %v1506_v45 = vadd.f32 %v4028_v26, %v1505_v24  ;;  %v4469_v46 = vpop.f32.mrb[38].mxu1  ;;  %v82_v24 = vld [vmem:[%s6274_s29 + $0x28] sm:$0xff] }
 0xc05   :  { %v1508_v54 = vpop.f32.mrb[39].mxu1  ;;  %v1517_v61 = vadd.f32 %v4469_v46, %v4028_v26  ;;  %v1522_v63 = vadd.f32 %v5021_v62, %v1514_v55  ;;  %v1715_v46 = vpack.c.bf16 %v82_v24, %v81_v43  ;;  %v4777_v55 = vld [vmem:[%s6273_s26 + $0x30] sm:$0xff]  }
 0xc06   :  { %v1509_v56 = vadd.f32 %v4028_v26, %v1508_v54  ;;  %v1520_v58 = vadd.f32 %v5019_v57, %v1506_v45  ;;  %v4774_v26 = vld [vmem:[%s6273_s26 + $0x18] sm:$0xff]   ;;  %v4775_v45 = vld [vmem:[%s6273_s26 + $0x20] sm:$0xff]   ;;  %v4776_v54 = vld [vmem:[%s6273_s26 + $0x28] sm:$0xff]  }
 0xc07   :  { %v1523_v1 = vadd.f32 %v5022_v0, %v1517_v61  ;;  %4476 = vmatprep.subr.bf16.mxu0 %v4774_v26  ;;  %1877 = vmatmul.mubr.bf16.gmra.mrb[48].mxu1 %v1715_v46 }
 0xc08   :  { %1524 = vadd.xlane.f32.xlu0 %v1520_v58  ;;  %v1521_v60 = vadd.f32 %v5020_v59, %v1509_v56  ;;  %4477 = vmatpush3.bf16.msra.mxu0 %v4774_v26  ;;  %v4778_v56 = vld [vmem:[%s6273_s26 + $0x38] sm:$0xff]  }
 0xc09   :  { %4478 = vmatprep.subr.bf16.mxu0 %v4775_v45  ;;  %4494 = vmatprep.mubr.msk.bf16.mxu1 %vm5049_vm0, %v5048_v31 }
 0xc0a   :  { %1526 = vadd.xlane.f32.xlu1 %v1521_v60 }
 0xc0c   :  { %1528 = vadd.xlane.f32.xlu0 %v1522_v63  ;;  %4479 = vmatpush3.bf16.msra.mxu0 %v4775_v45 }
 0xc0d   :  { %4480 = vmatprep.subr.bf16.mxu0 %v4776_v54 }
 0xc10   :  { %1530 = vadd.xlane.f32.xlu0 %v1523_v1  ;;  %4481 = vmatpush3.bf16.msra.mxu0 %v4776_v54 }
 0xc11   :  { %4482 = vmatprep.subr.bf16.mxu0 %v4777_v55 }
 0xc14   :  { %4483 = vmatpush3.bf16.msra.mxu0 %v4777_v55 }
 0xc15   :  { %4484 = vmatprep.subr.bf16.mxu0 %v4778_v56 }
 0xc18   :  { %4485 = vmatpush3.bf16.msra.mxu0 %v4778_v56 }
 0xc19   :  { %4498 = vmatprep.subr.bf16.mxu0 %v5048_v31 }
 0xc95   :  { %v1525_v27 = vpop.xlane.xlu0 %1524 }
 0xc96   :  { %v1533_v29 = vmul.f32 0.0078125, %v1525_v27 }
 0xc97   :  { %v1527_v51 = vpop.xlane.xlu1 %1526 }
 0xc98   :  { %v5571_v35 = vsub.f32 %v1520_v58, %v1533_v29  ;;  %v1534_v4 = vmul.f32 0.0078125, %v1527_v51 }
 0xc99   :  { %v1529_v7 = vpop.xlane.xlu0 %1528 }
 0xc9a   :  { %v5573_v37 = vsub.f32 %v1521_v60, %v1534_v4  ;;  %v1535_v38 = vmul.f32 0.0078125, %v1529_v7  ;;  %v1541_v16 = vmul.f32 %v5571_v35, %v5571_v35 }
 0xc9c   :  { %v5577_v39 = vsub.f32 %v1522_v63, %v1535_v38  ;;  %1545 = vadd.xlane.f32.xlu0 %v1541_v16  ;;  %v1542_v14 = vmul.f32 %v5573_v37, %v5573_v37 }
 0xc9d   :  { %v1531_v40 = vpop.xlane.xlu0 %1530 }
 0xc9e   :  { %v1536_v41 = vmul.f32 0.0078125, %v1531_v40  ;;  %1547 = vadd.xlane.f32.xlu1 %v1542_v14  ;;  %v1543_v42 = vmul.f32 %v5577_v39, %v5577_v39 }
 0xca0   :  { %v5583_v44 = vsub.f32 %v1523_v1, %v1536_v41  ;;  %1549 = vadd.xlane.f32.xlu0 %v1543_v42 }
 0xca2   :  { %v1544_v47 = vmul.f32 %v5583_v44, %v5583_v44 }
 0xca4   :  { %1551 = vadd.xlane.f32.xlu1 %v1544_v47 }
 0xd29   :  { %v1546_v57 = vpop.xlane.xlu0 %1545 }
 0xd2a   :  { %v1553_v58 = vmul.f32 0.0078125, %v1546_v57 }
 0xd2b   :  { %v1548_v59 = vpop.xlane.xlu1 %1547 }
 0xd2c   :  { %v1557_v60 = vadd.f32 1e-05, %v1553_v58  ;;  %v1554_v61 = vmul.f32 0.0078125, %v1548_v59 }
 0xd2d   :  { %v1550_v62 = vpop.xlane.xlu0 %1549 }
 0xd2e   :  { %4931 = vrsqrt.f32 %v1557_v60  ;;  %v1558_v63 = vadd.f32 1e-05, %v1554_v61  ;;  %v1555_v0 = vmul.f32 0.0078125, %v1550_v62 }
 0xd30   :  { %4933 = vrsqrt.f32 %v1558_v63  ;;  %v1559_v1 = vadd.f32 1e-05, %v1555_v0 }
 0xd31   :  { %v1552_v3 = vpop.xlane.xlu1 %1551 }
 0xd32   :  { %4935 = vrsqrt.f32 %v1559_v1  ;;  %v1556_v5 = vmul.f32 0.0078125, %v1552_v3 }
 0xd34   :  { %v1560_v6 = vadd.f32 1e-05, %v1556_v5 }
 0xd36   :  { %4937 = vrsqrt.f32 %v1560_v6  ;;  %v4039_v6 = vld [vmem:[%s6240_s7] ss:$0 sm:$0xff] }
 0xd38   :  { %v4932_v8 = vpop.eup %4931 }
 0xd39   :  { %v1565_v10 = vmul.f32 %v4932_v8, %v5571_v35 }
 0xd3a   :  { %v4934_v11 = vpop.eup %4933 }
 0xd3b   :  { %v1566_v15 = vmul.f32 %v4934_v11, %v5573_v37  ;;  %v1576_v17 = vmul.f32 %v4037_v9, %v1565_v10  ;;  %v1732_v37 = vld [vmem:[%s6242_s9] sm:$0x3] }
 0xd3c   :  { %v4936_v18 = vpop.eup %4935  ;;  %v1737_v38 = vrot.slane %v1732_v37, %v5266_v34  ;;  %v1741_v16 = vrot.slane %v1732_v37, %v5272_v36 }
 0xd3d   :  { %v1567_v50 = vmul.f32 %v4936_v18, %v5577_v39  ;;  %v1577_v20 = vmul.f32 %v4037_v9, %v1566_v15  ;;  %v5640_v21 = vadd.f32 %v4038_v19, %v1576_v17  ;;  %v1858_v39 = vpop.f32.mrb[40].mxu1 }
 0xd3e   :  { %v1859_v14 = vadd.f32 %v1858_v39, %v1737_v38  ;;  %v1860_v40 = vpop.f32.mrb[41].mxu1 }
 0xd3f   :  { %v5642_v22 = vadd.f32 %v4038_v19, %v1577_v20  ;;  %v1578_v29 = vmul.f32 %v4037_v9, %v1567_v50  ;;  %v1861_v41 = vadd.f32 %v1860_v40, %v1741_v16  ;;  %v1862_v42 = vpop.f32.mrb[42].mxu1 }
 0xd40   :  { %v4938_v23 = vpop.eup %4937  ;;  %v1864_v47 = vpop.f32.mrb[43].mxu1 }
 0xd41   :  { %v1568_v25 = vmul.f32 %v4938_v23, %v5583_v44  ;;  %v1591_v27 = vpack.c.bf16 %v5642_v22, %v5640_v21  ;;  %v5647_v35 = vadd.f32 %v4038_v19, %v1578_v29  ;;  %v1863_v44 = vadd.f32 %v1862_v42, %v1737_v38  ;;  %v1868_v28 = vpop.f32.mrb[44].mxu1 }
 0xd42   :  { %v1865_v12 = vadd.f32 %v1864_v47, %v1741_v16  ;;  %v1869_v30 = vadd.f32 %v1868_v28, %v1737_v38  ;;  %v1870_v32 = vpop.f32.mrb[45].mxu1 }
 0xd43   :  { %4486 = vmatprep.mubr.bf16.mxu0 %v1591_v27  ;;  %v1579_v51 = vmul.f32 %v4037_v9, %v1568_v25  ;;  %v5660_v13 = vpack.c.bf16 %v1863_v44, %v1859_v14  ;;  %v1871_v53 = vadd.f32 %v1870_v32, %v1741_v16  ;;  %v1872_v26 = vpop.f32.mrb[46].mxu1 }
 0xd44   :  { %v5662_v48 = vpack.c.bf16 %v1865_v12, %v1861_v41  ;;  %v5667_v43 = vpack.c.bf16 %v1869_v30, %v1869_v30  ;;  %v1874_v24 = vpop.f32.mrb[47].mxu1  ;;  %v1873_v54 = vadd.f32 %v1872_v26, %v1737_v38 }
 0xd45   :  { %v5649_v4 = vadd.f32 %v4038_v19, %v1579_v51  ;;  %v1901_v52 = vsel %vm372_vm1, %v5660_v13, 0  ;;  %v1875_v45 = vadd.f32 %v1874_v24, %v1741_v16  ;;  %v1878_v55 = vpop.f32.mrb[48].mxu1  ;;  %v5693_v51 = vpack.c.bf16 %v1871_v53, %v1871_v53 }
 0xd46   :  { %4491 = vmatpush3.bf16.xpose.msra.mxu1 %v1901_v52  ;;  %v1904_v46 = vsel %vm372_vm1, %v5667_v43, 0  ;;  %v1879_v56 = vadd.f32 %v1878_v55, %v1737_v38  ;;  %v1880_v57 = vpop.f32.mrb[49].mxu1 }
 0xd47   :  { %v1592_v7 = vpack.c.bf16 %v5649_v4, %v5647_v35  ;;  %4492 = vmatprep.subr.bf16.mxu1 %v5048_v31  ;;  %v1881_v58 = vadd.f32 %v1880_v57, %v1741_v16  ;;  %v1882_v59 = vpop.f32.mrb[50].mxu1 }
 0xd48   :  { %v5672_v60 = vpack.c.bf16 %v1879_v56, %v1873_v54  ;;  %v1884_v61 = vpop.f32.mrb[51].mxu1  ;;  %v1883_v1 = vadd.f32 %v1882_v59, %v1737_v38 }
 0xd49   :  { %4487 = vmatmul.mubr.bf16.vlgmr.msra.gmra.mrb[40].mxu0 %v1592_v7  ;;  %v5674_v62 = vpack.c.bf16 %v1881_v58, %v1875_v45  ;;  %v5676_v63 = vadd.f32 %v1884_v61, %v1741_v16  ;;  %v2053_v7 = vsel %vm2051_vm5, %v5693_v51, 0 }
 0xd4a   :  { %4502 = vmatprep.mubr.msk.bf16.mxu0 %vm5049_vm0, %v5048_v31  ;;  %v1951_v0 = vsel %vm372_vm1, %v5672_v60, 0  ;;  %v5681_v3 = vpack.c.bf16 %v1883_v1, %v1883_v1 }
 0xd4b   :  { %4499 = vmatpush3.bf16.xpose.msra.mxu0 %v1951_v0 }
 0xd4c   :  { %4500 = vmatprep.subr.bf16.mxu0 %v5048_v31  ;;  %v1954_v5 = vsel %vm372_vm1, %v5681_v3, 0 }
 0xd4e   :  { %4493 = vmatpush3.bf16.xpose.msra.mxu1 %v1904_v46 }
 0xd4f   :  { %4522 = vmatprep.subr.bf16.mxu1 %v5048_v31 }
 0xd53   :  { %4501 = vmatpush3.bf16.xpose.msra.mxu0 %v1954_v5 }
 0xd54   :  { %4506 = vmatprep.subr.bf16.mxu0 %v5048_v31 }
 0xe1c   :  { %v4488_v8 = vpop.f32.mrb[40].mxu0 }
 0xe1d   :  { %v1707_v9 = vadd.f32 %v4488_v8, %v4039_v6  ;;  %v1698_v10 = vpop.f32.mrb[41].mxu0 }
 0xe1e   :  { %v1699_v11 = vadd.f32 %v4039_v6, %v1698_v10  ;;  %v4489_v15 = vpop.f32.mrb[42].mxu0 }
 0xe1f   :  { %v1710_v17 = vadd.f32 %v4489_v15, %v4039_v6  ;;  %v1701_v18 = vpop.f32.mrb[43].mxu0  ;;  %v1889_v50 = vmul.f32 0.17677669, %v1707_v9 }
 0xe20   :  { %v1702_v19 = vadd.f32 %v4039_v6, %v1701_v18  ;;  %v1887_v23 = vmul.f32 0.17677669, %v1699_v11 }
 0xe21   :  { %v1890_v20 = vmul.f32 0.17677669, %v1710_v17 }
 0xe22   :  { %v1888_v25 = vmul.f32 0.17677669, %v1702_v19 }
 0xe23   :  { %v5689_v27 = vpack.c.bf16 %v1890_v20, %v1889_v50 }
 0xe24   :  { %v5691_v29 = vpack.c.bf16 %v1888_v25, %v1887_v23 }
 0xe25   :  { %4503 = vmatmul.mubr.msk.bf16.vlgmr.msra.gmra.mrb[44].mxu0 %vm372_vm1, %v5689_v27 }
 0xe26   :  { %4507 = vmatpush3.bf16.msra.mxu0 %v5662_v48  ;;  %4495 = vmatmul.mubr.msk.bf16.vlgmr.msra.gmra.mrb[52].mxu1 %vm372_vm1, %v5691_v29 }
 0xe27   :  { %4508 = vmatprep.subr.bf16.mxu0 %v5048_v31  ;;  %4510 = vmatprep.mubr.msk.bf16.mxu0 %vm5049_vm0, %v5048_v31 }
 0xe28   :  { %4526 = vmatprep.mubr.msk.bf16.mxu1 %vm5049_vm0, %v5048_v31 }
 0xe2a   :  { %4509 = vmatpush3.bf16.msra.mxu0 %v2053_v7 }
 0xe2b   :  { %4514 = vmatprep.subr.bf16.mxu0 %v5048_v31 }
 0xef8   :  { %v1990_v37 = vpop.f32.mrb[44].mxu0 }
 0xef9   :  { %v1940_v38 = vpop.f32.mrb[52].mxu1  ;;  %v4504_v16 = vpop.f32.mrb[45].mxu0  ;;  %v2004_v12 = vsel %vm1997_vm6, %v1990_v37, -inf }
 0xefa   :  { %v4496_v39 = vpop.f32.mrb[53].mxu1  ;;  %v1993_v14 = vpop.f32.mrb[46].mxu0  ;;  %v1998_v40 = vsel %vm1997_vm6, %v1940_v38, -inf }
 0xefb   :  { %v4505_v41 = vpop.f32.mrb[47].mxu0  ;;  %1999 = vmax.xlane.f32.xlu0 %v1998_v40  ;;  %v1943_v42 = vpop.f32.mrb[54].mxu1  ;;  %v2007_v52 = vsel %vm1997_vm6, %v1993_v14, -inf  ;;  %v5734_v39 = vpack.c.bf16 %v5676_v63, %v5676_v63 }
 0xefc   :  { %v4497_v44 = vpop.f32.mrb[55].mxu1  ;;  %v2001_v47 = vsel %vm1997_vm6, %v1943_v42, -inf }
 0xefd   :  { %2002 = vmax.xlane.f32.xlu1 %v2001_v47  ;;  %v2100_v44 = vsel %vm2051_vm5, %v5734_v39, 0 }
 0xeff   :  { %2005 = vmax.xlane.f32.xlu0 %v2004_v12 }
 0xf01   :  { %2008 = vmax.xlane.f32.xlu1 %v2007_v52 }
 0xf88   :  { %v2000_v28 = vpop.xlane.xlu0 %1999 }
 0xf89   :  { %v2010_v30 = vsub.f32 %v1940_v38, %v2000_v28 }
 0xf8a   :  { %v2003_v32 = vpop.xlane.xlu1 %2002 }
 0xf8b   :  { %v2011_v26 = vsub.f32 %v1943_v42, %v2003_v32  ;;  %v2014_v45 = vmul.f32 1.442695, %v2010_v30 }
 0xf8c   :  { %v2006_v53 = vpop.xlane.xlu0 %2005 }
 0xf8d   :  { %v2012_v24 = vsub.f32 %v1990_v37, %v2006_v53  ;;  %v2016_v56 = vmul.f32 1.442695, %v2011_v26 }
 0xf8e   :  { %v2009_v46 = vpop.xlane.xlu1 %2008 }
 0xf8f   :  { %v2018_v54 = vmul.f32 1.442695, %v2012_v24  ;;  %v2013_v55 = vsub.f32 %v1993_v14, %v2009_v46 }
 0xf91   :  { %4939 = vpow2.f32 %v2018_v54  ;;  %v2020_v57 = vmul.f32 1.442695, %v2013_v55 }
 0xf92   :  { %4941 = vpow2.f32 %v2014_v45 }
 0xf93   :  { %4943 = vpow2.f32 %v2020_v57 }
 0xf94   :  { %4945 = vpow2.f32 %v2016_v56 }
 0xf9b   :  { %v4940_v58 = vpop.eup %4939 }
 0xf9c   :  { %v4942_v59 = vpop.eup %4941  ;;  %v2028_v61 = vsel %vm1997_vm6, %v4940_v58, 0.0 }
 0xf9d   :  { %v4944_v0 = vpop.eup %4943  ;;  %2029 = vadd.xlane.f32.xlu0 %v2028_v61  ;;  %v2022_v6 = vsel %vm1997_vm6, %v4942_v59, 0.0 }
 0xf9e   :  { %v2031_v1 = vsel %vm1997_vm6, %v4944_v0, 0.0  ;;  %v4946_v5 = vpop.eup %4945 }
 0xf9f   :  { %2032 = vadd.xlane.f32.xlu1 %v2031_v1  ;;  %v2025_v8 = vsel %vm1997_vm6, %v4946_v5, 0.0 }
 0xfa1   :  { %2023 = vadd.xlane.f32.xlu0 %v2022_v6 }
 0xfa3   :  { %2026 = vadd.xlane.f32.xlu1 %v2025_v8 }
 0xfb4   :  { %2150 = vrot.lane.b32.xlu1 %v5667_v43, %s5050_s1 }
 0xfb7   :  { %2148 = vrot.lane.b32.xlu0 %v5660_v13, %s5050_s1 }
 0xfb8   :  { %2207 = vrot.lane.b32.xlu1 %v5672_v60, %s5050_s1 }
 0xfbb   :  { %2209 = vrot.lane.b32.xlu0 %v5681_v3, %s5050_s1 }
 0xfbc   :  { %2144 = vrot.lane.b32.xlu1 %v5691_v29, %s5050_s1 }
 0xfc0   :  { %2203 = vrot.lane.b32.xlu1 %v5689_v27, %s5050_s1 }
0x102a   :  { %v2030_v9 = vpop.xlane.xlu0 %2029 }
0x102c   :  { %v2033_v10 = vpop.xlane.xlu1 %2032 }
0x102e   :  { %v2024_v11 = vpop.xlane.xlu0 %2023 }
0x102f   :  { %4947 = vrcp.f32 %v2024_v11 }
0x1030   :  { %v2027_v15 = vpop.xlane.xlu1 %2026 }
0x1031   :  { %4949 = vrcp.f32 %v2027_v15 }
0x1032   :  { %v2149_v17 = vpop.permute.xlu0 %2148  ;;  %4951 = vrcp.f32 %v2033_v10 }
0x1033   :  { %v2156_v18 = vsel %vm372_vm1, %v2149_v17, 0  ;;  %4953 = vrcp.f32 %v2030_v9 }
0x1034   :  { %4523 = vmatpush3.bf16.xpose.msra.mxu1 %v2156_v18  ;;  %v2151_v19 = vpop.permute.xlu1 %2150 }
0x1035   :  { %4524 = vmatprep.subr.bf16.mxu1 %v5048_v31  ;;  %v2159_v23 = vsel %vm372_vm1, %v2151_v19, 0 }
0x1036   :  { %v2210_v12 = vpop.permute.xlu0 %2209 }
0x1037   :  { %v2218_v52 = vsel %vm372_vm1, %v2210_v12, 0 }
0x1038   :  { %v2208_v37 = vpop.permute.xlu1 %2207 }
0x1039   :  { %v4948_v50 = vpop.eup %4947  ;;  %v2215_v47 = vsel %vm372_vm1, %v2208_v37, 0 }
0x103a   :  { %v2038_v25 = vmul.f32 %v4948_v50, %v4942_v59 }
0x103b   :  { %v4950_v20 = vpop.eup %4949 }
0x103c   :  { %v2039_v7 = vmul.f32 %v4950_v20, %v4946_v5  ;;  %4525 = vmatpush3.bf16.xpose.msra.mxu1 %v2159_v23  ;;  %v4952_v16 = vpop.eup %4951  ;;  %v2145_v41 = vpop.permute.xlu1 %2144 }
0x103d   :  { %4538 = vmatprep.subr.bf16.mxu1 %v5048_v31  ;;  %v4954_v14 = vpop.eup %4953  ;;  %v2041_v40 = vmul.f32 %v4952_v16, %v4944_v0 }
0x103e   :  { %v2042_v38 = vpack.c.bf16 %v2039_v7, %v2038_v25  ;;  %v2040_v42 = vmul.f32 %v4954_v14, %v4940_v58 }
0x1040   :  { %4511 = vmatmul.mubr.msk.bf16.vlgmr.msra.gmra.mrb[48].mxu0 %vm1997_vm6, %v2042_v38  ;;  %v2043_v63 = vpack.c.bf16 %v2041_v40, %v2040_v42  ;;  %v2204_v28 = vpop.permute.xlu1 %2203 }
0x1041   :  { %4515 = vmatpush3.bf16.msra.mxu0 %v5674_v62  ;;  %4518 = vmatprep.mubr.msk.bf16.mxu0 %vm5049_vm0, %v5048_v31 }
0x1042   :  { %4516 = vmatprep.subr.bf16.mxu0 %v5048_v31 }
0x1043   :  { %4527 = vmatmul.mubr.msk.bf16.vlgmr.msra.gmra.mrb[56].mxu1 %vm372_vm1, %v2145_v41 }
0x1044   :  { %4542 = vmatprep.mubr.msk.bf16.mxu1 %vm5049_vm0, %v5048_v31 }
0x1045   :  { %4517 = vmatpush3.bf16.msra.mxu0 %v2100_v44 }
0x1046   :  { %4530 = vmatprep.subr.bf16.mxu0 %v5048_v31 }
0x1048   :  { %4519 = vmatmul.mubr.msk.bf16.vlgmr.msra.gmra.mrb[52].mxu0 %vm1997_vm6, %v2043_v63 }
0x1049   :  { %4534 = vmatprep.mubr.msk.bf16.mxu0 %vm5049_vm0, %v5048_v31 }
0x104e   :  { %4531 = vmatpush3.bf16.xpose.msra.mxu0 %v2215_v47 }
0x104f   :  { %4532 = vmatprep.subr.bf16.mxu0 %v5048_v31 }
0x1056   :  { %4533 = vmatpush3.bf16.xpose.msra.mxu0 %v2218_v52 }
0x1057   :  { %4554 = vmatprep.subr.bf16.mxu0 %v5048_v31 }
0x105d   :  { %4535 = vmatmul.mubr.msk.bf16.vlgmr.msra.gmra.mrb[56].mxu0 %vm372_vm1, %v2204_v28 }
0x105e   :  { %4558 = vmatprep.mubr.msk.bf16.mxu0 %vm5049_vm0, %v5048_v31 }
0x1113   :  { %v5757_v30 = vpop.f32.mrb[48].mxu0 }
0x1114   :  { %v4512_v32 = vpop.f32.mrb[49].mxu0 }
0x1115   :  { %v5759_v53 = vpop.f32.mrb[50].mxu0 }
0x1116   :  { %v4513_v26 = vpop.f32.mrb[51].mxu0  ;;  %v2195_v24 = vpop.f32.mrb[56].mxu1 }
0x1117   :  { %v4528_v45 = vpop.f32.mrb[57].mxu1  ;;  %v2261_v46 = vsel %vm1997_vm6, %v2195_v24, -inf }
0x1118   :  { %2262 = vmax.xlane.f32.xlu0 %v2261_v46  ;;  %v2198_v54 = vpop.f32.mrb[58].mxu1 }
0x1119   :  { %v4529_v55 = vpop.f32.mrb[59].mxu1  ;;  %v2264_v56 = vsel %vm1997_vm6, %v2198_v54, -inf }
0x111a   :  { %2265 = vmax.xlane.f32.xlu1 %v2264_v56 }
0x111b   :  { %v5763_v57 = vpop.f32.mrb[52].mxu0 }
0x111c   :  { %v4520_v58 = vpop.f32.mrb[53].mxu0 }
0x111d   :  { %v5765_v59 = vpop.f32.mrb[54].mxu0 }
0x111e   :  { %v4521_v61 = vpop.f32.mrb[55].mxu0 }
0x1130   :  { %v2254_v0 = vpop.f32.mrb[56].mxu0 }
0x1131   :  { %v4536_v1 = vpop.f32.mrb[57].mxu0  ;;  %v2267_v5 = vsel %vm1997_vm6, %v2254_v0, -inf }
0x1132   :  { %v2257_v6 = vpop.f32.mrb[58].mxu0  ;;  %2268 = vmax.xlane.f32.xlu0 %v2267_v5 }
0x1133   :  { %v4537_v8 = vpop.f32.mrb[59].mxu0  ;;  %v2270_v9 = vsel %vm1997_vm6, %v2257_v6, -inf }
0x1136   :  { %2271 = vmax.xlane.f32.xlu0 %v2270_v9 }
0x11a5   :  { %v2263_v10 = vpop.xlane.xlu0 %2262 }
0x11a6   :  { %v2273_v11 = vsub.f32 %v2195_v24, %v2263_v10 }
0x11a7   :  { %v2266_v15 = vpop.xlane.xlu1 %2265 }
0x11a8   :  { %v2277_v17 = vmul.f32 1.442695, %v2273_v11  ;;  %v2274_v18 = vsub.f32 %v2198_v54, %v2266_v15 }
0x11aa   :  { %4955 = vpow2.f32 %v2277_v17  ;;  %v2279_v19 = vmul.f32 1.442695, %v2274_v18 }
0x11ac   :  { %4957 = vpow2.f32 %v2279_v19 }
0x11b4   :  { %v4956_v50 = vpop.eup %4955 }
0x11b5   :  { %v2285_v20 = vsel %vm1997_vm6, %v4956_v50, 0.0 }
0x11b6   :  { %v4958_v23 = vpop.eup %4957  ;;  %2286 = vadd.xlane.f32.xlu0 %v2285_v20 }
0x11b7   :  { %v2288_v25 = vsel %vm1997_vm6, %v4958_v23, 0.0 }
0x11b8   :  { %2289 = vadd.xlane.f32.xlu1 %v2288_v25 }
0x11bf   :  { %v2269_v7 = vpop.xlane.xlu0 %2268 }
0x11c0   :  { %v2275_v37 = vsub.f32 %v2254_v0, %v2269_v7 }
0x11c2   :  { %v2281_v38 = vmul.f32 1.442695, %v2275_v37 }
0x11c3   :  { %v2272_v16 = vpop.xlane.xlu0 %2271 }
0x11c4   :  { %4959 = vpow2.f32 %v2281_v38  ;;  %v2276_v14 = vsub.f32 %v2257_v6, %v2272_v16 }
0x11c6   :  { %v2283_v41 = vmul.f32 1.442695, %v2276_v14 }
0x11c8   :  { %4961 = vpow2.f32 %v2283_v41 }
0x11c9   :  { %2311 = vrot.lane.b32.xlu1 %v5693_v51, %s5050_s1 }
0x11cc   :  { %2309 = vrot.lane.b32.xlu0 %v5662_v48, %s5050_s1 }
0x11cd   :  { %2363 = vrot.lane.b32.xlu1 %v5674_v62, %s5050_s1 }
0x11ce   :  { %v4960_v40 = vpop.eup %4959 }
0x11cf   :  { %v2291_v42 = vsel %vm1997_vm6, %v4960_v40, 0.0 }
0x11d1   :  { %2365 = vrot.lane.b32.xlu1 %v5734_v39, %s5050_s1 }
0x11d2   :  { %v4962_v44 = vpop.eup %4961 }
0x11d3   :  { %v2294_v63 = vsel %vm1997_vm6, %v4962_v44, 0.0 }
0x11d5   :  { %2473 = vrot.lane.b32.xlu1 %v5672_v60, %s5051_s5 }
0x11eb   :  { %2292 = vadd.xlane.f32.xlu0 %v2291_v42 }
0x11f9   :  { %2295 = vadd.xlane.f32.xlu1 %v2294_v63 }
0x1201   :  { %2417 = vrot.lane.b32.xlu0 %v5660_v13, %s5051_s5 }
0x1205   :  { %2419 = vrot.lane.b32.xlu0 %v5667_v43, %s5051_s5 }
0x1209   :  { %2415 = vrot.lane.b32.xlu0 %v5691_v29, %s5051_s5 }
0x120a   :  { %2475 = vrot.lane.b32.xlu1 %v5681_v3, %s5051_s5 }
0x120e   :  { %2471 = vrot.lane.b32.xlu1 %v5689_v27, %s5051_s5 }
0x1243   :  { %v2287_v47 = vpop.xlane.xlu0 %2286 }
0x1244   :  { %4963 = vrcp.f32 %v2287_v47 }
0x1245   :  { %v2290_v12 = vpop.xlane.xlu1 %2289 }
0x1246   :  { %4965 = vrcp.f32 %v2290_v12 }
0x1247   :  { %v2310_v52 = vpop.permute.xlu0 %2309 }
0x1248   :  { %4539 = vmatpush3.bf16.msra.mxu1 %v2310_v52 }
0x1249   :  { %v2312_v28 = vpop.permute.xlu1 %2311  ;;  %4540 = vmatprep.subr.bf16.mxu1 %v5048_v31 }
0x124a   :  { %v2318_v32 = vsel %vm2051_vm5, %v2312_v28, 0 }
0x124c   :  { %4541 = vmatpush3.bf16.msra.mxu1 %v2318_v32 }
0x124d   :  { %4546 = vmatprep.subr.bf16.mxu1 %v5048_v31  ;;  %v2364_v45 = vpop.permute.xlu1 %2363 }
0x124e   :  { %v4964_v26 = vpop.eup %4963 }
0x124f   :  { %v2301_v46 = vmul.f32 %v4964_v26, %v4956_v50 }
0x1250   :  { %v4966_v24 = vpop.eup %4965 }
0x1251   :  { %v2302_v54 = vmul.f32 %v4966_v24, %v4958_v23  ;;  %v2366_v56 = vpop.permute.xlu1 %2365 }
0x1252   :  { %v2372_v58 = vsel %vm2051_vm5, %v2366_v56, 0 }
0x1253   :  { %v2305_v55 = vpack.c.bf16 %v2302_v54, %v2301_v46 }
0x1255   :  { %4543 = vmatmul.mubr.msk.bf16.vlgmr.msra.gmra.mrb[60].mxu1 %vm1997_vm6, %v2305_v55  ;;  %v2474_v5 = vpop.permute.xlu1 %2473 }
0x1256   :  { %4547 = vmatpush3.bf16.msra.mxu1 %v2364_v45  ;;  %4550 = vmatprep.mubr.msk.bf16.mxu1 %vm5049_vm0, %v5048_v31  ;;  %v2481_v50 = vsel %vm372_vm1, %v2474_v5, 0 }
0x1257   :  { %4548 = vmatprep.subr.bf16.mxu1 %v5048_v31 }
0x125a   :  { %4549 = vmatpush3.bf16.msra.mxu1 %v2372_v58 }
0x125b   :  { %4562 = vmatprep.subr.bf16.mxu1 %v5048_v31 }
0x1278   :  { %v2293_v61 = vpop.xlane.xlu0 %2292 }
0x1279   :  { %4967 = vrcp.f32 %v2293_v61 }
0x127c   :  { %v2418_v0 = vpop.permute.xlu0 %2417 }
0x127d   :  { %v2425_v1 = vsel %vm372_vm1, %v2418_v0, 0 }
0x127e   :  { %4555 = vmatpush3.bf16.xpose.msra.mxu0 %v2425_v1 }
0x127f   :  { %4556 = vmatprep.subr.bf16.mxu0 %v5048_v31 }
0x1280   :  { %v2420_v6 = vpop.permute.xlu0 %2419 }
0x1281   :  { %v2428_v8 = vsel %vm372_vm1, %v2420_v6, 0 }
0x1283   :  { %v4968_v11 = vpop.eup %4967 }
0x1284   :  { %v2416_v10 = vpop.permute.xlu0 %2415  ;;  %v2303_v17 = vmul.f32 %v4968_v11, %v4960_v40 }
0x1286   :  { %4557 = vmatpush3.bf16.xpose.msra.mxu0 %v2428_v8  ;;  %v2296_v9 = vpop.xlane.xlu1 %2295 }
0x1287   :  { %4969 = vrcp.f32 %v2296_v9  ;;  %4570 = vmatprep.subr.bf16.mxu0 %v5048_v31 }
0x128a   :  { %v2476_v20 = vpop.permute.xlu1 %2475 }
0x128b   :  { %v2484_v23 = vsel %vm372_vm1, %v2476_v20, 0 }
0x128d   :  { %4559 = vmatmul.mubr.msk.bf16.vlgmr.msra.gmra.mrb[60].mxu0 %vm372_vm1, %v2416_v10 }
0x128e   :  { %4574 = vmatprep.mubr.msk.bf16.mxu0 %vm5049_vm0, %v5048_v31  ;;  %v2472_v25 = vpop.permute.xlu1 %2471 }
0x1291   :  { %v4970_v15 = vpop.eup %4969 }
0x1292   :  { %v2304_v18 = vmul.f32 %v4970_v15, %v4962_v44 }
0x1294   :  { %v2306_v19 = vpack.c.bf16 %v2304_v18, %v2303_v17 }
0x1296   :  { %4551 = vmatmul.mubr.msk.bf16.vlgmr.msra.gmra.mrb[64].mxu1 %vm1997_vm6, %v2306_v19 }
0x1297   :  { %4563 = vmatpush3.bf16.xpose.msra.mxu1 %v2481_v50  ;;  %4566 = vmatprep.mubr.msk.bf16.mxu1 %vm5049_vm0, %v5048_v31 }
0x1298   :  { %4564 = vmatprep.subr.bf16.mxu1 %v5048_v31 }
0x129f   :  { %4565 = vmatpush3.bf16.xpose.msra.mxu1 %v2484_v23 }
0x12a0   :  { %4578 = vmatprep.subr.bf16.mxu1 %v5048_v31 }
0x12a6   :  { %4567 = vmatmul.mubr.msk.bf16.vlgmr.msra.gmra.mrb[68].mxu1 %vm372_vm1, %v2472_v25 }
0x12a7   :  { %4582 = vmatprep.mubr.msk.bf16.mxu1 %vm5049_vm0, %v5048_v31 }
0x1328   :  { %v5819_v7 = vpop.f32.mrb[60].mxu1 }
0x1329   :  { %v4544_v37 = vpop.f32.mrb[61].mxu1 }
0x132a   :  { %v5821_v38 = vpop.f32.mrb[62].mxu1 }
0x132b   :  { %v4677_v16 = vpack.i.bf16 %v5821_v38, %v5819_v7  ;;  %v4545_v14 = vpop.f32.mrb[63].mxu1 }
0x1360   :  { %v2464_v40 = vpop.f32.mrb[60].mxu0 }
0x1361   :  { %v4560_v41 = vpop.f32.mrb[61].mxu0  ;;  %v2527_v42 = vsel %vm1997_vm6, %v2464_v40, -inf }
0x1362   :  { %2528 = vmax.xlane.f32.xlu0 %v2527_v42  ;;  %v2467_v44 = vpop.f32.mrb[62].mxu0 }
0x1363   :  { %v4561_v63 = vpop.f32.mrb[63].mxu0  ;;  %v2530_v47 = vsel %vm1997_vm6, %v2467_v44, -inf }
0x1364   :  { %2531 = vmax.xlane.f32.xlu1 %v2530_v47 }
0x1369   :  { %v5827_v12 = vpop.f32.mrb[64].mxu1 }
0x136a   :  { %v4552_v52 = vpop.f32.mrb[65].mxu1 }
0x136b   :  { %v5829_v28 = vpop.f32.mrb[66].mxu1 }
0x136c   :  { %v4682_v32 = vpack.i.bf16 %v5829_v28, %v5827_v12  ;;  %v4553_v26 = vpop.f32.mrb[67].mxu1 }
0x1379   :  { %v2520_v24 = vpop.f32.mrb[68].mxu1 }
0x137a   :  { %v4568_v45 = vpop.f32.mrb[69].mxu1  ;;  %v2533_v46 = vsel %vm1997_vm6, %v2520_v24, -inf }
0x137b   :  { %2534 = vmax.xlane.f32.xlu0 %v2533_v46  ;;  %v2523_v54 = vpop.f32.mrb[70].mxu1 }
0x137c   :  { %v4569_v55 = vpop.f32.mrb[71].mxu1  ;;  %v2536_v56 = vsel %vm1997_vm6, %v2523_v54, -inf }
0x137f   :  { %2537 = vmax.xlane.f32.xlu0 %v2536_v56 }
0x13ef   :  { %v2529_v58 = vpop.xlane.xlu0 %2528 }
0x13f0   :  { %v2539_v61 = vsub.f32 %v2464_v40, %v2529_v58 }
0x13f1   :  { %v2532_v0 = vpop.xlane.xlu1 %2531 }
0x13f2   :  { %v2543_v1 = vmul.f32 1.442695, %v2539_v61  ;;  %v2540_v5 = vsub.f32 %v2467_v44, %v2532_v0 }
0x13f4   :  { %4971 = vpow2.f32 %v2543_v1  ;;  %v2545_v6 = vmul.f32 1.442695, %v2540_v5 }
0x13f6   :  { %4973 = vpow2.f32 %v2545_v6 }
0x13fe   :  { %v4972_v8 = vpop.eup %4971 }
0x13ff   :  { %v2551_v9 = vsel %vm1997_vm6, %v4972_v8, 0.0 }
0x1400   :  { %v4974_v10 = vpop.eup %4973  ;;  %2552 = vadd.xlane.f32.xlu0 %v2551_v9 }
0x1401   :  { %v2554_v11 = vsel %vm1997_vm6, %v4974_v10, 0.0 }
0x1402   :  { %2555 = vadd.xlane.f32.xlu1 %v2554_v11 }
0x1408   :  { %v2535_v15 = vpop.xlane.xlu0 %2534 }
0x1409   :  { %v2541_v17 = vsub.f32 %v2520_v24, %v2535_v15 }
0x140b   :  { %v2547_v18 = vmul.f32 1.442695, %v2541_v17 }
0x140c   :  { %v2538_v19 = vpop.xlane.xlu0 %2537 }
0x140d   :  { %4975 = vpow2.f32 %v2547_v18  ;;  %v2542_v50 = vsub.f32 %v2523_v54, %v2538_v19 }
0x140f   :  { %v2549_v23 = vmul.f32 1.442695, %v2542_v50 }
0x1411   :  { %4977 = vpow2.f32 %v2549_v23 }
0x1413   :  { %2625 = vrot.lane.b32.xlu1 %v5674_v62, %s5051_s5 }
0x1416   :  { %2573 = vrot.lane.b32.xlu0 %v5662_v48, %s5051_s5 }
0x1417   :  { %2575 = vrot.lane.b32.xlu1 %v5693_v51, %s5051_s5  ;;  %v4976_v20 = vpop.eup %4975 }
0x1418   :  { %v2557_v25 = vsel %vm1997_vm6, %v4976_v20, 0.0 }
0x141b   :  { %2627 = vrot.lane.b32.xlu1 %v5734_v39, %s5051_s5  ;;  %v4978_v37 = vpop.eup %4977 }
0x141c   :  { %v2560_v14 = vsel %vm1997_vm6, %v4978_v37, 0.0 }
0x141f   :  { %2735 = vrot.lane.b32.xlu1 %v5672_v60, %s5052_s24 }
0x1435   :  { %2558 = vadd.xlane.f32.xlu0 %v2557_v25 }
0x1443   :  { %2561 = vadd.xlane.f32.xlu1 %v2560_v14 }
0x144b   :  { %2679 = vrot.lane.b32.xlu0 %v5660_v13, %s5052_s24 }
0x144f   :  { %2681 = vrot.lane.b32.xlu0 %v5667_v43, %s5052_s24 }
0x1453   :  { %2677 = vrot.lane.b32.xlu0 %v5691_v29, %s5052_s24 }
0x1454   :  { %2737 = vrot.lane.b32.xlu1 %v5681_v3, %s5052_s24 }
0x1458   :  { %2733 = vrot.lane.b32.xlu1 %v5689_v27, %s5052_s24 }
0x148d   :  { %v2553_v60 = vpop.xlane.xlu0 %2552 }
0x148e   :  { %4979 = vrcp.f32 %v2553_v60 }
0x148f   :  { %v2556_v40 = vpop.xlane.xlu1 %2555 }
0x1490   :  { %4981 = vrcp.f32 %v2556_v40 }
0x1491   :  { %v2574_v41 = vpop.permute.xlu0 %2573 }
0x1492   :  { %4571 = vmatpush3.bf16.msra.mxu0 %v2574_v41 }
0x1493   :  { %v2626_v42 = vpop.permute.xlu1 %2625  ;;  %4572 = vmatprep.subr.bf16.mxu0 %v5048_v31 }
0x1494   :  { %4579 = vmatpush3.bf16.msra.mxu1 %v2626_v42 }
0x1495   :  { %4580 = vmatprep.subr.bf16.mxu1 %v5048_v31 }
0x1497   :  { %v2576_v13 = vpop.permute.xlu1 %2575 }
0x1498   :  { %v4980_v43 = vpop.eup %4979  ;;  %v2582_v29 = vsel %vm2051_vm5, %v2576_v13, 0 }
0x1499   :  { %4573 = vmatpush3.bf16.msra.mxu0 %v2582_v29  ;;  %v2567_v27 = vmul.f32 %v4980_v43, %v4972_v8 }
0x149a   :  { %v4982_v3 = vpop.eup %4981  ;;  %4586 = vmatprep.subr.bf16.mxu0 %v5048_v31 }
0x149b   :  { %v2568_v44 = vmul.f32 %v4982_v3, %v4974_v10  ;;  %v2628_v63 = vpop.permute.xlu1 %2627 }
0x149c   :  { %v2634_v47 = vsel %vm2051_vm5, %v2628_v63, 0 }
0x149d   :  { %4581 = vmatpush3.bf16.msra.mxu1 %v2634_v47  ;;  %v2571_v52 = vpack.c.bf16 %v2568_v44, %v2567_v27 }
0x149e   :  { %4594 = vmatprep.subr.bf16.mxu1 %v5048_v31 }
0x149f   :  { %4575 = vmatmul.mubr.msk.bf16.vlgmr.msra.gmra.mrb[64].mxu0 %vm1997_vm6, %v2571_v52  ;;  %v2736_v46 = vpop.permute.xlu1 %2735 }
0x14a0   :  { %4590 = vmatprep.mubr.msk.bf16.mxu0 %vm5049_vm0, %v5048_v31  ;;  %v2743_v8 = vsel %vm372_vm1, %v2736_v46, 0 }
0x14c2   :  { %v2559_v26 = vpop.xlane.xlu0 %2558 }
0x14c3   :  { %4983 = vrcp.f32 %v2559_v26 }
0x14c6   :  { %v2680_v24 = vpop.permute.xlu0 %2679 }
0x14c7   :  { %v2687_v45 = vsel %vm372_vm1, %v2680_v24, 0 }
0x14c8   :  { %4587 = vmatpush3.bf16.xpose.msra.mxu0 %v2687_v45 }
0x14c9   :  { %4588 = vmatprep.subr.bf16.mxu0 %v5048_v31 }
0x14ca   :  { %v2682_v54 = vpop.permute.xlu0 %2681 }
0x14cb   :  { %v2690_v55 = vsel %vm372_vm1, %v2682_v54, 0 }
0x14cd   :  { %v4984_v61 = vpop.eup %4983 }
0x14ce   :  { %v2678_v58 = vpop.permute.xlu0 %2677  ;;  %v2569_v1 = vmul.f32 %v4984_v61, %v4976_v20 }
0x14d0   :  { %v2562_v56 = vpop.xlane.xlu1 %2561  ;;  %4589 = vmatpush3.bf16.xpose.msra.mxu0 %v2690_v55 }
0x14d1   :  { %4985 = vrcp.f32 %v2562_v56  ;;  %4602 = vmatprep.subr.bf16.mxu0 %v5048_v31 }
0x14d4   :  { %v2738_v9 = vpop.permute.xlu1 %2737 }
0x14d5   :  { %v2746_v10 = vsel %vm372_vm1, %v2738_v9, 0 }
0x14d7   :  { %4591 = vmatmul.mubr.msk.bf16.vlgmr.msra.gmra.mrb[68].mxu0 %vm372_vm1, %v2678_v58 }
0x14d8   :  { %4606 = vmatprep.mubr.msk.bf16.mxu0 %vm5049_vm0, %v5048_v31  ;;  %v2734_v11 = vpop.permute.xlu1 %2733 }
0x14db   :  { %v4986_v0 = vpop.eup %4985 }
0x14dc   :  { %v2570_v5 = vmul.f32 %v4986_v0, %v4978_v37 }
0x14de   :  { %v2572_v6 = vpack.c.bf16 %v2570_v5, %v2569_v1 }
0x14e0   :  { %4583 = vmatmul.mubr.msk.bf16.vlgmr.msra.gmra.mrb[72].mxu1 %vm1997_vm6, %v2572_v6 }
0x14e1   :  { %4595 = vmatpush3.bf16.xpose.msra.mxu1 %v2743_v8  ;;  %4598 = vmatprep.mubr.msk.bf16.mxu1 %vm5049_vm0, %v5048_v31 }
0x14e2   :  { %4596 = vmatprep.subr.bf16.mxu1 %v5048_v31 }
0x14e9   :  { %4597 = vmatpush3.bf16.xpose.msra.mxu1 %v2746_v10 }
0x14ea   :  { %4610 = vmatprep.subr.bf16.mxu1 %v5048_v31 }
0x14f0   :  { %4599 = vmatmul.mubr.msk.bf16.vlgmr.msra.gmra.mrb[76].mxu1 %vm372_vm1, %v2734_v11 }
0x14f1   :  { %4614 = vmatprep.mubr.msk.bf16.mxu1 %vm5049_vm0, %v5048_v31 }
0x1572   :  { %v2618_v15 = vpop.f32.mrb[64].mxu0 }
0x1573   :  { %v4576_v17 = vpop.f32.mrb[65].mxu0 }
0x1574   :  { %v2621_v18 = vpop.f32.mrb[66].mxu0 }
0x1575   :  { %v4687_v19 = vpack.i.bf16 %v2621_v18, %v2618_v15  ;;  %v4577_v50 = vpop.f32.mrb[67].mxu0 }
0x15aa   :  { %v2726_v20 = vpop.f32.mrb[68].mxu0 }
0x15ab   :  { %v4592_v23 = vpop.f32.mrb[69].mxu0  ;;  %v2789_v25 = vsel %vm1997_vm6, %v2726_v20, -inf }
0x15ac   :  { %2790 = vmax.xlane.f32.xlu0 %v2789_v25  ;;  %v2729_v37 = vpop.f32.mrb[70].mxu0 }
0x15ad   :  { %v4593_v14 = vpop.f32.mrb[71].mxu0  ;;  %v2792_v60 = vsel %vm1997_vm6, %v2729_v37, -inf }
0x15ae   :  { %2793 = vmax.xlane.f32.xlu1 %v2792_v60 }
0x15b3   :  { %v2670_v40 = vpop.f32.mrb[72].mxu1 }
0x15b4   :  { %v4584_v41 = vpop.f32.mrb[73].mxu1 }
0x15b5   :  { %v2673_v42 = vpop.f32.mrb[74].mxu1  ;;  %v4780_v41 = vld [vmem:[%s6243_s10 + $0x8] sm:$0xff]  }
0x15b6   :  { %v4692_v13 = vpack.i.bf16 %v2673_v42, %v2670_v40  ;;  %v4585_v43 = vpop.f32.mrb[75].mxu1 }
0x15b7   :  { %v4781_v43 = vld [vmem:[%s6243_s10 + $0x10] sm:$0xff]  }
0x15c3   :  { %v2782_v29 = vpop.f32.mrb[76].mxu1 }
0x15c4   :  { %v4600_v3 = vpop.f32.mrb[77].mxu1  ;;  %v2795_v27 = vsel %vm1997_vm6, %v2782_v29, -inf }
0x15c5   :  { %2796 = vmax.xlane.f32.xlu0 %v2795_v27  ;;  %v2785_v44 = vpop.f32.mrb[78].mxu1 }
0x15c6   :  { %v4601_v63 = vpop.f32.mrb[79].mxu1  ;;  %v2798_v47 = vsel %vm1997_vm6, %v2785_v44, -inf }
0x15c7   :  { %v4783_v63 = vld [vmem:[%s6243_s10 + $0x20] sm:$0xff]  }
0x15c9   :  { %2799 = vmax.xlane.f32.xlu0 %v2798_v47  ;;  %v4784_v47 = vld [vmem:[%s6243_s10 + $0x28] sm:$0xff]  }
0x1639   :  { %v2791_v52 = vpop.xlane.xlu0 %2790 }
0x163a   :  { %v2801_v26 = vsub.f32 %v2726_v20, %v2791_v52  ;;  %v4785_v52 = vld [vmem:[%s6243_s10 + $0x30] sm:$0xff]  }
0x163b   :  { %v2794_v24 = vpop.xlane.xlu1 %2793 }
0x163c   :  { %v2805_v45 = vmul.f32 1.442695, %v2801_v26  ;;  %v2802_v46 = vsub.f32 %v2729_v37, %v2794_v24  ;;  %v4786_v26 = vld [vmem:[%s6243_s10 + $0x38] sm:$0xff]  }
0x163e   :  { %4987 = vpow2.f32 %v2805_v45  ;;  %v2807_v54 = vmul.f32 1.442695, %v2802_v46 }
0x1640   :  { %4989 = vpow2.f32 %v2807_v54 }
0x1648   :  { %v4988_v55 = vpop.eup %4987 }
0x1649   :  { %v2813_v56 = vsel %vm1997_vm6, %v4988_v55, 0.0 }
0x164a   :  { %v4990_v58 = vpop.eup %4989  ;;  %2814 = vadd.xlane.f32.xlu0 %v2813_v56 }
0x164b   :  { %v2816_v61 = vsel %vm1997_vm6, %v4990_v58, 0.0 }
0x164c   :  { %2817 = vadd.xlane.f32.xlu1 %v2816_v61 }
0x1652   :  { %v2797_v0 = vpop.xlane.xlu0 %2796 }
0x1653   :  { %v2803_v1 = vsub.f32 %v2782_v29, %v2797_v0 }
0x1655   :  { %v2809_v5 = vmul.f32 1.442695, %v2803_v1 }
0x1656   :  { %v2800_v9 = vpop.xlane.xlu0 %2799 }
0x1657   :  { %4991 = vpow2.f32 %v2809_v5  ;;  %v2804_v10 = vsub.f32 %v2785_v44, %v2800_v9  ;;  %v4782_v44 = vld [vmem:[%s6243_s10 + $0x18] sm:$0xff]  }
0x1659   :  { %v2811_v11 = vmul.f32 1.442695, %v2804_v10 }
0x165b   :  { %4993 = vpow2.f32 %v2811_v11 }
0x165d   :  { %2887 = vrot.lane.b32.xlu1 %v5674_v62, %s5052_s24 }
0x1661   :  { %v4992_v6 = vpop.eup %4991  ;;  %2837 = vrot.lane.b32.xlu1 %v5693_v51, %s5052_s24 }
0x1662   :  { %v2819_v8 = vsel %vm1997_vm6, %v4992_v6, 0.0 }
0x1663   :  { %2820 = vadd.xlane.f32.xlu0 %v2819_v8 }
0x1665   :  { %v4994_v62 = vpop.eup %4993 }
0x1666   :  { %v2822_v51 = vsel %vm1997_vm6, %v4994_v62, 0.0 }
0x1679   :  { %2835 = vrot.lane.b32.xlu0 %v5662_v48, %s5052_s24 }
0x167d   :  { %4678 = vrot.lane.b32.xlu0 %v4677_v16, %s5052_s24 }
0x1681   :  { %4688 = vrot.lane.b32.xlu0 %v4687_v19, %s5051_s5 }
0x1685   :  { %2823 = vadd.xlane.f32.xlu1 %v2822_v51 }
0x1696   :  { %2889 = vrot.lane.b32.xlu1 %v5734_v39, %s5052_s24 }
0x169a   :  { %4683 = vrot.lane.b32.xlu1 %v4682_v32, %s5052_s24 }
0x169e   :  { %4693 = vrot.lane.b32.xlu1 %v4692_v13, %s5051_s5 }
0x16d7   :  { %v2815_v7 = vpop.xlane.xlu0 %2814 }
0x16d9   :  { %v2818_v48 = vpop.xlane.xlu1 %2817 }
0x16da   :  { %4995 = vrcp.f32 %v2818_v48 }
0x16db   :  { %4997 = vrcp.f32 %v2815_v7 }
0x16dd   :  { %v2888_v15 = vpop.permute.xlu1 %2887 }
0x16de   :  { %4611 = vmatpush3.bf16.msra.mxu1 %v2888_v15 }
0x16df   :  { %4612 = vmatprep.subr.bf16.mxu1 %v5048_v31 }
0x16e1   :  { %v2838_v39 = vpop.permute.xlu1 %2837 }
0x16e2   :  { %v2844_v28 = vsel %vm2051_vm5, %v2838_v39, 0 }
0x16e4   :  { %v4996_v16 = vpop.eup %4995 }
0x16e5   :  { %v4998_v18 = vpop.eup %4997  ;;  %v2830_v19 = vmul.f32 %v4996_v16, %v4990_v58 }
0x16e6   :  { %v2829_v12 = vmul.f32 %v4998_v18, %v4988_v55 }
0x16e8   :  { %v2833_v32 = vpack.c.bf16 %v2830_v19, %v2829_v12 }
0x16f0   :  { %v2821_v38 = vpop.xlane.xlu0 %2820 }
0x16f1   :  { %4999 = vrcp.f32 %v2821_v38 }
0x16f4   :  { %v2836_v17 = vpop.permute.xlu0 %2835 }
0x16f5   :  { %4603 = vmatpush3.bf16.msra.mxu0 %v2836_v17 }
0x16f6   :  { %4604 = vmatprep.subr.bf16.mxu0 %v5048_v31  ;;  %v4779_v31 = vld [vmem:[%s6243_s10] sm:$0xff]  }
0x16f8   :  { %v4679_v56 = vpop.permute.xlu0 %4678 }
0x16f9   :  { %4605 = vmatpush3.bf16.msra.mxu0 %v2844_v28  ;;  %v4681_v61 = vunpack.i.h.bf16 %v4679_v56  ;;  %v4680_v0 = vunpack.i.l.bf16 %v4679_v56 }
0x16fa   :  { %4618 = vmatprep.subr.bf16.mxu0 %v4779_v31 }
0x16fb   :  { %v5000_v25 = vpop.eup %4999  ;;  %v2988_v8 = vsel %vm372_vm1, %v5759_v53, %v4681_v61  ;;  %v2987_v9 = vsel %vm372_vm1, %v5757_v30, %v4680_v0 }
0x16fc   :  { %4607 = vmatmul.mubr.msk.bf16.vlgmr.msra.gmra.mrb[72].mxu0 %vm1997_vm6, %v2833_v32  ;;  %v2831_v14 = vmul.f32 %v5000_v25, %v4992_v6  ;;  %v4689_v58 = vpop.permute.xlu0 %4688 }
0x16fd   :  { %4619 = vmatpush3.bf16.msra.mxu0 %v4779_v31  ;;  %v4691_v1 = vunpack.i.h.bf16 %v4689_v58  ;;  %v4690_v5 = vunpack.i.l.bf16 %v4689_v58 }
0x16fe   :  { %4620 = vmatprep.subr.bf16.mxu0 %v4780_v41 }
0x16ff   :  { %v2992_v51 = vsel %vm1388_vm3, %v2988_v8, %v4691_v1 }
0x1701   :  { %4621 = vmatpush3.bf16.msra.mxu0 %v4780_v41 }
0x1702   :  { %4622 = vmatprep.subr.bf16.mxu0 %v4781_v43 }
0x1705   :  { %4623 = vmatpush3.bf16.msra.mxu0 %v4781_v43 }
0x1706   :  { %4624 = vmatprep.subr.bf16.mxu0 %v4782_v44 }
0x1709   :  { %4625 = vmatpush3.bf16.msra.mxu0 %v4782_v44  ;;  %v4787_v44 = vld [vmem:[%s6245_s12] ss:$16 sps:$4 sm:$0xff]  }
0x170a   :  { %4626 = vmatprep.subr.bf16.mxu0 %v4783_v63 }
0x170d   :  { %4627 = vmatpush3.bf16.msra.mxu0 %v4783_v63  ;;  %v4798_v63 = vld [vmem:[%s6245_s12 + $0x2c] ss:$16 sps:$4 sm:$0xff]  }
0x170e   :  { %4628 = vmatprep.subr.bf16.mxu0 %v4784_v47 }
0x1711   :  { %4629 = vmatpush3.bf16.msra.mxu0 %v4784_v47  ;;  %v4793_v47 = vld [vmem:[%s6245_s12 + $0x20] ss:$16 sps:$4 sm:$0xff]  }
0x1712   :  { %v2824_v50 = vpop.xlane.xlu1 %2823  ;;  %4630 = vmatprep.subr.bf16.mxu0 %v4785_v52 }
0x1713   :  { %5001 = vrcp.f32 %v2824_v50 }
0x1715   :  { %4631 = vmatpush3.bf16.msra.mxu0 %v4785_v52  ;;  %v4796_v52 = vld [vmem:[%s6245_s12 + $0x28] ss:$16 sps:$4 sm:$0xff]  }
0x1716   :  { %v2890_v20 = vpop.permute.xlu1 %2889  ;;  %4632 = vmatprep.subr.bf16.mxu0 %v4786_v26 }
0x1717   :  { %v2896_v23 = vsel %vm2051_vm5, %v2890_v20, 0 }
0x1718   :  { %4613 = vmatpush3.bf16.msra.mxu1 %v2896_v23 }
0x1719   :  { %4633 = vmatpush3.bf16.msra.mxu0 %v4786_v26 }
0x171a   :  { %v4684_v38 = vpop.permute.xlu1 %4683 }
0x171b   :  { %v4686_v17 = vunpack.i.h.bf16 %v4684_v38  ;;  %v4685_v18 = vunpack.i.l.bf16 %v4684_v38  ;;  %v4805_v38 = vld [vmem:[%s6245_s12 + $0x60] ss:$16 sps:$4 sm:$0xff]  }
0x171d   :  { %v5002_v37 = vpop.eup %5001  ;;  %v2990_v30 = vsel %vm372_vm1, %v5765_v59, %v4686_v17  ;;  %v2989_v12 = vsel %vm372_vm1, %v5763_v57, %v4685_v18  ;;  %v4080_v59 = vld [vmem:[%s6244_s11] ss:$0 sm:$0xff]  ;;  %v4813_v17 = vld [vmem:[%s6245_s12 + $0x84] ss:$16 sps:$4 sm:$0xff]   ;;  %v4816_v18 = vld [vmem:[%s6245_s12 + $0x8c] ss:$16 sps:$4 sm:$0xff]  }
0x171e   :  { %v2832_v60 = vmul.f32 %v5002_v37, %v4994_v62  ;;  %v2991_v62 = vsel %vm1388_vm3, %v2987_v9, %v4690_v5  ;;  %v4694_v16 = vpop.permute.xlu1 %4693 }
0x171f   :  { %v4696_v53 = vunpack.i.h.bf16 %v4694_v16  ;;  %v4695_v39 = vunpack.i.l.bf16 %v4694_v16  ;;  %v4808_v16 = vld [vmem:[%s6245_s12 + $0x68] ss:$16 sps:$4 sm:$0xff]  }
0x1720   :  { %v2834_v40 = vpack.c.bf16 %v2832_v60, %v2831_v14 }
0x1721   :  { %v2993_v50 = vsel %vm1388_vm3, %v2989_v12, %v4695_v39  ;;  %v2994_v20 = vsel %vm1388_vm3, %v2990_v30, %v4696_v53  ;;  %v4811_v53 = vld [vmem:[%s6245_s12 + $0x80] ss:$16 sps:$4 sm:$0xff]   ;;  %v4814_v39 = vld [vmem:[%s6245_s12 + $0x88] ss:$16 sps:$4 sm:$0xff]   ;;  %v4822_v30 = vld [vmem:[%s6245_s12 + $0xac] ss:$16 sps:$4 sm:$0xff]  }
0x1722   :  { %4615 = vmatmul.mubr.msk.bf16.vlgmr.msra.gmra.mrb[80].mxu1 %vm1997_vm6, %v2834_v40  ;;  %v4817_v12 = vld [vmem:[%s6245_s12 + $0xa0] ss:$16 sps:$4 sm:$0xff]  }
0x1723   :  { %3439 = vmatprep.mubr.bf16.mxu1 %v5047_v2 }
0x17cf   :  { %v2880_v42 = vpop.f32.mrb[72].mxu0 }
0x17d0   :  { %v4608_v13 = vpop.f32.mrb[73].mxu0 }
0x17d1   :  { %v2883_v29 = vpop.f32.mrb[74].mxu0 }
0x17d2   :  { %v4697_v3 = vpack.i.bf16 %v2883_v29, %v2880_v42  ;;  %v4609_v27 = vpop.f32.mrb[75].mxu0 }
0x17d4   :  { %4698 = vrot.lane.b32.xlu0 %v4697_v3, %s5050_s1 }
0x17f5   :  { %v2932_v24 = vpop.f32.mrb[80].mxu1 }
0x17f6   :  { %v4616_v45 = vpop.f32.mrb[81].mxu1 }
0x17f7   :  { %v2935_v46 = vpop.f32.mrb[82].mxu1 }
0x17f8   :  { %v4702_v54 = vpack.i.bf16 %v2935_v46, %v2932_v24  ;;  %v4617_v55 = vpop.f32.mrb[83].mxu1 }
0x17fa   :  { %4703 = vrot.lane.b32.xlu1 %v4702_v54, %s5050_s1 }
0x1846   :  { %v4699_v6 = vpop.permute.xlu0 %4698 }
0x1847   :  { %v4701_v10 = vunpack.i.h.bf16 %v4699_v6  ;;  %v4700_v11 = vunpack.i.l.bf16 %v4699_v6 }
0x1849   :  { %v2995_v48 = vsel %vm1393_vm4, %v2991_v62, %v4700_v11  ;;  %v2996_v15 = vsel %vm1393_vm4, %v2992_v51, %v4701_v10  ;;  %v4801_v11 = vld [vmem:[%s6245_s12 + $0x44] ss:$16 sps:$4 sm:$0xff]   ;;  %v4804_v62 = vld [vmem:[%s6245_s12 + $0x4c] ss:$16 sps:$4 sm:$0xff]   ;;  %v4799_v51 = vld [vmem:[%s6245_s12 + $0x40] ss:$16 sps:$4 sm:$0xff]  }
0x184a   :  { %v2999_v7 = vpack.c.bf16 %v2996_v15, %v2995_v48  ;;  %v4802_v48 = vld [vmem:[%s6245_s12 + $0x48] ss:$16 sps:$4 sm:$0xff]   ;;  %v4807_v15 = vld [vmem:[%s6245_s12 + $0x64] ss:$16 sps:$4 sm:$0xff]  }
0x184c   :  { %4634 = vmatprep.mubr.bf16.mxu0 %v2999_v7  ;;  %v4810_v7 = vld [vmem:[%s6245_s12 + $0x6c] ss:$16 sps:$4 sm:$0xff]  }
0x186c   :  { %v4704_v19 = vpop.permute.xlu1 %4703 }
0x186d   :  { %v4706_v28 = vunpack.i.h.bf16 %v4704_v19  ;;  %v4705_v32 = vunpack.i.l.bf16 %v4704_v19  ;;  %v4819_v19 = vld [vmem:[%s6245_s12 + $0xa4] ss:$16 sps:$4 sm:$0xff]  }
0x186f   :  { %v2998_v23 = vsel %vm1393_vm4, %v2994_v20, %v4706_v28  ;;  %v2997_v25 = vsel %vm1393_vm4, %v2993_v50, %v4705_v32  ;;  %v4820_v28 = vld [vmem:[%s6245_s12 + $0xa8] ss:$16 sps:$4 sm:$0xff]   ;;  %v4825_v32 = vld [vmem:[%s6245_s12 + $0xc4] ss:$16 sps:$4 sm:$0xff]   ;;  %v4828_v50 = vld [vmem:[%s6245_s12 + $0xcc] ss:$16 sps:$4 sm:$0xff]  }
0x1870   :  { %v3000_v37 = vpack.c.bf16 %v2998_v23, %v2997_v25  ;;  %v4823_v20 = vld [vmem:[%s6245_s12 + $0xc0] ss:$16 sps:$4 sm:$0xff]   ;;  %v4826_v23 = vld [vmem:[%s6245_s12 + $0xc8] ss:$16 sps:$4 sm:$0xff]   ;;  %v4831_v25 = vld [vmem:[%s6245_s12 + $0xe4] ss:$16 sps:$4 sm:$0xff]  }
0x1872   :  { %4635 = vmatmul.mubr.bf16.vlgmr.msra.gmra.mrb[76].mxu0 %v3000_v37  ;;  %v4834_v37 = vld [vmem:[%s6245_s12 + $0xec] ss:$16 sps:$4 sm:$0xff]  }
0x1873   :  { %3492 = vmatprep.mubr.bf16.mxu0 %v5047_v2 }
0x1945   :  { %v4636_v14 = vpop.f32.mrb[76].mxu0 }
0x1946   :  { %v3106_v57 = vpop.f32.mrb[77].mxu0  ;;  %v3115_v41 = vadd.f32 %v4636_v14, %v4080_v59  ;;  %v4832_v14 = vld [vmem:[%s6245_s12 + $0xe8] ss:$16 sps:$4 sm:$0xff]  }
0x1947   :  { %v3107_v60 = vadd.f32 %v4080_v59, %v3106_v57  ;;  %v4637_v40 = vpop.f32.mrb[78].mxu0  ;;  %v4835_v57 = vld [vmem:[%s6247_s14 + $0x40] sm:$0xff]  }
0x1948   :  { %v3109_v31 = vpop.f32.mrb[79].mxu0  ;;  %v3123_v29 = vadd.f32 %v3115_v41, %v5647_v35  ;;  %v3118_v3 = vadd.f32 %v4637_v40, %v4080_v59  ;;  %v4792_v35 = vld [vmem:[%s6245_s12 + $0xc] ss:$16 sps:$4 sm:$0xff]  }
0x1949   :  { %v3121_v42 = vadd.f32 %v3107_v60, %v5640_v21  ;;  %v3110_v13 = vadd.f32 %v4080_v59, %v3109_v31  ;;  %v4789_v21 = vld [vmem:[%s6245_s12 + $0x4] ss:$16 sps:$4 sm:$0xff]   ;;  %3460 = vmatprep.subr.bf16.mxu0 %v4792_v35  ;;  %v4829_v59 = vld [vmem:[%s6245_s12 + $0xe0] ss:$16 sps:$4 sm:$0xff]  }
0x194a   :  { %v3124_v27 = vadd.f32 %v3118_v3, %v5649_v4  ;;  %v4795_v4 = vld [vmem:[%s6245_s12 + $0x24] ss:$16 sps:$4 sm:$0xff]   ;;  %3407 = vmatprep.subr.bf16.mxu1 %v4789_v21 }
0x194b   :  { %v3122_v43 = vadd.f32 %v3110_v13, %v5642_v22  ;;  %3125 = vadd.xlane.f32.xlu0 %v3121_v42  ;;  %v4790_v22 = vld [vmem:[%s6245_s12 + $0x8] ss:$16 sps:$4 sm:$0xff]   ;;  %3408 = vmatpush1.bf16.msra.mxu1 %v4787_v44  ;;  %v4836_v60 = vld [vmem:[%s6247_s14 + $0xc0] sm:$0xff]  }
0x194c   :  { %3461 = vmatpush1.bf16.msra.mxu0 %v4790_v22  ;;  %3409 = vmatprep.subr.bf16.mxu1 %v4795_v4  ;;  %v4089_v4 = vld [vmem:[%s6251_s18] ss:$0 sm:$0xff] }
0x194d   :  { %3127 = vadd.xlane.f32.xlu1 %v3122_v43  ;;  %3462 = vmatprep.subr.bf16.mxu0 %v4798_v63 }
0x194f   :  { %3129 = vadd.xlane.f32.xlu0 %v3123_v29  ;;  %3410 = vmatpush1.bf16.msra.mxu1 %v4793_v47 }
0x1950   :  { %3463 = vmatpush1.bf16.msra.mxu0 %v4796_v52  ;;  %3411 = vmatprep.subr.bf16.mxu1 %v4801_v11 }
0x1951   :  { %3464 = vmatprep.subr.bf16.mxu0 %v4804_v62  ;;  %v4841_v62 = vld [vmem:[%s6247_s14 + $0x8] sm:$0xff]  }
0x1953   :  { %3131 = vadd.xlane.f32.xlu0 %v3124_v27  ;;  %3412 = vmatpush1.bf16.msra.mxu1 %v4799_v51  ;;  %v4842_v51 = vld [vmem:[%s6247_s14 + $0x88] sm:$0xff]  }
0x1954   :  { %3465 = vmatpush1.bf16.msra.mxu0 %v4802_v48  ;;  %3413 = vmatprep.subr.bf16.mxu1 %v4807_v15  ;;  %v4843_v48 = vld [vmem:[%s6247_s14 + $0x50] sm:$0xff]  }
0x1955   :  { %3466 = vmatprep.subr.bf16.mxu0 %v4810_v7 }
0x1957   :  { %3414 = vmatpush1.bf16.msra.mxu1 %v4805_v38  ;;  %v4845_v38 = vld [vmem:[%s6247_s14 + $0x10] sm:$0xff]  }
0x1958   :  { %3467 = vmatpush1.bf16.msra.mxu0 %v4808_v16  ;;  %3415 = vmatprep.subr.bf16.mxu1 %v4813_v17  ;;  %v4846_v16 = vld [vmem:[%s6247_s14 + $0x90] sm:$0xff]   ;;  %v4847_v17 = vld [vmem:[%s6247_s14 + $0x58] sm:$0xff]  }
0x1959   :  { %3468 = vmatprep.subr.bf16.mxu0 %v4816_v18  ;;  %v4848_v18 = vld [vmem:[%s6247_s14 + $0xd8] sm:$0xff]  }
0x195b   :  { %3416 = vmatpush1.bf16.msra.mxu1 %v4811_v53  ;;  %v4849_v53 = vld [vmem:[%s6247_s14 + $0x18] sm:$0xff]  }
0x195c   :  { %3469 = vmatpush1.bf16.msra.mxu0 %v4814_v39  ;;  %3417 = vmatprep.subr.bf16.mxu1 %v4819_v19  ;;  %v4850_v39 = vld [vmem:[%s6247_s14 + $0x98] sm:$0xff]   ;;  %v4851_v19 = vld [vmem:[%s6247_s14 + $0x60] sm:$0xff]  }
0x195d   :  { %3470 = vmatprep.subr.bf16.mxu0 %v4822_v30  ;;  %v4852_v30 = vld [vmem:[%s6247_s14 + $0xe0] sm:$0xff]  }
0x195f   :  { %3418 = vmatpush1.bf16.msra.mxu1 %v4817_v12  ;;  %v4853_v12 = vld [vmem:[%s6247_s14 + $0x20] sm:$0xff]  }
0x1960   :  { %3471 = vmatpush1.bf16.msra.mxu0 %v4820_v28  ;;  %3419 = vmatprep.subr.bf16.mxu1 %v4825_v32  ;;  %v4854_v28 = vld [vmem:[%s6247_s14 + $0xa0] sm:$0xff]   ;;  %v4855_v32 = vld [vmem:[%s6247_s14 + $0x68] sm:$0xff]  }
0x1961   :  { %3472 = vmatprep.subr.bf16.mxu0 %v4828_v50  ;;  %v4856_v50 = vld [vmem:[%s6247_s14 + $0xe8] sm:$0xff]  }
0x1963   :  { %3420 = vmatpush1.bf16.msra.mxu1 %v4823_v20  ;;  %v4857_v20 = vld [vmem:[%s6247_s14 + $0x28] sm:$0xff]  }
0x1964   :  { %3473 = vmatpush1.bf16.msra.mxu0 %v4826_v23  ;;  %3421 = vmatprep.subr.bf16.mxu1 %v4831_v25  ;;  %v4858_v23 = vld [vmem:[%s6247_s14 + $0xa8] sm:$0xff]   ;;  %v4859_v25 = vld [vmem:[%s6247_s14 + $0x70] sm:$0xff]  }
0x1965   :  { %3474 = vmatprep.subr.bf16.mxu0 %v4834_v37  ;;  %v4860_v37 = vld [vmem:[%s6247_s14 + $0xf0] sm:$0xff]  }
0x1967   :  { %3422 = vmatpush1.bf16.msra.mxu1 %v4829_v59  ;;  %v4861_v59 = vld [vmem:[%s6247_s14 + $0x30] sm:$0xff]  }
0x1968   :  { %3475 = vmatpush1.bf16.msra.mxu0 %v4832_v14  ;;  %4278 = vmatprep.subr.bf16.mxu1 %v4835_v57  ;;  %v4862_v14 = vld [vmem:[%s6247_s14 + $0xb0] sm:$0xff]   ;;  %v4863_v57 = vld [vmem:[%s6247_s14 + $0x78] sm:$0xff]  }
0x1969   :  { %4306 = vmatprep.subr.bf16.mxu0 %v4836_v60  ;;  %v4864_v60 = vld [vmem:[%s6247_s14 + $0xf8] sm:$0xff]  }
0x19d8   :  { %v3126_v26 = vpop.xlane.xlu0 %3125 }
0x19d9   :  { %v3133_v24 = vmul.f32 0.0078125, %v3126_v26 }
0x19da   :  { %v3128_v45 = vpop.xlane.xlu1 %3127 }
0x19db   :  { %v5992_v46 = vsub.f32 %v3121_v42, %v3133_v24  ;;  %v3134_v54 = vmul.f32 0.0078125, %v3128_v45  ;;  %v4090_v45 = vld [vmem:[%s6252_s19] ss:$0 sm:$0xff] }
0x19dc   :  { %v3130_v55 = vpop.xlane.xlu0 %3129 }
0x19dd   :  { %v5994_v56 = vsub.f32 %v3122_v43, %v3134_v54  ;;  %v3135_v58 = vmul.f32 0.0078125, %v3130_v55  ;;  %v3141_v61 = vmul.f32 %v5992_v46, %v5992_v46 }
0x19df   :  { %v5998_v0 = vsub.f32 %v3123_v29, %v3135_v58  ;;  %3145 = vadd.xlane.f32.xlu0 %v3141_v61  ;;  %v3142_v1 = vmul.f32 %v5994_v56, %v5994_v56 }
0x19e0   :  { %v3132_v5 = vpop.xlane.xlu0 %3131 }
0x19e1   :  { %v3136_v6 = vmul.f32 0.0078125, %v3132_v5  ;;  %3147 = vadd.xlane.f32.xlu1 %v3142_v1  ;;  %v3143_v8 = vmul.f32 %v5998_v0, %v5998_v0 }
0x19e3   :  { %v6004_v9 = vsub.f32 %v3124_v27, %v3136_v6  ;;  %3149 = vadd.xlane.f32.xlu0 %v3143_v8  ;;  %v4838_v6 = vld [vmem:[%s6247_s14 + $0x80] sm:$0xff]   ;;  %v4839_v8 = vld [vmem:[%s6247_s14 + $0x48] sm:$0xff]  }
0x19e5   :  { %v3144_v10 = vmul.f32 %v6004_v9, %v6004_v9 }
0x19e7   :  { %3151 = vadd.xlane.f32.xlu1 %v3144_v10 }
0x1a6c   :  { %v3146_v40 = vpop.xlane.xlu0 %3145 }
0x1a6d   :  { %v3153_v31 = vmul.f32 0.0078125, %v3146_v40  ;;  %v4865_v40 = vld [vmem:[%s6247_s14 + $0x38] sm:$0xff]  }
0x1a6e   :  { %v3148_v41 = vpop.xlane.xlu1 %3147 }
0x1a6f   :  { %v3157_v42 = vadd.f32 1e-05, %v3153_v31  ;;  %v3154_v13 = vmul.f32 0.0078125, %v3148_v41  ;;  %v4866_v31 = vld [vmem:[%s6247_s14 + $0xb8] sm:$0xff]   ;;  %v3225_v41 = vld [vmem:[%s6246_s13] sm:$0xf] }
0x1a70   :  { %v3150_v43 = vpop.xlane.xlu0 %3149 }
0x1a71   :  { %5003 = vrsqrt.f32 %v3157_v42  ;;  %v3158_v29 = vadd.f32 1e-05, %v3154_v13  ;;  %v3155_v3 = vmul.f32 0.0078125, %v3150_v43  ;;  %v3241_v42 = vsub.s32 3, %v5263_v33 }
0x1a72   :  { %v3230_v13 = vrot.slane %v3225_v41, %v5266_v34  ;;  %v3238_v43 = vrot.slane %v3225_v41, %v129_v49 }
0x1a73   :  { %5005 = vrsqrt.f32 %v3158_v29  ;;  %v3159_v27 = vadd.f32 1e-05, %v3155_v3  ;;  %v3234_v29 = vrot.slane %v3225_v41, %v5272_v36  ;;  %v3242_v3 = vrot.slane %v3225_v41, %v3241_v42 }
0x1a74   :  { %v3152_v44 = vpop.xlane.xlu1 %3151 }
0x1a75   :  { %5007 = vrsqrt.f32 %v3159_v27  ;;  %v3156_v21 = vmul.f32 0.0078125, %v3152_v44 }
0x1a77   :  { %v3160_v22 = vadd.f32 1e-05, %v3156_v21 }
0x1a79   :  { %5009 = vrsqrt.f32 %v3160_v22 }
0x1a7b   :  { %v5004_v35 = vpop.eup %5003 }
0x1a7c   :  { %v3165_v63 = vmul.f32 %v5004_v35, %v5992_v46 }
0x1a7d   :  { %v5006_v47 = vpop.eup %5005 }
0x1a7e   :  { %v3166_v52 = vmul.f32 %v5006_v47, %v5994_v56  ;;  %v3176_v26 = vmul.f32 %v4089_v4, %v3165_v63  ;;  %v4837_v56 = vld [vmem:[%s6247_s14] sm:$0xff]  }
0x1a7f   :  { %v5008_v24 = vpop.eup %5007 }
0x1a80   :  { %v3177_v54 = vmul.f32 %v4089_v4, %v3166_v52  ;;  %v6094_v55 = vadd.f32 %v4090_v45, %v3176_v26  ;;  %v3167_v61 = vmul.f32 %v5008_v24, %v5998_v0  ;;  %v4840_v0 = vld [vmem:[%s6247_s14 + $0xc8] sm:$0xff]  }
0x1a82   :  { %v6096_v58 = vadd.f32 %v4090_v45, %v3177_v54  ;;  %v3178_v10 = vmul.f32 %v4089_v4, %v3167_v61 }
0x1a83   :  { %v5010_v1 = vpop.eup %5009 }
0x1a84   :  { %v3191_v46 = vpack.c.bf16 %v6096_v58, %v6094_v55  ;;  %v3168_v5 = vmul.f32 %v5010_v1, %v6004_v9  ;;  %v6130_v15 = vadd.f32 %v4090_v45, %v3178_v10 }
0x1a86   :  { %3440 = vmatmul.mubr.bf16.vlgmr.msra.gmra.mrb[84].mxu1 %v3191_v46  ;;  %3493 = vmatmul.mubr.bf16.vlgmr.msra.gmra.mrb[80].mxu0 %v3191_v46  ;;  %v3179_v9 = vmul.f32 %v4089_v4, %v3168_v5 }
0x1a87   :  { %3449 = vmatprep.mubr.bf16.mxu1 %v5047_v2  ;;  %3502 = vmatprep.mubr.bf16.mxu0 %v5047_v2  ;;  %v4844_v2 = vld [vmem:[%s6247_s14 + $0xd0] sm:$0xff]  }
0x1a88   :  { %v6116_v11 = vadd.f32 %v4090_v45, %v3179_v9  ;;  %4279 = vmatpush3.bf16.msra.mxu1 %v4837_v56  ;;  %4307 = vmatpush3.bf16.msra.mxu0 %v4838_v6 }
0x1a89   :  { %4280 = vmatprep.subr.bf16.mxu1 %v4839_v8  ;;  %4308 = vmatprep.subr.bf16.mxu0 %v4840_v0 }
0x1a8a   :  { %v3192_v7 = vpack.c.bf16 %v6116_v11, %v6130_v15 }
0x1a8c   :  { %4281 = vmatpush3.bf16.msra.mxu1 %v4841_v62  ;;  %4309 = vmatpush3.bf16.msra.mxu0 %v4842_v51 }
0x1a8d   :  { %4282 = vmatprep.subr.bf16.mxu1 %v4843_v48  ;;  %4310 = vmatprep.subr.bf16.mxu0 %v4844_v2 }
0x1a8e   :  { %3450 = vmatmul.mubr.bf16.gmra.mrb[88].mxu1 %v3192_v7  ;;  %3503 = vmatmul.mubr.bf16.gmra.mrb[84].mxu0 %v3192_v7 }
0x1a90   :  { %4283 = vmatpush3.bf16.msra.mxu1 %v4845_v38  ;;  %4311 = vmatpush3.bf16.msra.mxu0 %v4846_v16 }
0x1a91   :  { %4284 = vmatprep.subr.bf16.mxu1 %v4847_v17  ;;  %4312 = vmatprep.subr.bf16.mxu0 %v4848_v18 }
0x1a94   :  { %4285 = vmatpush3.bf16.msra.mxu1 %v4849_v53  ;;  %4313 = vmatpush3.bf16.msra.mxu0 %v4850_v39 }
0x1a95   :  { %4286 = vmatprep.subr.bf16.mxu1 %v4851_v19  ;;  %4314 = vmatprep.subr.bf16.mxu0 %v4852_v30 }
0x1a98   :  { %4287 = vmatpush3.bf16.msra.mxu1 %v4853_v12  ;;  %4315 = vmatpush3.bf16.msra.mxu0 %v4854_v28 }
0x1a99   :  { %4288 = vmatprep.subr.bf16.mxu1 %v4855_v32  ;;  %4316 = vmatprep.subr.bf16.mxu0 %v4856_v50 }
0x1a9c   :  { %4289 = vmatpush3.bf16.msra.mxu1 %v4857_v20  ;;  %4317 = vmatpush3.bf16.msra.mxu0 %v4858_v23 }
0x1a9d   :  { %4290 = vmatprep.subr.bf16.mxu1 %v4859_v25  ;;  %4318 = vmatprep.subr.bf16.mxu0 %v4860_v37 }
0x1aa0   :  { %4291 = vmatpush3.bf16.msra.mxu1 %v4861_v59  ;;  %4319 = vmatpush3.bf16.msra.mxu0 %v4862_v14 }
0x1aa1   :  { %4292 = vmatprep.subr.bf16.mxu1 %v4863_v57  ;;  %4320 = vmatprep.subr.bf16.mxu0 %v4864_v60 }
0x1aa4   :  { %4293 = vmatpush3.bf16.msra.mxu1 %v4865_v40  ;;  %4321 = vmatpush3.bf16.msra.mxu0 %v4866_v31 }
0x1b59   :  { %v3441_v27 = vpop.f32.mrb[84].mxu1  ;;  %v3494_v44 = vpop.f32.mrb[80].mxu0 }
0x1b5a   :  { %v3442_v21 = vadd.f32 %v3441_v27, %v3230_v13  ;;  %v3495_v22 = vadd.f32 %v3494_v44, %v3238_v43  ;;  %v3443_v35 = vpop.f32.mrb[85].mxu1  ;;  %v3496_v4 = vpop.f32.mrb[81].mxu0 }
0x1b5b   :  { %v3444_v63 = vadd.f32 %v3443_v35, %v3234_v29  ;;  %v3497_v47 = vadd.f32 %v3496_v4, %v3242_v3  ;;  %v3445_v52 = vpop.f32.mrb[86].mxu1  ;;  %v3498_v26 = vpop.f32.mrb[82].mxu0 }
0x1b5c   :  { %v3446_v24 = vadd.f32 %v3445_v52, %v3230_v13  ;;  %v3499_v45 = vadd.f32 %v3498_v26, %v3238_v43  ;;  %v3447_v54 = vpop.f32.mrb[87].mxu1  ;;  %v3500_v34 = vpop.f32.mrb[83].mxu0  ;;  %v3513_v49 = vmax.f32 %v3442_v21, 0.0  ;;  %v3515_v1 = vmax.f32 %v3495_v22, 0.0 }
0x1b5d   :  { %v3448_v61 = vadd.f32 %v3447_v54, %v3234_v29  ;;  %v3501_v33 = vadd.f32 %v3500_v34, %v3242_v3  ;;  %v3514_v5 = vmax.f32 %v3444_v63, 0.0  ;;  %v3516_v56 = vmax.f32 %v3497_v47, 0.0 }
0x1b5e   :  { %v3517_v36 = vmax.f32 %v3446_v24, 0.0  ;;  %v3519_v46 = vmax.f32 %v3499_v45, 0.0 }
0x1b5f   :  { %v3518_v6 = vmax.f32 %v3448_v61, 0.0  ;;  %v3520_v8 = vmax.f32 %v3501_v33, 0.0 }
0x1b60   :  { %v3529_v0 = vpack.c.bf16 %v3517_v36, %v3513_v49  ;;  %v3531_v10 = vpack.c.bf16 %v3519_v46, %v3515_v1 }
0x1b61   :  { %v3530_v9 = vpack.c.bf16 %v3518_v6, %v3514_v5  ;;  %v3532_v62 = vpack.c.bf16 %v3520_v8, %v3516_v56  ;;  %v3451_v51 = vpop.f32.mrb[88].mxu1  ;;  %v3504_v48 = vpop.f32.mrb[84].mxu0 }
0x1b62   :  { %v3452_v2 = vadd.f32 %v3451_v51, %v3230_v13  ;;  %v3505_v7 = vadd.f32 %v3504_v48, %v3238_v43  ;;  %v3453_v38 = vpop.f32.mrb[89].mxu1  ;;  %v3506_v16 = vpop.f32.mrb[85].mxu0 }
0x1b63   :  { %v3454_v17 = vadd.f32 %v3453_v38, %v3234_v29  ;;  %v3507_v18 = vadd.f32 %v3506_v16, %v3242_v3  ;;  %v3455_v53 = vpop.f32.mrb[90].mxu1  ;;  %v3508_v39 = vpop.f32.mrb[86].mxu0  ;;  %3832 = vmatprep.mubr.bf16.mxu1 %v3530_v9  ;;  %3881 = vmatprep.mubr.bf16.mxu0 %v3532_v62 }
0x1b64   :  { %v3456_v19 = vadd.f32 %v3455_v53, %v3230_v13  ;;  %v3509_v30 = vadd.f32 %v3508_v39, %v3238_v43  ;;  %v3457_v12 = vpop.f32.mrb[91].mxu1  ;;  %v3510_v28 = vpop.f32.mrb[87].mxu0  ;;  %3833 = vmatmul.mubr.bf16.vlgmr.msra.gmra.mrb[92].mxu1 %v3529_v0  ;;  %3882 = vmatmul.mubr.bf16.vlgmr.msra.gmra.mrb[88].mxu0 %v3531_v10  ;;  %v3521_v20 = vmax.f32 %v3452_v2, 0.0  ;;  %v3523_v23 = vmax.f32 %v3505_v7, 0.0 }
0x1b65   :  { %v3458_v32 = vadd.f32 %v3457_v12, %v3234_v29  ;;  %v3511_v50 = vadd.f32 %v3510_v28, %v3242_v3  ;;  %v3522_v59 = vmax.f32 %v3454_v17, 0.0  ;;  %v3524_v14 = vmax.f32 %v3507_v18, 0.0  ;;  %v4123_v29 = vld [vmem:[%s6248_s15] ss:$0 sm:$0xff] }
0x1b66   :  { %v3525_v25 = vmax.f32 %v3456_v19, 0.0  ;;  %v3527_v37 = vmax.f32 %v3509_v30, 0.0 }
0x1b67   :  { %v3526_v57 = vmax.f32 %v3458_v32, 0.0  ;;  %v3528_v60 = vmax.f32 %v3511_v50, 0.0 }
0x1b68   :  { %v3533_v40 = vpack.c.bf16 %v3525_v25, %v3521_v20  ;;  %v3535_v31 = vpack.c.bf16 %v3527_v37, %v3523_v23 }
0x1b69   :  { %v3534_v41 = vpack.c.bf16 %v3526_v57, %v3522_v59  ;;  %v3536_v42 = vpack.c.bf16 %v3528_v60, %v3524_v14 }
0x1b6b   :  { %3840 = vmatprep.mubr.bf16.mxu1 %v3534_v41  ;;  %3889 = vmatprep.mubr.bf16.mxu0 %v3536_v42 }
0x1b6c   :  { %3841 = vmatmul.mubr.bf16.gmra.mrb[96].mxu1 %v3533_v40  ;;  %3890 = vmatmul.mubr.bf16.gmra.mrb[92].mxu0 %v3535_v31 }
0x1c37   :  { %v4294_v13 = vpop.f32.mrb[92].mxu1  ;;  %v4322_v43 = vpop.f32.mrb[88].mxu0 }
0x1c38   :  { %v4295_v3 = vpop.f32.mrb[93].mxu1  ;;  %v4323_v27 = vpop.f32.mrb[89].mxu0 }
0x1c39   :  { %v4296_v44 = vadd.f32 %v4295_v3, %v4294_v13  ;;  %v4324_v21 = vadd.f32 %v4323_v27, %v4322_v43  ;;  %v4297_v22 = vpop.f32.mrb[94].mxu1  ;;  %v4325_v35 = vpop.f32.mrb[90].mxu0 }
0x1c3a   :  { %v4298_v4 = vpop.f32.mrb[95].mxu1  ;;  %v4326_v63 = vpop.f32.mrb[91].mxu0 }
0x1c3b   :  { %v3835_v47 = vadd.f32 %v4296_v44, %v4123_v29  ;;  %v4299_v52 = vadd.f32 %v4298_v4, %v4297_v22  ;;  %v4327_v26 = vadd.f32 %v4326_v63, %v4325_v35  ;;  %v4157_v44 = vld [vmem:[%s6254_s21] ss:$0 sm:$0xff] }
0x1c3d   :  { %v3884_v24 = vadd.f32 %v4324_v21, %v3835_v47  ;;  %v3838_v45 = vadd.f32 %v4299_v52, %v4123_v29 }
0x1c3f   :  { %v3887_v54 = vadd.f32 %v4327_v26, %v3838_v45  ;;  %v4300_v34 = vpop.f32.mrb[96].mxu1  ;;  %v4328_v61 = vpop.f32.mrb[92].mxu0  ;;  %v3898_v33 = vadd.f32 %v3884_v24, %v6094_v55 }
0x1c40   :  { %v4301_v49 = vpop.f32.mrb[97].mxu1  ;;  %v4329_v1 = vpop.f32.mrb[93].mxu0 }
0x1c41   :  { %v4302_v36 = vadd.f32 %v4301_v49, %v4300_v34  ;;  %v4330_v46 = vadd.f32 %v4329_v1, %v4328_v61  ;;  %v4303_v5 = vpop.f32.mrb[98].mxu1  ;;  %v4331_v56 = vpop.f32.mrb[94].mxu0  ;;  %3902 = vadd.xlane.f32.xlu0 %v3898_v33  ;;  %v3899_v6 = vadd.f32 %v3887_v54, %v6096_v58 }
0x1c42   :  { %v4304_v8 = vpop.f32.mrb[99].mxu1  ;;  %v4332_v0 = vpop.f32.mrb[95].mxu0 }
0x1c43   :  { %v3843_v10 = vadd.f32 %v4302_v36, %v4123_v29  ;;  %v4305_v9 = vadd.f32 %v4304_v8, %v4303_v5  ;;  %v4333_v62 = vadd.f32 %v4332_v0, %v4331_v56  ;;  %3904 = vadd.xlane.f32.xlu1 %v3899_v6 }
0x1c45   :  { %v3892_v51 = vadd.f32 %v4330_v46, %v3843_v10  ;;  %v3846_v48 = vadd.f32 %v4305_v9, %v4123_v29  ;;  %v4156_v29 = vld [vmem:[%s6253_s20] ss:$0 sm:$0xff]  ;;  %s5053_s20 = smov [#allocation2]  }
0x1c46   :  { %s3977_s25 = sshll.u32 %s5053_s20, 4  ;;  %s3978_s25 = int_to_ptr.vmem [resolvable:$true] %s3977_s25 }
0x1c47   :  { %v3895_v2 = vadd.f32 %v4333_v62, %v3846_v48  ;;  %v3900_v55 = vadd.f32 %v3892_v51, %v6130_v15  ;;  %s5023_s21 = scalar_lea.vmem %s3978_s25, 512  ;;  %p5028_p1 = scmp.lt.s32.totalorder %s3978_s25, %s3978_s25 }
0x1c48   :  { %p5024_p0 = scmp.ne.s32.totalorder %s3978_s25, %s5023_s21  ;;  %p5029_p2 = scmp.lt.s32.totalorder %s5023_s21, %s5023_s21 }
0x1c49   :  { %3906 = vadd.xlane.f32.xlu0 %v3900_v55  ;;  %v3901_v7 = vadd.f32 %v3895_v2, %v6116_v11 }
0x1c4a   :  { %p5030_p3 = por %p5029_p2, %p5028_p1 }
0x1c4b   :  { %3908 = vadd.xlane.f32.xlu1 %v3901_v7 }
0x1c4c   :  { %p5031_p4 = pnand %p5030_p3, %p5024_p0 }
0x1cce   :  { %v3903_v38 = vpop.xlane.xlu0 %3902 }
0x1ccf   :  { %v3910_v16 = vmul.f32 0.0078125, %v3903_v38 }
0x1cd0   :  { %v3905_v17 = vpop.xlane.xlu1 %3904 }
0x1cd1   :  { %v3914_v18 = vsub.f32 %v3898_v33, %v3910_v16  ;;  %v3911_v58 = vmul.f32 0.0078125, %v3905_v17 }
0x1cd3   :  { %v3915_v53 = vsub.f32 %v3899_v6, %v3911_v58  ;;  %v3918_v39 = vmul.f32 %v3914_v18, %v3914_v18 }
0x1cd5   :  { %3922 = vadd.xlane.f32.xlu0 %v3918_v39  ;;  %v3919_v19 = vmul.f32 %v3915_v53, %v3915_v53 }
0x1cd6   :  { %v3907_v30 = vpop.xlane.xlu0 %3906 }
0x1cd7   :  { %v3912_v12 = vmul.f32 0.0078125, %v3907_v30  ;;  %3924 = vadd.xlane.f32.xlu1 %v3919_v19 }
0x1cd8   :  { %v3909_v28 = vpop.xlane.xlu1 %3908 }
0x1cd9   :  { %v3916_v32 = vsub.f32 %v3900_v55, %v3912_v12  ;;  %v3913_v50 = vmul.f32 0.0078125, %v3909_v28 }
0x1cdb   :  { %v3917_v15 = vsub.f32 %v3901_v7, %v3913_v50  ;;  %v3920_v20 = vmul.f32 %v3916_v32, %v3916_v32 }
0x1cdd   :  { %3926 = vadd.xlane.f32.xlu0 %v3920_v20  ;;  %v3921_v11 = vmul.f32 %v3917_v15, %v3917_v15 }
0x1cdf   :  { %3928 = vadd.xlane.f32.xlu1 %v3921_v11 }
0x1d62   :  { %v3923_v23 = vpop.xlane.xlu0 %3922 }
0x1d63   :  { %v3930_v25 = vmul.f32 0.0078125, %v3923_v23 }
0x1d64   :  { %v3925_v37 = vpop.xlane.xlu1 %3924 }
0x1d65   :  { %v3934_v59 = vadd.f32 1e-05, %v3930_v25  ;;  %v3931_v14 = vmul.f32 0.0078125, %v3925_v37 }
0x1d67   :  { %5011 = vrsqrt.f32 %v3934_v59  ;;  %v3935_v57 = vadd.f32 1e-05, %v3931_v14 }
0x1d69   :  { %5013 = vrsqrt.f32 %v3935_v57 }
0x1d6a   :  { %v3927_v60 = vpop.xlane.xlu0 %3926 }
0x1d6b   :  { %v3932_v40 = vmul.f32 0.0078125, %v3927_v60 }
0x1d6c   :  { %v3929_v31 = vpop.xlane.xlu1 %3928 }
0x1d6d   :  { %v3936_v41 = vadd.f32 1e-05, %v3932_v40  ;;  %v3933_v42 = vmul.f32 0.0078125, %v3929_v31 }
0x1d6f   :  { %5015 = vrsqrt.f32 %v3936_v41  ;;  %v3937_v13 = vadd.f32 1e-05, %v3933_v42 }
0x1d71   :  { %v5012_v43 = vpop.eup %5011  ;;  %5017 = vrsqrt.f32 %v3937_v13 }
0x1d72   :  { %v3942_v3 = vmul.f32 %v5012_v43, %v3914_v18 }
0x1d73   :  { %v5014_v27 = vpop.eup %5013 }
0x1d74   :  { %v3953_v21 = vmul.f32 %v4156_v29, %v3942_v3  ;;  %v3943_v22 = vmul.f32 %v5014_v27, %v3915_v53 }
0x1d76   :  { %v3954_v35 = vmul.f32 %v4156_v29, %v3943_v22  ;;  %v3964_v4 = vadd.f32 %v4157_v44, %v3953_v21 }
0x1d78   :  { %v3965_v63 = vadd.f32 %v4157_v44, %v3954_v35  ;;  %3968 = vst [vmem:[#allocation2] sm:$0xff] %v3964_v4 }
0x1d79   :  { %v5016_v47 = vpop.eup %5015 }
0x1d7a   :  { %v3944_v52 = vmul.f32 %v5016_v47, %v3916_v32  ;;  %3969 = vst [vmem:[#allocation2 + $0x8] sm:$0xff] %v3965_v63 }
0x1d7b   :  { %v5018_v26 = vpop.eup %5017 }
0x1d7c   :  { %v3955_v24 = vmul.f32 %v4156_v29, %v3944_v52  ;;  %v3945_v45 = vmul.f32 %v5018_v26, %v3917_v15 }
0x1d7e   :  { %v3966_v54 = vadd.f32 %v4157_v44, %v3955_v24  ;;  %v3956_v34 = vmul.f32 %v4156_v29, %v3945_v45 }
0x1d80   :  { %3970 = vst [vmem:[#allocation2 + $0x10] sm:$0xff] %v3966_v54  ;;  %v3967_v61 = vadd.f32 %v4157_v44, %v3956_v34 }
0x1d82   :  { %3971 = vst [vmem:[#allocation2 + $0x18] sm:$0xff] %v3967_v61 }
0x1d83   :  { %5034 = shalt.err (!%p5031_p4)
}
0x1d84   :  { %s5035_s1 = scalar_lea.hbm %s6255_s22, 512 }
0x1d85   :  { %p5036_p5 = scmp.ne.s32.totalorder %s6255_s22, %s5035_s1  ;;  %p5039_p6 = scmp.lt.u32.totalorder %s5035_s1, %s6255_s22 }
0x1d87   :  { %p5041_p7 = pnand %p5039_p6, %p5036_p5 }
0x1d89   :  { %5044 = shalt.err (!%p5041_p7)
}
0x1d8a   :  { %s5054_s2 = smov 128   ;;  %s5055_s7 = smov 8  }
0x1d8b   :  { %3983 = dma.vmem_to_hbm [thread:$0]  %s3978_s25, 512, %s6255_s22, [#allocation3], %s5054_s2, %s5054_s2, %s5055_s7  }
0x1d8c   :  { %5045 = dma.done.wait [#allocation3], 512  }
0x1d8d   :  { %5046 = vsyncadd [#allocation3], 4294966784 }
0x1d8e   :  { %3987 = vsyncpa [#allocation3], 1 }

</bundles_post_ra>
